<compile_context>
chip_gen: v7x
topology: tpu7x:2x2x1
jax: 0.10.0
libtpu: 0.0.40
codegen_flags: <defaults>
</compile_context>

<pallas_src>
import functools

import jax
import jax.numpy as jnp
from jax import lax
from jax.experimental import pallas as pl
from jax.experimental.pallas import tpu as pltpu

_BN_EPS = 1e-5
_LANE = 128
_DEFAULT_TILE_M = 1024


def _round_up(x, m):
    return (x + m - 1) // m * m


def _cdiv(a, b):
    return (a + b - 1) // b


# ----------------------------- Pallas kernels ------------------------------ #

def _matmul_bias_kernel(p_ref, w_ref, b_ref, o_ref):
    # (TILE_M, K) bf16 @ (K, C) bf16 -> f32 accumulate, + (1, C) f32 bias.
    acc = jnp.dot(p_ref[...], w_ref[...], preferred_element_type=jnp.float32)
    o_ref[...] = (acc + b_ref[...]).astype(o_ref.dtype)


def _matmul_stats_kernel(p_ref, w_ref, y_ref, sum_ref, ssq_ref):
    # Conv-as-matmul plus per-tile BatchNorm partial statistics.  The conv
    # bias is intentionally absent (cancelled by the batch-mean subtraction).
    y = jnp.dot(p_ref[...], w_ref[...], preferred_element_type=jnp.float32)
    y_ref[...] = y.astype(y_ref.dtype)
    # Each grid step owns its own (8, C) stats rows -> "parallel"-safe; the
    # tiny cross-tile reduction happens in the wrapper.
    sum_ref[...] = jnp.broadcast_to(jnp.sum(y, axis=0, keepdims=True),
                                    sum_ref.shape)
    ssq_ref[...] = jnp.broadcast_to(jnp.sum(y * y, axis=0, keepdims=True),
                                    ssq_ref.shape)


def _affine_relu_matmul_stats_kernel(p_ref, w_ref, a_ref, b_ref,
                                     y_ref, sum_ref, ssq_ref,
                                     *, m_real, tile_m, need_mask):
    # Previous layer's BatchNorm+ReLU fused as a prologue on the im2col
    # patches (a/b are per-K-column scale/shift, i.e. the per-channel affine
    # tiled over the kh*kw taps), then the conv matmul + partial BN stats.
    p = jnp.maximum(p_ref[...].astype(jnp.float32) * a_ref[...] + b_ref[...],
                    0.0)
    if need_mask:
        # Zero the M-padding rows so they cannot pollute the batch statistics
        # (relu(shift) is generally nonzero on all-zero padded patch rows).
        rows_left = m_real - pl.program_id(0) * tile_m
        row_ids = lax.broadcasted_iota(jnp.int32, p.shape, 0)
        p = jnp.where(row_ids < rows_left, p, 0.0)
    y = jnp.dot(p.astype(jnp.bfloat16), w_ref[...],
                preferred_element_type=jnp.float32)
    y_ref[...] = y.astype(y_ref.dtype)
    sum_ref[...] = jnp.broadcast_to(jnp.sum(y, axis=0, keepdims=True),
                                    sum_ref.shape)
    ssq_ref[...] = jnp.broadcast_to(jnp.sum(y * y, axis=0, keepdims=True),
                                    ssq_ref.shape)


def _scale_shift_relu_kernel(y_ref, a_ref, b_ref, o_ref):
    # Training-mode BatchNorm folded into per-channel scale/shift, then ReLU.
    y = y_ref[...].astype(jnp.float32)
    o_ref[...] = jnp.maximum(y * a_ref[...] + b_ref[...], 0.0).astype(o_ref.dtype)


# ------------------------------- helpers ----------------------------------- #

def _vmem_cap_bytes():
    try:
        cap = getattr(pltpu.get_tpu_info(), "vmem_capacity_bytes", None)
        if cap:
            return int(cap)
    except Exception:
        pass
    return 64 << 20  # conservative fallback (v7x per-core VMEM)


def _compiler_params(vmem_need_bytes, num_tiles):
    cap = _vmem_cap_bytes()
    limit = int(min(max(int(vmem_need_bytes) + (2 << 20), 16 << 20),
                    (cap * 7) // 10))
    sem = ("parallel",) if num_tiles > 1 else ("arbitrary",)
    return pltpu.CompilerParams(dimension_semantics=sem,
                                vmem_limit_bytes=limit)


def _im2col(x_nhwc, kh, kw):
    # TODO(synk): replace with an in-kernel halo DMA (NHWC row tiles carrying a
    # (kh-1)-row halo + kh*kw shifted sub-slice dots into a VMEM accumulator)
    # to remove the kh*kw-fold HBM read inflation of materialized patches.
    n, h, w, c = x_nhwc.shape
    ho, wo = h - kh + 1, w - kw + 1
    cols = [x_nhwc[:, i:i + ho, j:j + wo, :]
            for i in range(kh) for j in range(kw)]
    patches = jnp.stack(cols, axis=3)                 # (N, Ho, Wo, KH*KW, C)
    return patches.reshape(n * ho * wo, kh * kw * c), (n, ho, wo)


def conv2d_pallas(x_nhwc, w_mat, *, kh, kw, bias=None, bn=None,
                  input_affine=None, fuse_bn_into_next=False,
                  tile_m=_DEFAULT_TILE_M):
    """Valid 2-D correlation as a tiled Pallas matmul.

    bias         : conv bias (path with no BatchNorm afterwards), bf16 output.
    bn           : (gamma, beta) -> training-mode BatchNorm2d (+ ReLU); the
                   conv bias is cancelled by the batch-mean subtraction.
    input_affine : (scale, shift) per *input* channel, applied with ReLU as an
                   in-kernel prologue on the patches (fuses the previous
                   layer's BatchNorm+ReLU into this conv).
    fuse_bn_into_next : with bn, return (raw bf16 output, scale, shift) instead
                   of applying this layer's BN+ReLU here.
    """
    patches, (n, ho, wo) = _im2col(x_nhwc.astype(jnp.bfloat16), kh, kw)
    m, k = patches.shape
    c_out = w_mat.shape[1]

    # NOTE: for deep U-Net levels (real K, C_out >= 128) v6e/v7x prefer
    # 256-multiple padding for the 256x256 MXU; at these channel counts the
    # kernel is memory/overhead bound, so lane (128) padding is used.
    k_pad = _round_up(k, _LANE)
    c_pad = _round_up(c_out, _LANE)

    tile_m = min(tile_m, _round_up(m, 16))
    num_tiles = _cdiv(m, tile_m)
    if num_tiles > 1 and num_tiles % 2 == 1:
        # Even tile count so v7x's two TensorCores split the parallel axis.
        tile_m = _round_up(_cdiv(m, num_tiles + 1), 16)
        num_tiles = _cdiv(m, tile_m)
    m_pad = num_tiles * tile_m

    # bf16 operands (f32 MXU accumulation), lane-dense K / C_out, padded in
    # bf16 (half the XLA-side temp traffic vs padding at f32).
    patches = jnp.pad(patches, ((0, m_pad - m), (0, k_pad - k)))
    w_p = jnp.pad(w_mat.astype(jnp.float32),
                  ((0, k_pad - k), (0, c_pad - c_out))).astype(jnp.bfloat16)

    p_spec = pl.BlockSpec((tile_m, k_pad), lambda i: (i, 0))
    w_spec = pl.BlockSpec((k_pad, c_pad), lambda i: (0, 0))        # resident
    y_spec = pl.BlockSpec((tile_m, c_pad), lambda i: (i, 0))
    cvec_spec = pl.BlockSpec((1, c_pad), lambda i: (0, 0))
    kvec_spec = pl.BlockSpec((1, k_pad), lambda i: (0, 0))
    stats_spec = pl.BlockSpec((8, c_pad), lambda i: (i, 0))

    mm_cost = pl.CostEstimate(
        flops=2 * m_pad * k_pad * c_pad, transcendentals=0,
        bytes_accessed=int(m_pad * k_pad * 2 + k_pad * c_pad * 2
                           + m_pad * c_pad * 2))
    # Per-step VMEM including the pipeline's double buffering (x2 on the tiled
    # operands) plus the f32 accumulator tile.
    mm_vmem = (2 * tile_m * k_pad * 2 + 2 * k_pad * c_pad * 2
               + 2 * tile_m * c_pad * 2 + tile_m * c_pad * 4
               + 4 * 8 * c_pad * 4 + 4 * k_pad * 4 + 4 * c_pad * 4)

    if bn is None:
        bias_p = jnp.pad(bias.astype(jnp.float32),
                         (0, c_pad - c_out)).reshape(1, c_pad)
        out = pl.pallas_call(
            _matmul_bias_kernel,
            out_shape=jax.ShapeDtypeStruct((m_pad, c_pad), jnp.bfloat16),
            grid=(num_tiles,),
            in_specs=[p_spec, w_spec, cvec_spec],
            out_specs=y_spec,
            compiler_params=_compiler_params(mm_vmem, num_tiles),
            cost_estimate=mm_cost,
        )(patches, w_p, bias_p)
        return out[:m, :c_out].reshape(n, ho, wo, c_out)

    gamma, beta = bn
    out_shapes = (jax.ShapeDtypeStruct((m_pad, c_pad), jnp.bfloat16),
                  jax.ShapeDtypeStruct((num_tiles * 8, c_pad), jnp.float32),
                  jax.ShapeDtypeStruct((num_tiles * 8, c_pad), jnp.float32))
    out_specs = (y_spec, stats_spec, stats_spec)

    if input_affine is None:
        y, sums, ssqs = pl.pallas_call(
            _matmul_stats_kernel,
            out_shape=out_shapes, grid=(num_tiles,),
            in_specs=[p_spec, w_spec], out_specs=out_specs,
            compiler_params=_compiler_params(mm_vmem, num_tiles),
            cost_estimate=mm_cost,
        )(patches, w_p)
    else:
        in_scale, in_shift = input_affine
        a_k = jnp.pad(jnp.tile(in_scale.astype(jnp.float32), kh * kw),
                      (0, k_pad - k)).reshape(1, k_pad)
        b_k = jnp.pad(jnp.tile(in_shift.astype(jnp.float32), kh * kw),
                      (0, k_pad - k)).reshape(1, k_pad)
        kern = functools.partial(_affine_relu_matmul_stats_kernel,
                                 m_real=m, tile_m=tile_m,
                                 need_mask=(m_pad > m))
        y, sums, ssqs = pl.pallas_call(
            kern,
            out_shape=out_shapes, grid=(num_tiles,),
            in_specs=[p_spec, w_spec, kvec_spec, kvec_spec],
            out_specs=out_specs,
            compiler_params=_compiler_params(mm_vmem, num_tiles),
            cost_estimate=mm_cost,
        )(patches, w_p, a_k, b_k)

    # Global batch statistics over the real M rows.  Padded rows contribute
    # exact zeros (bias dropped; padded rows masked in the fused prologue).
    # Each tile wrote its partial sum replicated over 8 sublanes -> /8.
    count = jnp.float32(m)
    total = jnp.sum(sums, axis=0) / 8.0
    total_sq = jnp.sum(ssqs, axis=0) / 8.0
    mean = total / count
    var = jnp.maximum(total_sq / count - mean * mean, 0.0)
    inv_std = lax.rsqrt(var + _BN_EPS)
    g = jnp.pad(gamma.astype(jnp.float32), (0, c_pad - c_out))
    b = jnp.pad(beta.astype(jnp.float32), (0, c_pad - c_out))
    scale = g * inv_std
    shift = b - mean * scale

    if fuse_bn_into_next:
        # Raw bf16 conv output + the affine the *next* conv applies in-kernel.
        y_nhwc = y[:m, :c_out].reshape(n, ho, wo, c_out)
        return y_nhwc, scale[:c_out], shift[:c_out]

    # Final layer: apply BatchNorm + ReLU in a tiled elementwise pass (f32).
    ew_vmem = 2 * tile_m * c_pad * 2 + 2 * tile_m * c_pad * 4 + 4 * c_pad * 4
    ew_cost = pl.CostEstimate(flops=3 * m_pad * c_pad, transcendentals=0,
                              bytes_accessed=int(m_pad * c_pad * 6
                                                 + 2 * c_pad * 4))
    out = pl.pallas_call(
        _scale_shift_relu_kernel,
        out_shape=jax.ShapeDtypeStruct((m_pad, c_pad), jnp.float32),
        grid=(num_tiles,),
        in_specs=[y_spec, cvec_spec, cvec_spec],
        out_specs=y_spec,
        compiler_params=_compiler_params(ew_vmem, num_tiles),
        cost_estimate=ew_cost,
    )(y, scale.reshape(1, c_pad), shift.reshape(1, c_pad))
    return out[:m, :c_out].reshape(n, ho, wo, c_out)


def _conv_weight_to_mat(w):
    # PyTorch Conv2d weight (C_out, C_in, KH, KW) -> (KH*KW*C_in, C_out)
    c_out, c_in, kh, kw = w.shape
    return jnp.transpose(w, (2, 3, 1, 0)).reshape(kh * kw * c_in, c_out)


def _convT_weight_to_mat(w):
    # ConvTranspose2d weight (C_in, C_out, KH, KW).  A stride-1 transposed conv
    # equals a valid correlation on a (K-1)-zero-padded input with the kernel
    # spatially flipped. -> (KH*KW*C_in, C_out)
    c_in, c_out, kh, kw = w.shape
    wf = w[:, :, ::-1, ::-1]
    return jnp.transpose(wf, (2, 3, 0, 1)).reshape(kh * kw * c_in, c_out)


# ------------------------------ parameter init ----------------------------- #

def init_params(key, in_channels, out_channels):
    ks = jax.random.split(key, 6)

    def u(k, shape, fan_in):
        bound = 1.0 / jnp.sqrt(float(fan_in))
        return jax.random.uniform(k, shape, jnp.float32, -bound, bound)

    p = {}
    # up_conv1: ConvTranspose2d(in, out, kernel_size=2)
    p["up_w"] = u(ks[0], (in_channels, out_channels, 2, 2), in_channels * 4)
    p["up_b"] = u(ks[1], (out_channels,), in_channels * 4)
    # doub.conv1: Conv2d(in, out, 3)  /  doub.conv2: Conv2d(out, out, 3)
    # Their biases exist in the PyTorch module but are cancelled exactly by the
    # training-mode BatchNorm mean subtraction, so they are never consumed.
    p["c1_w"] = u(ks[2], (out_channels, in_channels, 3, 3), in_channels * 9)
    p["c1_b"] = u(ks[3], (out_channels,), in_channels * 9)
    p["c2_w"] = u(ks[4], (out_channels, out_channels, 3, 3), out_channels * 9)
    p["c2_b"] = u(ks[5], (out_channels,), out_channels * 9)
    # BatchNorm2d default init: weight=1, bias=0
    p["g1"] = jnp.ones((out_channels,), jnp.float32)
    p["b1"] = jnp.zeros((out_channels,), jnp.float32)
    p["g2"] = jnp.ones((out_channels,), jnp.float32)
    p["b2"] = jnp.zeros((out_channels,), jnp.float32)
    return p


# ------------------------------ forward (NCHW) ----------------------------- #

def up_scale_forward(x_nchw, y_nchw, params):
    x = jnp.transpose(x_nchw, (0, 2, 3, 1)).astype(jnp.float32)  # -> NHWC
    y = jnp.transpose(y_nchw, (0, 2, 3, 1)).astype(jnp.float32)

    # nn.Upsample(scale_factor=2, mode='nearest')
    x = jnp.repeat(jnp.repeat(x, 2, axis=1), 2, axis=2)

    # ConvTranspose2d(in, out, kernel_size=2), stride 1 == valid correlation of
    # the 1-padded input with the spatially flipped kernel.
    # TODO(synk): fold upsample+pad+convT into a 4-phase subpixel conv on the
    # original x, and fuse the F.pad + channel concat below into conv1 as two
    # accumulated K-blocks, to avoid the upsampled/concatenated HBM temps.
    x = jnp.pad(x, ((0, 0), (1, 1), (1, 1), (0, 0)))
    x = conv2d_pallas(x, _convT_weight_to_mat(params["up_w"]),
                      bias=params["up_b"], kh=2, kw=2)          # bf16 output

    # F.pad to match skip-connection spatial size, then cat([y, x], channel)
    diff_y = y.shape[1] - x.shape[1]
    diff_x = y.shape[2] - x.shape[2]
    x = jnp.pad(x, ((0, 0),
                    (diff_y // 2, diff_y - diff_y // 2),
                    (diff_x // 2, diff_x - diff_x // 2),
                    (0, 0)))
    x = jnp.concatenate([y.astype(jnp.bfloat16), x.astype(jnp.bfloat16)],
                        axis=-1)

    # Double_Convolution (up_conv=False): conv3x3 -> BN -> ReLU, twice.
    # conv1's BN+ReLU is fused into conv2's kernel as an affine+ReLU prologue;
    # conv2's BN+ReLU runs as the final tiled elementwise pass.
    x, s1, t1 = conv2d_pallas(x, _conv_weight_to_mat(params["c1_w"]),
                              bn=(params["g1"], params["b1"]),
                              kh=3, kw=3, fuse_bn_into_next=True)
    x = conv2d_pallas(x, _conv_weight_to_mat(params["c2_w"]),
                      bn=(params["g2"], params["b2"]),
                      input_affine=(s1, t1), kh=3, kw=3)

    return jnp.transpose(x, (0, 3, 1, 2))  # back to NCHW


if __name__ == "__main__":
    key = jax.random.PRNGKey(0)
    kx, ky, kp = jax.random.split(key, 3)
    in_channels, out_channels = 8, 4

    # x: decoder feature map, y: encoder skip connection (both NCHW).
    x = jax.random.normal(kx, (2, in_channels, 8, 8), jnp.float32)
    y = jax.random.normal(ky, (2, out_channels, 20, 20), jnp.float32)
    params = init_params(kp, in_channels, out_channels)

    fwd = jax.jit(up_scale_forward)
    out = jax.block_until_ready(fwd(x, y, params))

    # x: 8x8 -> up 16x16 -> convT(2) 17x17 -> pad 20x20 -> conv3x3 18x18 -> conv3x3 16x16
    assert out.shape == (2, out_channels, 16, 16), out.shape
    assert bool(jnp.all(jnp.isfinite(out)))
    print("KERNEL_OK")
</pallas_src>

<mosaic_0001>
module attributes {stable_mosaic.version = 11 : i64} {
  func.func @_matmul_bias_kernel(%arg0: i32, %arg1: memref<592x128xbf16, #tpu.memory_space<vmem>>, %arg2: memref<128x128xbf16, #tpu.memory_space<vmem>>, %arg3: memref<1x128xf32, #tpu.memory_space<vmem>>, %arg4: memref<592x128xbf16, #tpu.memory_space<vmem>>) attributes {dimension_semantics = [#tpu.dimension_semantics<arbitrary>], iteration_bounds = array<i64: 1>, scalar_prefetch = 0 : i64, scratch_operands = 0 : i64, tpu.core_type = #tpu.core_type<tc>, window_params = [{transform_indices = @transform_0, window_bounds = array<i64: 592, 128>}, {pipeline_mode = #tpu.pipeline_mode<synchronous>, transform_indices = @transform_1, window_bounds = array<i64: 128, 128>}, {pipeline_mode = #tpu.pipeline_mode<synchronous>, transform_indices = @transform_2, window_bounds = array<i64: 1, 128>}, {transform_indices = @transform_3, window_bounds = array<i64: 592, 128>}]} {
    %c0 = arith.constant 0 : index
    %c0_0 = arith.constant 0 : index
    %0 = vector.load %arg1[%c0, %c0_0] : memref<592x128xbf16, #tpu.memory_space<vmem>>, vector<592x128xbf16>
    %c0_1 = arith.constant 0 : index
    %c0_2 = arith.constant 0 : index
    %1 = vector.load %arg2[%c0_1, %c0_2] : memref<128x128xbf16, #tpu.memory_space<vmem>>, vector<128x128xbf16>
    %cst = arith.constant dense<0.000000e+00> : vector<592x128xf32>
    %2 = tpu.matmul %0, %1, %cst {dimension_numbers = #tpu.dot_dimension_numbers<[1], [0], [0], [1], [0, 0, 1, 1], [], []>} : vector<592x128xbf16>, vector<128x128xbf16>, vector<592x128xf32> -> vector<592x128xf32>
    %c0_3 = arith.constant 0 : index
    %c0_4 = arith.constant 0 : index
    %3 = vector.load %arg3[%c0_3, %c0_4] : memref<1x128xf32, #tpu.memory_space<vmem>>, vector<1x128xf32>
    %4 = vector.broadcast %3 : vector<1x128xf32> to vector<592x128xf32>
    %5 = arith.addf %2, %4 : vector<592x128xf32>
    %6 = arith.truncf %5 : vector<592x128xf32> to vector<592x128xbf16>
    %c0_5 = arith.constant 0 : index
    %c0_6 = arith.constant 0 : index
    %7 = vector.load %arg4[%c0_5, %c0_6] : memref<592x128xbf16, #tpu.memory_space<vmem>>, vector<592x128xbf16>
    tpu.vector_store %arg4[%c0_5, %c0_6], %6 {strides = array<i32>} : memref<592x128xbf16, #tpu.memory_space<vmem>>, vector<592x128xbf16>,
    return
  }
  func.func @transform_0(%arg0: i32) -> (i32, i32) {
    %c0_i32 = arith.constant 0 : i32
    %c0_i32_0 = arith.constant 0 : i32
    return %arg0, %c0_i32 : i32, i32
  }
  func.func @transform_1(%arg0: i32) -> (i32, i32) {
    %c0_i32 = arith.constant 0 : i32
    %c0_i32_0 = arith.constant 0 : i32
    %c0_i32_1 = arith.constant 0 : i32
    return %c0_i32, %c0_i32_0 : i32, i32
  }
  func.func @transform_2(%arg0: i32) -> (i32, i32) {
    %c0_i32 = arith.constant 0 : i32
    %c0_i32_0 = arith.constant 0 : i32
    %c0_i32_1 = arith.constant 0 : i32
    return %c0_i32, %c0_i32_0 : i32, i32
  }
  func.func @transform_3(%arg0: i32) -> (i32, i32) {
    %c0_i32 = arith.constant 0 : i32
    %c0_i32_0 = arith.constant 0 : i32
    return %arg0, %c0_i32 : i32, i32
  }
}

module attributes {stable_mosaic.version = 11 : i64} {
  func.func @_matmul_stats_kernel(%arg0: i32, %arg1: memref<656x128xbf16, #tpu.memory_space<vmem>>, %arg2: memref<128x128xbf16, #tpu.memory_space<vmem>>, %arg3: memref<656x128xbf16, #tpu.memory_space<vmem>>, %arg4: memref<8x128xf32, #tpu.memory_space<vmem>>, %arg5: memref<8x128xf32, #tpu.memory_space<vmem>>) attributes {dimension_semantics = [#tpu.dimension_semantics<arbitrary>], iteration_bounds = array<i64: 1>, scalar_prefetch = 0 : i64, scratch_operands = 0 : i64, tpu.core_type = #tpu.core_type<tc>, window_params = [{transform_indices = @transform_0, window_bounds = array<i64: 656, 128>}, {pipeline_mode = #tpu.pipeline_mode<synchronous>, transform_indices = @transform_1, window_bounds = array<i64: 128, 128>}, {transform_indices = @transform_2, window_bounds = array<i64: 656, 128>}, {transform_indices = @transform_3, window_bounds = array<i64: 8, 128>}, {transform_indices = @transform_4, window_bounds = array<i64: 8, 128>}]} {
    %c0 = arith.constant 0 : index
    %c0_0 = arith.constant 0 : index
    %0 = vector.load %arg1[%c0, %c0_0] : memref<656x128xbf16, #tpu.memory_space<vmem>>, vector<656x128xbf16>
    %c0_1 = arith.constant 0 : index
    %c0_2 = arith.constant 0 : index
    %1 = vector.load %arg2[%c0_1, %c0_2] : memref<128x128xbf16, #tpu.memory_space<vmem>>, vector<128x128xbf16>
    %cst = arith.constant dense<0.000000e+00> : vector<656x128xf32>
    %2 = tpu.matmul %0, %1, %cst {dimension_numbers = #tpu.dot_dimension_numbers<[1], [0], [0], [1], [0, 0, 1, 1], [], []>} : vector<656x128xbf16>, vector<128x128xbf16>, vector<656x128xf32> -> vector<656x128xf32>
    %3 = arith.truncf %2 : vector<656x128xf32> to vector<656x128xbf16>
    %c0_3 = arith.constant 0 : index
    %c0_4 = arith.constant 0 : index
    %4 = vector.load %arg3[%c0_3, %c0_4] : memref<656x128xbf16, #tpu.memory_space<vmem>>, vector<656x128xbf16>
    tpu.vector_store %arg3[%c0_3, %c0_4], %3 {strides = array<i32>} : memref<656x128xbf16, #tpu.memory_space<vmem>>, vector<656x128xbf16>,
    %cst_5 = arith.constant dense<0.000000e+00> : vector<128xf32>
    %5 = vector.multi_reduction <add>, %2, %cst_5 [0] : vector<656x128xf32> to vector<128xf32>
    %6 = vector.shape_cast %5 : vector<128xf32> to vector<1x128xf32>
    %7 = vector.shape_cast %6 : vector<1x128xf32> to vector<1x128xf32>
    %8 = vector.broadcast %7 : vector<1x128xf32> to vector<8x128xf32>
    %c0_6 = arith.constant 0 : index
    %c0_7 = arith.constant 0 : index
    %9 = vector.load %arg4[%c0_6, %c0_7] : memref<8x128xf32, #tpu.memory_space<vmem>>, vector<8x128xf32>
    tpu.vector_store %arg4[%c0_6, %c0_7], %8 {strides = array<i32>} : memref<8x128xf32, #tpu.memory_space<vmem>>, vector<8x128xf32>,
    %10 = arith.mulf %2, %2 : vector<656x128xf32>
    %cst_8 = arith.constant dense<0.000000e+00> : vector<128xf32>
    %11 = vector.multi_reduction <add>, %10, %cst_8 [0] : vector<656x128xf32> to vector<128xf32>
    %12 = vector.shape_cast %11 : vector<128xf32> to vector<1x128xf32>
    %13 = vector.shape_cast %12 : vector<1x128xf32> to vector<1x128xf32>
    %14 = vector.broadcast %13 : vector<1x128xf32> to vector<8x128xf32>
    %c0_9 = arith.constant 0 : index
    %c0_10 = arith.constant 0 : index
    %15 = vector.load %arg5[%c0_9, %c0_10] : memref<8x128xf32, #tpu.memory_space<vmem>>, vector<8x128xf32>
    tpu.vector_store %arg5[%c0_9, %c0_10], %14 {strides = array<i32>} : memref<8x128xf32, #tpu.memory_space<vmem>>, vector<8x128xf32>,
    return
  }
  func.func @transform_0(%arg0: i32) -> (i32, i32) {
    %c0_i32 = arith.constant 0 : i32
    %c0_i32_0 = arith.constant 0 : i32
    return %arg0, %c0_i32 : i32, i32
  }
  func.func @transform_1(%arg0: i32) -> (i32, i32) {
    %c0_i32 = arith.constant 0 : i32
    %c0_i32_0 = arith.constant 0 : i32
    %c0_i32_1 = arith.constant 0 : i32
    return %c0_i32, %c0_i32_0 : i32, i32
  }
  func.func @transform_2(%arg0: i32) -> (i32, i32) {
    %c0_i32 = arith.constant 0 : i32
    %c0_i32_0 = arith.constant 0 : i32
    return %arg0, %c0_i32 : i32, i32
  }
  func.func @transform_3(%arg0: i32) -> (i32, i32) {
    %c0_i32 = arith.constant 0 : i32
    %c0_i32_0 = arith.constant 0 : i32
    return %arg0, %c0_i32 : i32, i32
  }
  func.func @transform_4(%arg0: i32) -> (i32, i32) {
    %c0_i32 = arith.constant 0 : i32
    %c0_i32_0 = arith.constant 0 : i32
    return %arg0, %c0_i32 : i32, i32
  }
}

module attributes {stable_mosaic.version = 11 : i64} {
  func.func @_scale_shift_relu_kernel(%arg0: i32, %arg1: memref<512x128xbf16, #tpu.memory_space<vmem>>, %arg2: memref<1x128xf32, #tpu.memory_space<vmem>>, %arg3: memref<1x128xf32, #tpu.memory_space<vmem>>, %arg4: memref<512x128xf32, #tpu.memory_space<vmem>>) attributes {dimension_semantics = [#tpu.dimension_semantics<arbitrary>], iteration_bounds = array<i64: 1>, scalar_prefetch = 0 : i64, scratch_operands = 0 : i64, tpu.core_type = #tpu.core_type<tc>, window_params = [{transform_indices = @transform_0, window_bounds = array<i64: 512, 128>}, {pipeline_mode = #tpu.pipeline_mode<synchronous>, transform_indices = @transform_1, window_bounds = array<i64: 1, 128>}, {pipeline_mode = #tpu.pipeline_mode<synchronous>, transform_indices = @transform_2, window_bounds = array<i64: 1, 128>}, {transform_indices = @transform_3, window_bounds = array<i64: 512, 128>}]} {
    %c0 = arith.constant 0 : index
    %c0_0 = arith.constant 0 : index
    %0 = vector.load %arg1[%c0, %c0_0] : memref<512x128xbf16, #tpu.memory_space<vmem>>, vector<512x128xbf16>
    %1 = arith.extf %0 : vector<512x128xbf16> to vector<512x128xf32>
    %c0_1 = arith.constant 0 : index
    %c0_2 = arith.constant 0 : index
    %2 = vector.load %arg2[%c0_1, %c0_2] : memref<1x128xf32, #tpu.memory_space<vmem>>, vector<1x128xf32>
    %3 = vector.broadcast %2 : vector<1x128xf32> to vector<512x128xf32>
    %4 = arith.mulf %1, %3 : vector<512x128xf32>
    %c0_3 = arith.constant 0 : index
    %c0_4 = arith.constant 0 : index
    %5 = vector.load %arg3[%c0_3, %c0_4] : memref<1x128xf32, #tpu.memory_space<vmem>>, vector<1x128xf32>
    %6 = vector.broadcast %5 : vector<1x128xf32> to vector<512x128xf32>
    %7 = arith.addf %4, %6 : vector<512x128xf32>
    %cst = arith.constant 0.000000e+00 : f32
    %8 = vector.broadcast %cst : f32 to vector<512x128xf32>
    %9 = arith.maximumf %7, %8 : vector<512x128xf32>
    %c0_5 = arith.constant 0 : index
    %c0_6 = arith.constant 0 : index
    %10 = vector.load %arg4[%c0_5, %c0_6] : memref<512x128xf32, #tpu.memory_space<vmem>>, vector<512x128xf32>
    tpu.vector_store %arg4[%c0_5, %c0_6], %9 {strides = array<i32>} : memref<512x128xf32, #tpu.memory_space<vmem>>, vector<512x128xf32>,
    return
  }
  func.func @transform_0(%arg0: i32) -> (i32, i32) {
    %c0_i32 = arith.constant 0 : i32
    %c0_i32_0 = arith.constant 0 : i32
    return %arg0, %c0_i32 : i32, i32
  }
  func.func @transform_1(%arg0: i32) -> (i32, i32) {
    %c0_i32 = arith.constant 0 : i32
    %c0_i32_0 = arith.constant 0 : i32
    %c0_i32_1 = arith.constant 0 : i32
    return %c0_i32, %c0_i32_0 : i32, i32
  }
  func.func @transform_2(%arg0: i32) -> (i32, i32) {
    %c0_i32 = arith.constant 0 : i32
    %c0_i32_0 = arith.constant 0 : i32
    %c0_i32_1 = arith.constant 0 : i32
    return %c0_i32, %c0_i32_0 : i32, i32
  }
  func.func @transform_3(%arg0: i32) -> (i32, i32) {
    %c0_i32 = arith.constant 0 : i32
    %c0_i32_0 = arith.constant 0 : i32
    return %arg0, %c0_i32 : i32, i32
  }
}

module attributes {stable_mosaic.version = 11 : i64} {
  func.func @_affine_relu_matmul_stats_kernel(%arg0: i32, %arg1: memref<512x128xbf16, #tpu.memory_space<vmem>>, %arg2: memref<128x128xbf16, #tpu.memory_space<vmem>>, %arg3: memref<1x128xf32, #tpu.memory_space<vmem>>, %arg4: memref<1x128xf32, #tpu.memory_space<vmem>>, %arg5: memref<512x128xbf16, #tpu.memory_space<vmem>>, %arg6: memref<8x128xf32, #tpu.memory_space<vmem>>, %arg7: memref<8x128xf32, #tpu.memory_space<vmem>>) attributes {dimension_semantics = [#tpu.dimension_semantics<arbitrary>], iteration_bounds = array<i64: 1>, scalar_prefetch = 0 : i64, scratch_operands = 0 : i64, tpu.core_type = #tpu.core_type<tc>, window_params = [{transform_indices = @transform_0, window_bounds = array<i64: 512, 128>}, {pipeline_mode = #tpu.pipeline_mode<synchronous>, transform_indices = @transform_1, window_bounds = array<i64: 128, 128>}, {pipeline_mode = #tpu.pipeline_mode<synchronous>, transform_indices = @transform_2, window_bounds = array<i64: 1, 128>}, {pipeline_mode = #tpu.pipeline_mode<synchronous>, transform_indices = @transform_3, window_bounds = array<i64: 1, 128>}, {transform_indices = @transform_4, window_bounds = array<i64: 512, 128>}, {transform_indices = @transform_5, window_bounds = array<i64: 8, 128>}, {transform_indices = @transform_6, window_bounds = array<i64: 8, 128>}]} {
    %c0 = arith.constant 0 : index
    %c0_0 = arith.constant 0 : index
    %0 = vector.load %arg1[%c0, %c0_0] : memref<512x128xbf16, #tpu.memory_space<vmem>>, vector<512x128xbf16>
    %1 = arith.extf %0 : vector<512x128xbf16> to vector<512x128xf32>
    %c0_1 = arith.constant 0 : index
    %c0_2 = arith.constant 0 : index
    %2 = vector.load %arg3[%c0_1, %c0_2] : memref<1x128xf32, #tpu.memory_space<vmem>>, vector<1x128xf32>
    %3 = vector.broadcast %2 : vector<1x128xf32> to vector<512x128xf32>
    %4 = arith.mulf %1, %3 : vector<512x128xf32>
    %c0_3 = arith.constant 0 : index
    %c0_4 = arith.constant 0 : index
    %5 = vector.load %arg4[%c0_3, %c0_4] : memref<1x128xf32, #tpu.memory_space<vmem>>, vector<1x128xf32>
    %6 = vector.broadcast %5 : vector<1x128xf32> to vector<512x128xf32>
    %7 = arith.addf %4, %6 : vector<512x128xf32>
    %cst = arith.constant 0.000000e+00 : f32
    %8 = vector.broadcast %cst : f32 to vector<512x128xf32>
    %9 = arith.maximumf %7, %8 : vector<512x128xf32>
    %10 = arith.truncf %9 : vector<512x128xf32> to vector<512x128xbf16>
    %c0_5 = arith.constant 0 : index
    %c0_6 = arith.constant 0 : index
    %11 = vector.load %arg2[%c0_5, %c0_6] : memref<128x128xbf16, #tpu.memory_space<vmem>>, vector<128x128xbf16>
    %cst_7 = arith.constant dense<0.000000e+00> : vector<512x128xf32>
    %12 = tpu.matmul %10, %11, %cst_7 {dimension_numbers = #tpu.dot_dimension_numbers<[1], [0], [0], [1], [0, 0, 1, 1], [], []>} : vector<512x128xbf16>, vector<128x128xbf16>, vector<512x128xf32> -> vector<512x128xf32>
    %13 = arith.truncf %12 : vector<512x128xf32> to vector<512x128xbf16>
    %c0_8 = arith.constant 0 : index
    %c0_9 = arith.constant 0 : index
    %14 = vector.load %arg5[%c0_8, %c0_9] : memref<512x128xbf16, #tpu.memory_space<vmem>>, vector<512x128xbf16>
    tpu.vector_store %arg5[%c0_8, %c0_9], %13 {strides = array<i32>} : memref<512x128xbf16, #tpu.memory_space<vmem>>, vector<512x128xbf16>,
    %cst_10 = arith.constant dense<0.000000e+00> : vector<128xf32>
    %15 = vector.multi_reduction <add>, %12, %cst_10 [0] : vector<512x128xf32> to vector<128xf32>
    %16 = vector.shape_cast %15 : vector<128xf32> to vector<1x128xf32>
    %17 = vector.shape_cast %16 : vector<1x128xf32> to vector<1x128xf32>
    %18 = vector.broadcast %17 : vector<1x128xf32> to vector<8x128xf32>
    %c0_11 = arith.constant 0 : index
    %c0_12 = arith.constant 0 : index
    %19 = vector.load %arg6[%c0_11, %c0_12] : memref<8x128xf32, #tpu.memory_space<vmem>>, vector<8x128xf32>
    tpu.vector_store %arg6[%c0_11, %c0_12], %18 {strides = array<i32>} : memref<8x128xf32, #tpu.memory_space<vmem>>, vector<8x128xf32>,
    %20 = arith.mulf %12, %12 : vector<512x128xf32>
    %cst_13 = arith.constant dense<0.000000e+00> : vector<128xf32>
    %21 = vector.multi_reduction <add>, %20, %cst_13 [0] : vector<512x128xf32> to vector<128xf32>
    %22 = vector.shape_cast %21 : vector<128xf32> to vector<1x128xf32>
    %23 = vector.shape_cast %22 : vector<1x128xf32> to vector<1x128xf32>
    %24 = vector.broadcast %23 : vector<1x128xf32> to vector<8x128xf32>
    %c0_14 = arith.constant 0 : index
    %c0_15 = arith.constant 0 : index
    %25 = vector.load %arg7[%c0_14, %c0_15] : memref<8x128xf32, #tpu.memory_space<vmem>>, vector<8x128xf32>
    tpu.vector_store %arg7[%c0_14, %c0_15], %24 {strides = array<i32>} : memref<8x128xf32, #tpu.memory_space<vmem>>, vector<8x128xf32>,
    return
  }
  func.func @transform_0(%arg0: i32) -> (i32, i32) {
    %c0_i32 = arith.constant 0 : i32
    %c0_i32_0 = arith.constant 0 : i32
    return %arg0, %c0_i32 : i32, i32
  }
  func.func @transform_1(%arg0: i32) -> (i32, i32) {
    %c0_i32 = arith.constant 0 : i32
    %c0_i32_0 = arith.constant 0 : i32
    %c0_i32_1 = arith.constant 0 : i32
    return %c0_i32, %c0_i32_0 : i32, i32
  }
  func.func @transform_2(%arg0: i32) -> (i32, i32) {
    %c0_i32 = arith.constant 0 : i32
    %c0_i32_0 = arith.constant 0 : i32
    %c0_i32_1 = arith.constant 0 : i32
    return %c0_i32, %c0_i32_0 : i32, i32
  }
  func.func @transform_3(%arg0: i32) -> (i32, i32) {
    %c0_i32 = arith.constant 0 : i32
    %c0_i32_0 = arith.constant 0 : i32
    %c0_i32_1 = arith.constant 0 : i32
    return %c0_i32, %c0_i32_0 : i32, i32
  }
  func.func @transform_4(%arg0: i32) -> (i32, i32) {
    %c0_i32 = arith.constant 0 : i32
    %c0_i32_0 = arith.constant 0 : i32
    return %arg0, %c0_i32 : i32, i32
  }
  func.func @transform_5(%arg0: i32) -> (i32, i32) {
    %c0_i32 = arith.constant 0 : i32
    %c0_i32_0 = arith.constant 0 : i32
    return %arg0, %c0_i32 : i32, i32
  }
  func.func @transform_6(%arg0: i32) -> (i32, i32) {
    %c0_i32 = arith.constant 0 : i32
    %c0_i32_0 = arith.constant 0 : i32
    return %arg0, %c0_i32 : i32, i32
  }
}

</mosaic_0001>

<bundles_post_ra>
// kernel: up_scale_forward.4
= control target key start
LH: loop header
LB: loop body
LE: loop exit
PB: predicated region body
PF: predicated region fallthrough
CT: control target
= control target key end

     0   :  { %v1772_v0 = vmov 0.0   ;;  %vm1773_vm0 = vmmov 0   ;;  %s2209_s1 = inlined_call_operand.vmem [shape: bf16[128,128], index: 1, kind: input, shape index: {}]   ;;  %s2210_s0 = inlined_call_operand.vmem [shape: bf16[592,128], index: 0, kind: input, shape index: {}]   ;;  %s2211_s2 = inlined_call_operand.vmem [shape: f32[1,128], index: 2, kind: input, shape index: {}]   ;;  %s2212_s3 = inlined_call_operand.vmem [shape: bf16[592,128], index: 3, kind: output, shape index: {}]  }
   0x1   :  { %1545 = vmatprep.subr.bf16.mxu0 %v1772_v0  ;;  %v1727_v1 = vld [vmem:[%s2209_s1] sm:$0xff]   ;;  %1709 = vmatprep.subr.bf16.mxu1 %v1772_v0  ;;  %v1728_v2 = vld [vmem:[%s2209_s1 + $0x8] sm:$0xff]   ;;  %v1729_v3 = vld [vmem:[%s2209_s1 + $0x10] sm:$0xff]  }
   0x2   :  { %1561 = vmatprep.mubr.msk.bf16.mxu0 %vm1773_vm0, %v1772_v0  ;;  %1637 = vmatprep.mubr.msk.bf16.mxu1 %vm1773_vm0, %v1772_v0  ;;  %v1730_v4 = vld [vmem:[%s2209_s1 + $0x18] sm:$0xff]   ;;  %v1731_v5 = vld [vmem:[%s2209_s1 + $0x20] sm:$0xff]   ;;  %v1732_v6 = vld [vmem:[%s2209_s1 + $0x28] sm:$0xff]  }
   0x3   :  { %1546 = vmatpush3.bf16.msra.mxu0 %v1727_v1  ;;  %1717 = vmatpush3.bf16.msra.mxu1 %v1727_v1  ;;  %v1733_v7 = vld [vmem:[%s2209_s1 + $0x30] sm:$0xff]   ;;  %v1734_v8 = vld [vmem:[%s2209_s1 + $0x38] sm:$0xff]   ;;  %v1735_v9 = vld [vmem:[%s2210_s0] sm:$0xff]  }
   0x4   :  { %1547 = vmatprep.subr.bf16.mxu0 %v1772_v0  ;;  %1710 = vmatprep.subr.bf16.mxu1 %v1772_v0  ;;  %v1736_v10 = vld [vmem:[%s2210_s0 + $0x98] sm:$0xff]   ;;  %v1737_v11 = vld [vmem:[%s2210_s0 + $0x8] sm:$0xff]   ;;  %v1738_v12 = vld [vmem:[%s2210_s0 + $0xa0] sm:$0xff]  }
   0x5   :  { %v1739_v13 = vld [vmem:[%s2210_s0 + $0x10] sm:$0xff]   ;;  %v1740_v14 = vld [vmem:[%s2210_s0 + $0xa8] sm:$0xff]   ;;  %v1741_v15 = vld [vmem:[%s2210_s0 + $0x18] sm:$0xff]  }
   0x6   :  { %v1742_v16 = vld [vmem:[%s2210_s0 + $0xb0] sm:$0xff]   ;;  %v1743_v17 = vld [vmem:[%s2210_s0 + $0x20] sm:$0xff]   ;;  %v1744_v18 = vld [vmem:[%s2210_s0 + $0xb8] sm:$0xff]  }
   0x7   :  { %1548 = vmatpush3.bf16.msra.mxu0 %v1728_v2  ;;  %1718 = vmatpush3.bf16.msra.mxu1 %v1728_v2  ;;  %v1745_v19 = vld [vmem:[%s2210_s0 + $0x28] sm:$0xff]   ;;  %v1746_v20 = vld [vmem:[%s2210_s0 + $0xc0] sm:$0xff]   ;;  %v1747_v21 = vld [vmem:[%s2210_s0 + $0x30] sm:$0xff]  }
   0x8   :  { %1549 = vmatprep.subr.bf16.mxu0 %v1772_v0  ;;  %1711 = vmatprep.subr.bf16.mxu1 %v1772_v0  ;;  %v1748_v22 = vld [vmem:[%s2210_s0 + $0xc8] sm:$0xff]   ;;  %v1749_v23 = vld [vmem:[%s2210_s0 + $0x38] sm:$0xff]   ;;  %v1750_v24 = vld [vmem:[%s2210_s0 + $0xd0] sm:$0xff]  }
   0x9   :  { %v1751_v25 = vld [vmem:[%s2210_s0 + $0x40] sm:$0xff]   ;;  %v1752_v26 = vld [vmem:[%s2210_s0 + $0xd8] sm:$0xff]   ;;  %v1753_v27 = vld [vmem:[%s2210_s0 + $0x48] sm:$0xff]  }
   0xa   :  { %v1754_v28 = vld [vmem:[%s2210_s0 + $0xe0] sm:$0xff]   ;;  %v1755_v29 = vld [vmem:[%s2210_s0 + $0x50] sm:$0xff]   ;;  %v1756_v30 = vld [vmem:[%s2210_s0 + $0xe8] sm:$0xff]  }
   0xb   :  { %1550 = vmatpush3.bf16.msra.mxu0 %v1729_v3  ;;  %1719 = vmatpush3.bf16.msra.mxu1 %v1729_v3  ;;  %v1757_v31 = vld [vmem:[%s2210_s0 + $0x58] sm:$0xff]   ;;  %v1758_v32 = vld [vmem:[%s2210_s0 + $0xf0] sm:$0xff]   ;;  %v1759_v33 = vld [vmem:[%s2210_s0 + $0x60] sm:$0xff]  }
   0xc   :  { %1551 = vmatprep.subr.bf16.mxu0 %v1772_v0  ;;  %1712 = vmatprep.subr.bf16.mxu1 %v1772_v0  ;;  %v1760_v34 = vld [vmem:[%s2210_s0 + $0xf8] sm:$0xff]   ;;  %v1761_v35 = vld [vmem:[%s2210_s0 + $0x68] sm:$0xff]   ;;  %v1762_v36 = vld [vmem:[%s2210_s0 + $0x100] sm:$0xff]  }
   0xd   :  { %v1763_v37 = vld [vmem:[%s2210_s0 + $0x70] sm:$0xff]   ;;  %v1764_v38 = vld [vmem:[%s2210_s0 + $0x108] sm:$0xff]   ;;  %v1765_v39 = vld [vmem:[%s2210_s0 + $0x78] sm:$0xff]  }
   0xe   :  { %v1766_v40 = vld [vmem:[%s2210_s0 + $0x110] sm:$0xff]   ;;  %v1767_v41 = vld [vmem:[%s2210_s0 + $0x80] sm:$0xff]   ;;  %v1768_v42 = vld [vmem:[%s2210_s0 + $0x118] sm:$0xff]  }
   0xf   :  { %1552 = vmatpush3.bf16.msra.mxu0 %v1730_v4  ;;  %1720 = vmatpush3.bf16.msra.mxu1 %v1730_v4  ;;  %v1769_v43 = vld [vmem:[%s2210_s0 + $0x88] sm:$0xff]   ;;  %v1770_v44 = vld [vmem:[%s2210_s0 + $0x120] sm:$0xff]   ;;  %v1771_v45 = vld [vmem:[%s2210_s0 + $0x90] sm:$0xff]  }
  0x10   :  { %1553 = vmatprep.subr.bf16.mxu0 %v1772_v0  ;;  %1713 = vmatprep.subr.bf16.mxu1 %v1772_v0  ;;  %v2022_v46 = vld [vmem:[%s2211_s2] ss:$0 sm:$0xff] }
  0x13   :  { %1554 = vmatpush3.bf16.msra.mxu0 %v1731_v5  ;;  %1721 = vmatpush3.bf16.msra.mxu1 %v1731_v5 }
  0x14   :  { %1555 = vmatprep.subr.bf16.mxu0 %v1772_v0  ;;  %1714 = vmatprep.subr.bf16.mxu1 %v1772_v0 }
  0x17   :  { %1556 = vmatpush3.bf16.msra.mxu0 %v1732_v6  ;;  %1722 = vmatpush3.bf16.msra.mxu1 %v1732_v6 }
  0x18   :  { %1557 = vmatprep.subr.bf16.mxu0 %v1772_v0  ;;  %1715 = vmatprep.subr.bf16.mxu1 %v1772_v0 }
  0x1b   :  { %1558 = vmatpush3.bf16.msra.mxu0 %v1733_v7  ;;  %1723 = vmatpush3.bf16.msra.mxu1 %v1733_v7 }
  0x1c   :  { %1559 = vmatprep.subr.bf16.mxu0 %v1772_v0  ;;  %1716 = vmatprep.subr.bf16.mxu1 %v1772_v0 }
  0x1f   :  { %1560 = vmatpush3.bf16.msra.mxu0 %v1734_v8  ;;  %1724 = vmatpush3.bf16.msra.mxu1 %v1734_v8 }
  0x22   :  { %1562 = vmatmul.mubr.bf16.vlgmr.msra.gmra.mrb[0].mxu0 %v1735_v9  ;;  %1638 = vmatmul.mubr.bf16.vlgmr.msra.gmra.mrb[0].mxu1 %v1736_v10 }
  0x23   :  { %1565 = vmatprep.mubr.msk.bf16.mxu0 %vm1773_vm0, %v1772_v0  ;;  %1641 = vmatprep.mubr.msk.bf16.mxu1 %vm1773_vm0, %v1772_v0 }
  0x2a   :  { %1566 = vmatmul.mubr.bf16.gmra.mrb[4].mxu0 %v1737_v11  ;;  %1642 = vmatmul.mubr.bf16.gmra.mrb[4].mxu1 %v1738_v12 }
  0x2b   :  { %1569 = vmatprep.mubr.msk.bf16.mxu0 %vm1773_vm0, %v1772_v0  ;;  %1645 = vmatprep.mubr.msk.bf16.mxu1 %vm1773_vm0, %v1772_v0 }
  0x32   :  { %1570 = vmatmul.mubr.bf16.gmra.mrb[8].mxu0 %v1739_v13  ;;  %1646 = vmatmul.mubr.bf16.gmra.mrb[8].mxu1 %v1740_v14 }
  0x33   :  { %1573 = vmatprep.mubr.msk.bf16.mxu0 %vm1773_vm0, %v1772_v0  ;;  %1649 = vmatprep.mubr.msk.bf16.mxu1 %vm1773_vm0, %v1772_v0 }
  0x3a   :  { %1574 = vmatmul.mubr.bf16.gmra.mrb[12].mxu0 %v1741_v15  ;;  %1650 = vmatmul.mubr.bf16.gmra.mrb[12].mxu1 %v1742_v16 }
  0x3b   :  { %1577 = vmatprep.mubr.msk.bf16.mxu0 %vm1773_vm0, %v1772_v0  ;;  %1653 = vmatprep.mubr.msk.bf16.mxu1 %vm1773_vm0, %v1772_v0 }
  0x42   :  { %1578 = vmatmul.mubr.bf16.gmra.mrb[16].mxu0 %v1743_v17  ;;  %1654 = vmatmul.mubr.bf16.gmra.mrb[16].mxu1 %v1744_v18 }
  0x43   :  { %1581 = vmatprep.mubr.msk.bf16.mxu0 %vm1773_vm0, %v1772_v0  ;;  %1657 = vmatprep.mubr.msk.bf16.mxu1 %vm1773_vm0, %v1772_v0 }
  0x4a   :  { %1582 = vmatmul.mubr.bf16.gmra.mrb[20].mxu0 %v1745_v19  ;;  %1658 = vmatmul.mubr.bf16.gmra.mrb[20].mxu1 %v1746_v20 }
  0x4b   :  { %1585 = vmatprep.mubr.msk.bf16.mxu0 %vm1773_vm0, %v1772_v0  ;;  %1661 = vmatprep.mubr.msk.bf16.mxu1 %vm1773_vm0, %v1772_v0 }
  0x52   :  { %1586 = vmatmul.mubr.bf16.gmra.mrb[24].mxu0 %v1747_v21  ;;  %1662 = vmatmul.mubr.bf16.gmra.mrb[24].mxu1 %v1748_v22 }
  0x53   :  { %1589 = vmatprep.mubr.msk.bf16.mxu0 %vm1773_vm0, %v1772_v0  ;;  %1665 = vmatprep.mubr.msk.bf16.mxu1 %vm1773_vm0, %v1772_v0 }
  0x5a   :  { %1590 = vmatmul.mubr.bf16.gmra.mrb[28].mxu0 %v1749_v23  ;;  %1666 = vmatmul.mubr.bf16.gmra.mrb[28].mxu1 %v1750_v24 }
  0x5b   :  { %1593 = vmatprep.mubr.msk.bf16.mxu0 %vm1773_vm0, %v1772_v0  ;;  %1669 = vmatprep.mubr.msk.bf16.mxu1 %vm1773_vm0, %v1772_v0 }
  0x62   :  { %1594 = vmatmul.mubr.bf16.gmra.mrb[32].mxu0 %v1751_v25  ;;  %1670 = vmatmul.mubr.bf16.gmra.mrb[32].mxu1 %v1752_v26 }
  0x63   :  { %1597 = vmatprep.mubr.msk.bf16.mxu0 %vm1773_vm0, %v1772_v0  ;;  %1673 = vmatprep.mubr.msk.bf16.mxu1 %vm1773_vm0, %v1772_v0 }
  0x6a   :  { %1598 = vmatmul.mubr.bf16.gmra.mrb[36].mxu0 %v1753_v27  ;;  %1674 = vmatmul.mubr.bf16.gmra.mrb[36].mxu1 %v1754_v28 }
  0x6b   :  { %1601 = vmatprep.mubr.msk.bf16.mxu0 %vm1773_vm0, %v1772_v0  ;;  %1677 = vmatprep.mubr.msk.bf16.mxu1 %vm1773_vm0, %v1772_v0 }
  0x72   :  { %1602 = vmatmul.mubr.bf16.gmra.mrb[40].mxu0 %v1755_v29  ;;  %1678 = vmatmul.mubr.bf16.gmra.mrb[40].mxu1 %v1756_v30 }
  0x73   :  { %1605 = vmatprep.mubr.msk.bf16.mxu0 %vm1773_vm0, %v1772_v0  ;;  %1681 = vmatprep.mubr.msk.bf16.mxu1 %vm1773_vm0, %v1772_v0 }
  0x7a   :  { %1606 = vmatmul.mubr.bf16.gmra.mrb[44].mxu0 %v1757_v31  ;;  %1682 = vmatmul.mubr.bf16.gmra.mrb[44].mxu1 %v1758_v32 }
  0x7b   :  { %1609 = vmatprep.mubr.msk.bf16.mxu0 %vm1773_vm0, %v1772_v0  ;;  %1685 = vmatprep.mubr.msk.bf16.mxu1 %vm1773_vm0, %v1772_v0 }
  0x82   :  { %1610 = vmatmul.mubr.bf16.gmra.mrb[48].mxu0 %v1759_v33  ;;  %1686 = vmatmul.mubr.bf16.gmra.mrb[48].mxu1 %v1760_v34 }
  0x83   :  { %1613 = vmatprep.mubr.msk.bf16.mxu0 %vm1773_vm0, %v1772_v0  ;;  %1689 = vmatprep.mubr.msk.bf16.mxu1 %vm1773_vm0, %v1772_v0 }
  0x8a   :  { %1614 = vmatmul.mubr.bf16.gmra.mrb[52].mxu0 %v1761_v35  ;;  %1690 = vmatmul.mubr.bf16.gmra.mrb[52].mxu1 %v1762_v36 }
  0x8b   :  { %1617 = vmatprep.mubr.msk.bf16.mxu0 %vm1773_vm0, %v1772_v0  ;;  %1693 = vmatprep.mubr.msk.bf16.mxu1 %vm1773_vm0, %v1772_v0 }
  0x92   :  { %1618 = vmatmul.mubr.bf16.gmra.mrb[56].mxu0 %v1763_v37  ;;  %1694 = vmatmul.mubr.bf16.gmra.mrb[56].mxu1 %v1764_v38 }
  0x93   :  { %1621 = vmatprep.mubr.msk.bf16.mxu0 %vm1773_vm0, %v1772_v0  ;;  %1697 = vmatprep.mubr.msk.bf16.mxu1 %vm1773_vm0, %v1772_v0 }
  0x9a   :  { %1622 = vmatmul.mubr.bf16.gmra.mrb[60].mxu0 %v1765_v39  ;;  %1698 = vmatmul.mubr.bf16.gmra.mrb[60].mxu1 %v1766_v40 }
  0x9b   :  { %1625 = vmatprep.mubr.msk.bf16.mxu0 %vm1773_vm0, %v1772_v0  ;;  %1701 = vmatprep.mubr.msk.bf16.mxu1 %vm1773_vm0, %v1772_v0 }
  0xa2   :  { %1626 = vmatmul.mubr.bf16.gmra.mrb[64].mxu0 %v1767_v41  ;;  %1702 = vmatmul.mubr.bf16.gmra.mrb[64].mxu1 %v1768_v42 }
  0xa3   :  { %1629 = vmatprep.mubr.msk.bf16.mxu0 %vm1773_vm0, %v1772_v0  ;;  %1705 = vmatprep.mubr.msk.bf16.mxu1 %vm1773_vm0, %v1772_v0 }
  0xaa   :  { %1630 = vmatmul.mubr.bf16.gmra.mrb[68].mxu0 %v1769_v43  ;;  %1706 = vmatmul.mubr.bf16.gmra.mrb[68].mxu1 %v1770_v44 }
  0xab   :  { %1633 = vmatprep.mubr.msk.bf16.mxu0 %vm1773_vm0, %v1772_v0 }
  0xb2   :  { %1634 = vmatmul.mubr.bf16.gmra.mrb[72].mxu0 %v1771_v45 }
  0xf5   :  { %v416_v47 = vpop.f32.mrb[0].mxu0  ;;  %v568_v48 = vpop.f32.mrb[0].mxu1 }
  0xf6   :  { %v1563_v49 = vpop.f32.mrb[1].mxu0  ;;  %v569_v50 = vadd.f32 %v2022_v46, %v568_v48  ;;  %v1639_v51 = vpop.f32.mrb[1].mxu1  ;;  %v417_v54 = vadd.f32 %v2022_v46, %v416_v47 }
  0xf7   :  { %v419_v52 = vpop.f32.mrb[2].mxu0  ;;  %v571_v53 = vpop.f32.mrb[2].mxu1 }
  0xf8   :  { %v420_v55 = vadd.f32 %v2022_v46, %v419_v52  ;;  %v1564_v56 = vpop.f32.mrb[3].mxu0  ;;  %v572_v57 = vadd.f32 %v2022_v46, %v571_v53  ;;  %v1640_v58 = vpop.f32.mrb[3].mxu1 }
  0xfa   :  { %v1282_v59 = vpack.c.bf16 %v420_v55, %v417_v54  ;;  %v1377_v60 = vpack.c.bf16 %v572_v57, %v569_v50 }
  0xfc   :  { %1283 = vst [vmem:[%s2212_s3] sm:$0xff] %v1282_v59   ;;  %1482 = vst [vmem:[%s2212_s3 + $0x98] sm:$0xff] %v1377_v60  }
  0xfd   :  { %v424_v61 = vpop.f32.mrb[4].mxu0  ;;  %v576_v62 = vpop.f32.mrb[4].mxu1 }
  0xfe   :  { %v1567_v63 = vpop.f32.mrb[5].mxu0  ;;  %v577_v0 = vadd.f32 %v2022_v46, %v576_v62  ;;  %v1643_v1 = vpop.f32.mrb[5].mxu1  ;;  %v425_v4 = vadd.f32 %v2022_v46, %v424_v61 }
  0xff   :  { %v427_v2 = vpop.f32.mrb[6].mxu0  ;;  %v579_v3 = vpop.f32.mrb[6].mxu1 }
 0x100   :  { %v428_v5 = vadd.f32 %v2022_v46, %v427_v2  ;;  %v1568_v6 = vpop.f32.mrb[7].mxu0  ;;  %v580_v7 = vadd.f32 %v2022_v46, %v579_v3  ;;  %v1644_v8 = vpop.f32.mrb[7].mxu1 }
 0x102   :  { %v1287_v9 = vpack.c.bf16 %v428_v5, %v425_v4  ;;  %v1382_v10 = vpack.c.bf16 %v580_v7, %v577_v0 }
 0x104   :  { %1464 = vst [vmem:[%s2212_s3 + $0x8] sm:$0xff] %v1287_v9   ;;  %1483 = vst [vmem:[%s2212_s3 + $0xa0] sm:$0xff] %v1382_v10  }
 0x105   :  { %v432_v11 = vpop.f32.mrb[8].mxu0  ;;  %v584_v12 = vpop.f32.mrb[8].mxu1 }
 0x106   :  { %v1571_v13 = vpop.f32.mrb[9].mxu0  ;;  %v585_v14 = vadd.f32 %v2022_v46, %v584_v12  ;;  %v1647_v15 = vpop.f32.mrb[9].mxu1  ;;  %v433_v18 = vadd.f32 %v2022_v46, %v432_v11 }
 0x107   :  { %v435_v16 = vpop.f32.mrb[10].mxu0  ;;  %v587_v17 = vpop.f32.mrb[10].mxu1 }
 0x108   :  { %v436_v19 = vadd.f32 %v2022_v46, %v435_v16  ;;  %v1572_v20 = vpop.f32.mrb[11].mxu0  ;;  %v588_v21 = vadd.f32 %v2022_v46, %v587_v17  ;;  %v1648_v22 = vpop.f32.mrb[11].mxu1 }
 0x10a   :  { %v1292_v23 = vpack.c.bf16 %v436_v19, %v433_v18  ;;  %v1387_v24 = vpack.c.bf16 %v588_v21, %v585_v14 }
 0x10c   :  { %1465 = vst [vmem:[%s2212_s3 + $0x10] sm:$0xff] %v1292_v23   ;;  %1484 = vst [vmem:[%s2212_s3 + $0xa8] sm:$0xff] %v1387_v24  }
 0x10d   :  { %v440_v25 = vpop.f32.mrb[12].mxu0  ;;  %v592_v26 = vpop.f32.mrb[12].mxu1 }
 0x10e   :  { %v1575_v27 = vpop.f32.mrb[13].mxu0  ;;  %v593_v28 = vadd.f32 %v2022_v46, %v592_v26  ;;  %v1651_v29 = vpop.f32.mrb[13].mxu1  ;;  %v441_v32 = vadd.f32 %v2022_v46, %v440_v25 }
 0x10f   :  { %v443_v30 = vpop.f32.mrb[14].mxu0  ;;  %v595_v31 = vpop.f32.mrb[14].mxu1 }
 0x110   :  { %v444_v33 = vadd.f32 %v2022_v46, %v443_v30  ;;  %v1576_v34 = vpop.f32.mrb[15].mxu0  ;;  %v596_v35 = vadd.f32 %v2022_v46, %v595_v31  ;;  %v1652_v36 = vpop.f32.mrb[15].mxu1 }
 0x112   :  { %v1297_v37 = vpack.c.bf16 %v444_v33, %v441_v32  ;;  %v1392_v38 = vpack.c.bf16 %v596_v35, %v593_v28 }
 0x114   :  { %1466 = vst [vmem:[%s2212_s3 + $0x18] sm:$0xff] %v1297_v37   ;;  %1485 = vst [vmem:[%s2212_s3 + $0xb0] sm:$0xff] %v1392_v38  }
 0x115   :  { %v448_v39 = vpop.f32.mrb[16].mxu0  ;;  %v600_v40 = vpop.f32.mrb[16].mxu1 }
 0x116   :  { %v1579_v41 = vpop.f32.mrb[17].mxu0  ;;  %v601_v42 = vadd.f32 %v2022_v46, %v600_v40  ;;  %v1655_v43 = vpop.f32.mrb[17].mxu1  ;;  %v449_v47 = vadd.f32 %v2022_v46, %v448_v39 }
 0x117   :  { %v451_v44 = vpop.f32.mrb[18].mxu0  ;;  %v603_v45 = vpop.f32.mrb[18].mxu1 }
 0x118   :  { %v452_v48 = vadd.f32 %v2022_v46, %v451_v44  ;;  %v1580_v49 = vpop.f32.mrb[19].mxu0  ;;  %v604_v50 = vadd.f32 %v2022_v46, %v603_v45  ;;  %v1656_v51 = vpop.f32.mrb[19].mxu1 }
 0x11a   :  { %v1302_v52 = vpack.c.bf16 %v452_v48, %v449_v47  ;;  %v1397_v53 = vpack.c.bf16 %v604_v50, %v601_v42 }
 0x11c   :  { %1467 = vst [vmem:[%s2212_s3 + $0x20] sm:$0xff] %v1302_v52   ;;  %1486 = vst [vmem:[%s2212_s3 + $0xb8] sm:$0xff] %v1397_v53  }
 0x11d   :  { %v456_v54 = vpop.f32.mrb[20].mxu0  ;;  %v608_v55 = vpop.f32.mrb[20].mxu1 }
 0x11e   :  { %v1583_v56 = vpop.f32.mrb[21].mxu0  ;;  %v609_v57 = vadd.f32 %v2022_v46, %v608_v55  ;;  %v1659_v58 = vpop.f32.mrb[21].mxu1  ;;  %v457_v61 = vadd.f32 %v2022_v46, %v456_v54 }
 0x11f   :  { %v459_v59 = vpop.f32.mrb[22].mxu0  ;;  %v611_v60 = vpop.f32.mrb[22].mxu1 }
 0x120   :  { %v460_v62 = vadd.f32 %v2022_v46, %v459_v59  ;;  %v1584_v63 = vpop.f32.mrb[23].mxu0  ;;  %v612_v0 = vadd.f32 %v2022_v46, %v611_v60  ;;  %v1660_v1 = vpop.f32.mrb[23].mxu1 }
 0x122   :  { %v1307_v2 = vpack.c.bf16 %v460_v62, %v457_v61  ;;  %v1402_v3 = vpack.c.bf16 %v612_v0, %v609_v57 }
 0x124   :  { %1468 = vst [vmem:[%s2212_s3 + $0x28] sm:$0xff] %v1307_v2   ;;  %1487 = vst [vmem:[%s2212_s3 + $0xc0] sm:$0xff] %v1402_v3  }
 0x125   :  { %v464_v4 = vpop.f32.mrb[24].mxu0  ;;  %v616_v5 = vpop.f32.mrb[24].mxu1 }
 0x126   :  { %v1587_v6 = vpop.f32.mrb[25].mxu0  ;;  %v617_v7 = vadd.f32 %v2022_v46, %v616_v5  ;;  %v1663_v8 = vpop.f32.mrb[25].mxu1  ;;  %v465_v11 = vadd.f32 %v2022_v46, %v464_v4 }
 0x127   :  { %v467_v9 = vpop.f32.mrb[26].mxu0  ;;  %v619_v10 = vpop.f32.mrb[26].mxu1 }
 0x128   :  { %v468_v12 = vadd.f32 %v2022_v46, %v467_v9  ;;  %v1588_v13 = vpop.f32.mrb[27].mxu0  ;;  %v620_v14 = vadd.f32 %v2022_v46, %v619_v10  ;;  %v1664_v15 = vpop.f32.mrb[27].mxu1 }
 0x12a   :  { %v1312_v16 = vpack.c.bf16 %v468_v12, %v465_v11  ;;  %v1407_v17 = vpack.c.bf16 %v620_v14, %v617_v7 }
 0x12c   :  { %1469 = vst [vmem:[%s2212_s3 + $0x30] sm:$0xff] %v1312_v16   ;;  %1488 = vst [vmem:[%s2212_s3 + $0xc8] sm:$0xff] %v1407_v17  }
 0x12d   :  { %v472_v18 = vpop.f32.mrb[28].mxu0  ;;  %v624_v19 = vpop.f32.mrb[28].mxu1 }
 0x12e   :  { %v1591_v20 = vpop.f32.mrb[29].mxu0  ;;  %v625_v21 = vadd.f32 %v2022_v46, %v624_v19  ;;  %v1667_v22 = vpop.f32.mrb[29].mxu1  ;;  %v473_v25 = vadd.f32 %v2022_v46, %v472_v18 }
 0x12f   :  { %v475_v23 = vpop.f32.mrb[30].mxu0  ;;  %v627_v24 = vpop.f32.mrb[30].mxu1 }
 0x130   :  { %v476_v26 = vadd.f32 %v2022_v46, %v475_v23  ;;  %v1592_v27 = vpop.f32.mrb[31].mxu0  ;;  %v628_v28 = vadd.f32 %v2022_v46, %v627_v24  ;;  %v1668_v29 = vpop.f32.mrb[31].mxu1 }
 0x132   :  { %v1317_v30 = vpack.c.bf16 %v476_v26, %v473_v25  ;;  %v1412_v31 = vpack.c.bf16 %v628_v28, %v625_v21 }
 0x134   :  { %1470 = vst [vmem:[%s2212_s3 + $0x38] sm:$0xff] %v1317_v30   ;;  %1489 = vst [vmem:[%s2212_s3 + $0xd0] sm:$0xff] %v1412_v31  }
 0x135   :  { %v480_v32 = vpop.f32.mrb[32].mxu0  ;;  %v632_v33 = vpop.f32.mrb[32].mxu1 }
 0x136   :  { %v1595_v34 = vpop.f32.mrb[33].mxu0  ;;  %v633_v35 = vadd.f32 %v2022_v46, %v632_v33  ;;  %v1671_v36 = vpop.f32.mrb[33].mxu1  ;;  %v481_v39 = vadd.f32 %v2022_v46, %v480_v32 }
 0x137   :  { %v483_v37 = vpop.f32.mrb[34].mxu0  ;;  %v635_v38 = vpop.f32.mrb[34].mxu1 }
 0x138   :  { %v484_v40 = vadd.f32 %v2022_v46, %v483_v37  ;;  %v1596_v41 = vpop.f32.mrb[35].mxu0  ;;  %v636_v42 = vadd.f32 %v2022_v46, %v635_v38  ;;  %v1672_v43 = vpop.f32.mrb[35].mxu1 }
 0x13a   :  { %v1322_v44 = vpack.c.bf16 %v484_v40, %v481_v39  ;;  %v1417_v45 = vpack.c.bf16 %v636_v42, %v633_v35 }
 0x13c   :  { %1471 = vst [vmem:[%s2212_s3 + $0x40] sm:$0xff] %v1322_v44   ;;  %1490 = vst [vmem:[%s2212_s3 + $0xd8] sm:$0xff] %v1417_v45  }
 0x13d   :  { %v488_v47 = vpop.f32.mrb[36].mxu0  ;;  %v640_v48 = vpop.f32.mrb[36].mxu1 }
 0x13e   :  { %v1599_v49 = vpop.f32.mrb[37].mxu0  ;;  %v641_v50 = vadd.f32 %v2022_v46, %v640_v48  ;;  %v1675_v51 = vpop.f32.mrb[37].mxu1  ;;  %v489_v54 = vadd.f32 %v2022_v46, %v488_v47 }
 0x13f   :  { %v491_v52 = vpop.f32.mrb[38].mxu0  ;;  %v643_v53 = vpop.f32.mrb[38].mxu1 }
 0x140   :  { %v492_v55 = vadd.f32 %v2022_v46, %v491_v52  ;;  %v1600_v56 = vpop.f32.mrb[39].mxu0  ;;  %v644_v57 = vadd.f32 %v2022_v46, %v643_v53  ;;  %v1676_v58 = vpop.f32.mrb[39].mxu1 }
 0x142   :  { %v1327_v59 = vpack.c.bf16 %v492_v55, %v489_v54  ;;  %v1422_v60 = vpack.c.bf16 %v644_v57, %v641_v50 }
 0x144   :  { %1472 = vst [vmem:[%s2212_s3 + $0x48] sm:$0xff] %v1327_v59   ;;  %1491 = vst [vmem:[%s2212_s3 + $0xe0] sm:$0xff] %v1422_v60  }
 0x145   :  { %v496_v61 = vpop.f32.mrb[40].mxu0  ;;  %v648_v62 = vpop.f32.mrb[40].mxu1 }
 0x146   :  { %v1603_v63 = vpop.f32.mrb[41].mxu0  ;;  %v649_v0 = vadd.f32 %v2022_v46, %v648_v62  ;;  %v1679_v1 = vpop.f32.mrb[41].mxu1  ;;  %v497_v4 = vadd.f32 %v2022_v46, %v496_v61 }
 0x147   :  { %v499_v2 = vpop.f32.mrb[42].mxu0  ;;  %v651_v3 = vpop.f32.mrb[42].mxu1 }
 0x148   :  { %v500_v5 = vadd.f32 %v2022_v46, %v499_v2  ;;  %v1604_v6 = vpop.f32.mrb[43].mxu0  ;;  %v652_v7 = vadd.f32 %v2022_v46, %v651_v3  ;;  %v1680_v8 = vpop.f32.mrb[43].mxu1 }
 0x14a   :  { %v1332_v9 = vpack.c.bf16 %v500_v5, %v497_v4  ;;  %v1427_v10 = vpack.c.bf16 %v652_v7, %v649_v0 }
 0x14c   :  { %1473 = vst [vmem:[%s2212_s3 + $0x50] sm:$0xff] %v1332_v9   ;;  %1492 = vst [vmem:[%s2212_s3 + $0xe8] sm:$0xff] %v1427_v10  }
 0x14d   :  { %v504_v11 = vpop.f32.mrb[44].mxu0  ;;  %v656_v12 = vpop.f32.mrb[44].mxu1 }
 0x14e   :  { %v1607_v13 = vpop.f32.mrb[45].mxu0  ;;  %v657_v14 = vadd.f32 %v2022_v46, %v656_v12  ;;  %v1683_v15 = vpop.f32.mrb[45].mxu1  ;;  %v505_v18 = vadd.f32 %v2022_v46, %v504_v11 }
 0x14f   :  { %v507_v16 = vpop.f32.mrb[46].mxu0  ;;  %v659_v17 = vpop.f32.mrb[46].mxu1 }
 0x150   :  { %v508_v19 = vadd.f32 %v2022_v46, %v507_v16  ;;  %v1608_v20 = vpop.f32.mrb[47].mxu0  ;;  %v660_v21 = vadd.f32 %v2022_v46, %v659_v17  ;;  %v1684_v22 = vpop.f32.mrb[47].mxu1 }
 0x152   :  { %v1337_v23 = vpack.c.bf16 %v508_v19, %v505_v18  ;;  %v1432_v24 = vpack.c.bf16 %v660_v21, %v657_v14 }
 0x154   :  { %1474 = vst [vmem:[%s2212_s3 + $0x58] sm:$0xff] %v1337_v23   ;;  %1493 = vst [vmem:[%s2212_s3 + $0xf0] sm:$0xff] %v1432_v24  }
 0x155   :  { %v512_v25 = vpop.f32.mrb[48].mxu0  ;;  %v664_v26 = vpop.f32.mrb[48].mxu1 }
 0x156   :  { %v1611_v27 = vpop.f32.mrb[49].mxu0  ;;  %v665_v28 = vadd.f32 %v2022_v46, %v664_v26  ;;  %v1687_v29 = vpop.f32.mrb[49].mxu1  ;;  %v513_v32 = vadd.f32 %v2022_v46, %v512_v25 }
 0x157   :  { %v515_v30 = vpop.f32.mrb[50].mxu0  ;;  %v667_v31 = vpop.f32.mrb[50].mxu1 }
 0x158   :  { %v516_v33 = vadd.f32 %v2022_v46, %v515_v30  ;;  %v1612_v34 = vpop.f32.mrb[51].mxu0  ;;  %v668_v35 = vadd.f32 %v2022_v46, %v667_v31  ;;  %v1688_v36 = vpop.f32.mrb[51].mxu1 }
 0x15a   :  { %v1342_v37 = vpack.c.bf16 %v516_v33, %v513_v32  ;;  %v1437_v38 = vpack.c.bf16 %v668_v35, %v665_v28 }
 0x15c   :  { %1475 = vst [vmem:[%s2212_s3 + $0x60] sm:$0xff] %v1342_v37   ;;  %1494 = vst [vmem:[%s2212_s3 + $0xf8] sm:$0xff] %v1437_v38  }
 0x15d   :  { %v520_v39 = vpop.f32.mrb[52].mxu0  ;;  %v672_v40 = vpop.f32.mrb[52].mxu1 }
 0x15e   :  { %v1615_v41 = vpop.f32.mrb[53].mxu0  ;;  %v673_v42 = vadd.f32 %v2022_v46, %v672_v40  ;;  %v1691_v43 = vpop.f32.mrb[53].mxu1  ;;  %v521_v47 = vadd.f32 %v2022_v46, %v520_v39 }
 0x15f   :  { %v523_v44 = vpop.f32.mrb[54].mxu0  ;;  %v675_v45 = vpop.f32.mrb[54].mxu1 }
 0x160   :  { %v524_v48 = vadd.f32 %v2022_v46, %v523_v44  ;;  %v1616_v49 = vpop.f32.mrb[55].mxu0  ;;  %v676_v50 = vadd.f32 %v2022_v46, %v675_v45  ;;  %v1692_v51 = vpop.f32.mrb[55].mxu1 }
 0x162   :  { %v1347_v52 = vpack.c.bf16 %v524_v48, %v521_v47  ;;  %v1442_v53 = vpack.c.bf16 %v676_v50, %v673_v42 }
 0x164   :  { %1476 = vst [vmem:[%s2212_s3 + $0x68] sm:$0xff] %v1347_v52   ;;  %1495 = vst [vmem:[%s2212_s3 + $0x100] sm:$0xff] %v1442_v53  }
 0x165   :  { %v528_v54 = vpop.f32.mrb[56].mxu0  ;;  %v680_v55 = vpop.f32.mrb[56].mxu1 }
 0x166   :  { %v1619_v56 = vpop.f32.mrb[57].mxu0  ;;  %v681_v57 = vadd.f32 %v2022_v46, %v680_v55  ;;  %v1695_v58 = vpop.f32.mrb[57].mxu1  ;;  %v529_v61 = vadd.f32 %v2022_v46, %v528_v54 }
 0x167   :  { %v531_v59 = vpop.f32.mrb[58].mxu0  ;;  %v683_v60 = vpop.f32.mrb[58].mxu1 }
 0x168   :  { %v532_v62 = vadd.f32 %v2022_v46, %v531_v59  ;;  %v1620_v63 = vpop.f32.mrb[59].mxu0  ;;  %v684_v0 = vadd.f32 %v2022_v46, %v683_v60  ;;  %v1696_v1 = vpop.f32.mrb[59].mxu1 }
 0x16a   :  { %v1352_v2 = vpack.c.bf16 %v532_v62, %v529_v61  ;;  %v1447_v3 = vpack.c.bf16 %v684_v0, %v681_v57 }
 0x16c   :  { %1477 = vst [vmem:[%s2212_s3 + $0x70] sm:$0xff] %v1352_v2   ;;  %1496 = vst [vmem:[%s2212_s3 + $0x108] sm:$0xff] %v1447_v3  }
 0x16d   :  { %v536_v4 = vpop.f32.mrb[60].mxu0  ;;  %v688_v5 = vpop.f32.mrb[60].mxu1 }
 0x16e   :  { %v1623_v6 = vpop.f32.mrb[61].mxu0  ;;  %v689_v7 = vadd.f32 %v2022_v46, %v688_v5  ;;  %v1699_v8 = vpop.f32.mrb[61].mxu1  ;;  %v537_v11 = vadd.f32 %v2022_v46, %v536_v4 }
 0x16f   :  { %v539_v9 = vpop.f32.mrb[62].mxu0  ;;  %v691_v10 = vpop.f32.mrb[62].mxu1 }
 0x170   :  { %v540_v12 = vadd.f32 %v2022_v46, %v539_v9  ;;  %v1624_v13 = vpop.f32.mrb[63].mxu0  ;;  %v692_v14 = vadd.f32 %v2022_v46, %v691_v10  ;;  %v1700_v15 = vpop.f32.mrb[63].mxu1 }
 0x172   :  { %v1357_v16 = vpack.c.bf16 %v540_v12, %v537_v11  ;;  %v1452_v17 = vpack.c.bf16 %v692_v14, %v689_v7 }
 0x174   :  { %1478 = vst [vmem:[%s2212_s3 + $0x78] sm:$0xff] %v1357_v16   ;;  %1497 = vst [vmem:[%s2212_s3 + $0x110] sm:$0xff] %v1452_v17  }
 0x175   :  { %v544_v18 = vpop.f32.mrb[64].mxu0  ;;  %v696_v19 = vpop.f32.mrb[64].mxu1 }
 0x176   :  { %v1627_v20 = vpop.f32.mrb[65].mxu0  ;;  %v697_v21 = vadd.f32 %v2022_v46, %v696_v19  ;;  %v1703_v22 = vpop.f32.mrb[65].mxu1  ;;  %v545_v25 = vadd.f32 %v2022_v46, %v544_v18 }
 0x177   :  { %v547_v23 = vpop.f32.mrb[66].mxu0  ;;  %v699_v24 = vpop.f32.mrb[66].mxu1 }
 0x178   :  { %v548_v26 = vadd.f32 %v2022_v46, %v547_v23  ;;  %v1628_v27 = vpop.f32.mrb[67].mxu0  ;;  %v700_v28 = vadd.f32 %v2022_v46, %v699_v24  ;;  %v1704_v29 = vpop.f32.mrb[67].mxu1 }
 0x17a   :  { %v1362_v30 = vpack.c.bf16 %v548_v26, %v545_v25  ;;  %v1457_v31 = vpack.c.bf16 %v700_v28, %v697_v21 }
 0x17c   :  { %1479 = vst [vmem:[%s2212_s3 + $0x80] sm:$0xff] %v1362_v30   ;;  %1498 = vst [vmem:[%s2212_s3 + $0x118] sm:$0xff] %v1457_v31  }
 0x17d   :  { %v552_v32 = vpop.f32.mrb[68].mxu0  ;;  %v704_v33 = vpop.f32.mrb[68].mxu1 }
 0x17e   :  { %v1631_v34 = vpop.f32.mrb[69].mxu0  ;;  %v705_v35 = vadd.f32 %v2022_v46, %v704_v33  ;;  %v1707_v36 = vpop.f32.mrb[69].mxu1  ;;  %v553_v39 = vadd.f32 %v2022_v46, %v552_v32 }
 0x17f   :  { %v555_v37 = vpop.f32.mrb[70].mxu0  ;;  %v707_v38 = vpop.f32.mrb[70].mxu1 }
 0x180   :  { %v556_v40 = vadd.f32 %v2022_v46, %v555_v37  ;;  %v1632_v41 = vpop.f32.mrb[71].mxu0  ;;  %v708_v42 = vadd.f32 %v2022_v46, %v707_v38  ;;  %v1708_v43 = vpop.f32.mrb[71].mxu1 }
 0x182   :  { %v1367_v44 = vpack.c.bf16 %v556_v40, %v553_v39  ;;  %v1462_v45 = vpack.c.bf16 %v708_v42, %v705_v35 }
 0x184   :  { %1480 = vst [vmem:[%s2212_s3 + $0x88] sm:$0xff] %v1367_v44   ;;  %1499 = vst [vmem:[%s2212_s3 + $0x120] sm:$0xff] %v1462_v45  }
 0x185   :  { %v560_v47 = vpop.f32.mrb[72].mxu0 }
 0x186   :  { %v1635_v48 = vpop.f32.mrb[73].mxu0  ;;  %v561_v50 = vadd.f32 %v2022_v46, %v560_v47 }
 0x187   :  { %v563_v49 = vpop.f32.mrb[74].mxu0 }
 0x188   :  { %v564_v51 = vadd.f32 %v2022_v46, %v563_v49  ;;  %v1636_v52 = vpop.f32.mrb[75].mxu0 }
 0x18a   :  { %v1372_v53 = vpack.c.bf16 %v564_v51, %v561_v50 }
 0x18c   :  { %1481 = vst [vmem:[%s2212_s3 + $0x90] sm:$0xff] %v1372_v53  }

// kernel: tile.13
= control target key start
LH: loop header
LB: loop body
LE: loop exit
PB: predicated region body
PF: predicated region fallthrough
CT: control target
= control target key end

     0   :  { %s28_s0 = inlined_call_operand.vmem [shape: f32[4], index: 0, kind: input, shape index: {}]   ;;  %s29_s1 = inlined_call_operand.vmem [shape: f32[9,4], index: 1, kind: output, shape index: {}]  }
   0x1   :  { %v4_v0 = vld [vmem:[%s28_s0] ss:$0 sm:$0xff] }
   0x2   :  { %5 = vst [vmem:[%s29_s1] sm:$0xff] %v4_v0  ;;  %8 = vst [vmem:[%s29_s1 + $0x8] sm:$0xff] %v4_v0 }

// kernel: tile.14
= control target key start
LH: loop header
LB: loop body
LE: loop exit
PB: predicated region body
PF: predicated region fallthrough
CT: control target
= control target key end

     0   :  { %s75_s10 = smov 32   ;;  %s76_s11 = smov 24   ;;  %vm3_vm0 = vcmask 31744   ;;  %vm9_vm1 = vcmask 294144   ;;  %vm15_vm2 = vcmask 261344   ;;  %vm21_vm3 = vcmask 228544   ;;  %s123_s0 = inlined_call_operand.vmem [shape: f32[9,4], index: 0, kind: input, shape index: {}]   ;;  %s124_s1 = inlined_call_operand.vmem [shape: f32[36], index: 1, kind: output, shape index: {}]  }
   0x1   :  { %v59_v0 = vld [vmem:[%s123_s0 + $0x8] sm:$0x1]   ;;  %v61_v1 = vld [vmem:[%s123_s0 + $0x6] sm:$0x1]   ;;  %v60_v2 = vld [vmem:[%s123_s0 + $0x7] sm:$0x1]  }
   0x2   :  { %7 = vrot.lane.b32.xlu0 %v59_v0, %s75_s10  ;;  %19 = vrot.lane.b32.xlu1 %v61_v1, %s76_s11  ;;  %v62_v3 = vld [vmem:[%s123_s0 + $0x5] sm:$0x1]   ;;  %v2_v4 = vld [vmem:[%s123_s0] sm:$0x1]   ;;  %s77_s18 = smov 28   ;;  %s78_s19 = smov 20  }
   0x3   :  { %4 = vst.msk [vmem:[#allocation0] sm:$0x1] %vm3_vm0, %v2_v4   ;;  %v63_v5 = vld [vmem:[%s123_s0 + $0x4] sm:$0x1]   ;;  %v64_v6 = vld [vmem:[%s123_s0 + $0x3] sm:$0x1]  }
   0x4   :  { %s79_s24 = smov 16   ;;  %s80_s25 = smov 12   ;;  %v65_v7 = vld [vmem:[%s123_s0 + $0x2] sm:$0x1]   ;;  %v66_v8 = vld [vmem:[%s123_s0 + $0x1] sm:$0x1]  }
   0x5   :  { %s81_s0 = smov 8   ;;  %s82_s30 = smov 4   ;;  %vm27_vm4 = vcmask 195744   ;;  %vm33_vm5 = vcmask 162944   ;;  %vm39_vm6 = vcmask 130144   ;;  %vm45_vm7 = vcmask 97344  }
   0x6   :  { %13 = vrot.lane.b32.xlu0 %v60_v2, %s77_s18  ;;  %25 = vrot.lane.b32.xlu1 %v62_v3, %s78_s19  ;;  %vm51_vm8 = vcmask 64544  }
   0xa   :  { %31 = vrot.lane.b32.xlu0 %v63_v5, %s79_s24  ;;  %37 = vrot.lane.b32.xlu1 %v64_v6, %s80_s25 }
   0xe   :  { %43 = vrot.lane.b32.xlu0 %v65_v7, %s81_s0  ;;  %49 = vrot.lane.b32.xlu1 %v66_v8, %s82_s30 }
  0x74   :  { %v8_v9 = vpop.permute.xlu0 %7   ;;  %v20_v10 = vpop.permute.xlu1 %19  }
  0x75   :  { %10 = vst.msk [vmem:[#allocation0] sm:$0x1] %vm9_vm1, %v8_v9  }
  0x78   :  { %v14_v11 = vpop.permute.xlu0 %13   ;;  %v26_v12 = vpop.permute.xlu1 %25  }
  0x79   :  { %16 = vst.msk [vmem:[#allocation0] sm:$0x1] %vm15_vm2, %v14_v11  }
  0x7a   :  { %22 = vst.msk [vmem:[#allocation0] sm:$0x1] %vm21_vm3, %v20_v10  }
  0x7b   :  { %28 = vst.msk [vmem:[#allocation0] sm:$0x1] %vm27_vm4, %v26_v12  }
  0x7c   :  { %v32_v13 = vpop.permute.xlu0 %31   ;;  %v38_v14 = vpop.permute.xlu1 %37  }
  0x7d   :  { %34 = vst.msk [vmem:[#allocation0] sm:$0x1] %vm33_vm5, %v32_v13  }
  0x7e   :  { %40 = vst.msk [vmem:[#allocation0] sm:$0x1] %vm39_vm6, %v38_v14  }
  0x80   :  { %v44_v15 = vpop.permute.xlu0 %43   ;;  %v50_v16 = vpop.permute.xlu1 %49  }
  0x81   :  { %46 = vst.msk [vmem:[#allocation0] sm:$0x1] %vm45_vm7, %v44_v15  }
  0x82   :  { %52 = vst.msk [vmem:[#allocation0] sm:$0x1] %vm51_vm8, %v50_v16  }
  0x89   :  { %v56_v17 = vld [vmem:[#allocation0] sm:$0x1] }
  0x8a   :  { %58 = vst [vmem:[%s124_s1] sm:$0x1] %v56_v17 }

// kernel: up_scale_forward.5
= control target key start
LH: loop header
LB: loop body
LE: loop exit
PB: predicated region body
PF: predicated region fallthrough
CT: control target
= control target key end

     0   :  { %v2202_v0 = vmov 0.0   ;;  %vm2203_vm0 = vmmov 0   ;;  %s2843_s1 = inlined_call_operand.vmem [shape: bf16[128,128], index: 1, kind: input, shape index: {}]   ;;  %s2844_s0 = inlined_call_operand.vmem [shape: bf16[656,128], index: 0, kind: input, shape index: {}]   ;;  %s2845_s2 = inlined_call_operand.vmem [shape: bf16[656,128], index: 2, kind: output, shape index: {0}]   ;;  %s2846_s3 = inlined_call_operand.vmem [shape: f32[8,128], index: 3, kind: output, shape index: {1}]   ;;  %s2847_s4 = inlined_call_operand.vmem [shape: f32[8,128], index: 4, kind: output, shape index: {2}]  }
   0x1   :  { %1955 = vmatprep.subr.bf16.mxu0 %v2202_v0  ;;  %v2153_v1 = vld [vmem:[%s2843_s1] sm:$0xff]   ;;  %1971 = vmatprep.mubr.msk.bf16.mxu0 %vm2203_vm0, %v2202_v0  ;;  %v2154_v2 = vld [vmem:[%s2843_s1 + $0x8] sm:$0xff]   ;;  %v2155_v3 = vld [vmem:[%s2843_s1 + $0x10] sm:$0xff]  }
   0x2   :  { %2135 = vmatprep.subr.bf16.mxu1 %v2202_v0  ;;  %2055 = vmatprep.mubr.msk.bf16.mxu1 %vm2203_vm0, %v2202_v0  ;;  %v2156_v4 = vld [vmem:[%s2843_s1 + $0x18] sm:$0xff]   ;;  %v2157_v5 = vld [vmem:[%s2843_s1 + $0x20] sm:$0xff]   ;;  %v2158_v6 = vld [vmem:[%s2843_s1 + $0x28] sm:$0xff]  }
   0x3   :  { %1956 = vmatpush3.bf16.msra.mxu0 %v2153_v1  ;;  %2143 = vmatpush3.bf16.msra.mxu1 %v2153_v1  ;;  %v2159_v7 = vld [vmem:[%s2843_s1 + $0x30] sm:$0xff]   ;;  %v2160_v8 = vld [vmem:[%s2843_s1 + $0x38] sm:$0xff]   ;;  %v2161_v9 = vld [vmem:[%s2844_s0] sm:$0xff]  }
   0x4   :  { %1957 = vmatprep.subr.bf16.mxu0 %v2202_v0  ;;  %2136 = vmatprep.subr.bf16.mxu1 %v2202_v0  ;;  %v2172_v10 = vld [vmem:[%s2844_s0 + $0xa8] sm:$0xff]   ;;  %v2174_v12 = vld [vmem:[%s2844_s0 + $0xb0] sm:$0xff]   ;;  %v2176_v14 = vld [vmem:[%s2844_s0 + $0xb8] sm:$0xff]  }
   0x5   :  { %v2162_v11 = vld [vmem:[%s2844_s0 + $0x8] sm:$0xff]   ;;  %v2163_v13 = vld [vmem:[%s2844_s0 + $0x10] sm:$0xff]   ;;  %v2164_v15 = vld [vmem:[%s2844_s0 + $0x18] sm:$0xff]  }
   0x6   :  { %v2178_v16 = vld [vmem:[%s2844_s0 + $0xc0] sm:$0xff]   ;;  %v2180_v18 = vld [vmem:[%s2844_s0 + $0xc8] sm:$0xff]   ;;  %v2182_v20 = vld [vmem:[%s2844_s0 + $0xd0] sm:$0xff]  }
   0x7   :  { %1958 = vmatpush3.bf16.msra.mxu0 %v2154_v2  ;;  %2144 = vmatpush3.bf16.msra.mxu1 %v2154_v2  ;;  %v2165_v17 = vld [vmem:[%s2844_s0 + $0x20] sm:$0xff]   ;;  %v2166_v19 = vld [vmem:[%s2844_s0 + $0x28] sm:$0xff]   ;;  %v2167_v21 = vld [vmem:[%s2844_s0 + $0x30] sm:$0xff]  }
   0x8   :  { %1959 = vmatprep.subr.bf16.mxu0 %v2202_v0  ;;  %2137 = vmatprep.subr.bf16.mxu1 %v2202_v0  ;;  %v2184_v22 = vld [vmem:[%s2844_s0 + $0xd8] sm:$0xff]   ;;  %v2186_v24 = vld [vmem:[%s2844_s0 + $0xe0] sm:$0xff]   ;;  %v2188_v26 = vld [vmem:[%s2844_s0 + $0xe8] sm:$0xff]  }
   0x9   :  { %v2168_v23 = vld [vmem:[%s2844_s0 + $0x38] sm:$0xff]   ;;  %v2169_v25 = vld [vmem:[%s2844_s0 + $0x40] sm:$0xff]   ;;  %v2170_v27 = vld [vmem:[%s2844_s0 + $0x48] sm:$0xff]  }
   0xa   :  { %v2190_v28 = vld [vmem:[%s2844_s0 + $0xf0] sm:$0xff]   ;;  %v2192_v30 = vld [vmem:[%s2844_s0 + $0xf8] sm:$0xff]   ;;  %v2193_v32 = vld [vmem:[%s2844_s0 + $0x100] sm:$0xff]  }
   0xb   :  { %1960 = vmatpush3.bf16.msra.mxu0 %v2155_v3  ;;  %2145 = vmatpush3.bf16.msra.mxu1 %v2155_v3  ;;  %v2171_v29 = vld [vmem:[%s2844_s0 + $0x50] sm:$0xff]   ;;  %v2173_v31 = vld [vmem:[%s2844_s0 + $0x58] sm:$0xff]   ;;  %v2175_v33 = vld [vmem:[%s2844_s0 + $0x60] sm:$0xff]  }
   0xc   :  { %1961 = vmatprep.subr.bf16.mxu0 %v2202_v0  ;;  %2138 = vmatprep.subr.bf16.mxu1 %v2202_v0  ;;  %v2194_v34 = vld [vmem:[%s2844_s0 + $0x108] sm:$0xff]   ;;  %v2195_v36 = vld [vmem:[%s2844_s0 + $0x110] sm:$0xff]   ;;  %v2196_v38 = vld [vmem:[%s2844_s0 + $0x118] sm:$0xff]  }
   0xd   :  { %v2177_v35 = vld [vmem:[%s2844_s0 + $0x68] sm:$0xff]   ;;  %v2179_v37 = vld [vmem:[%s2844_s0 + $0x70] sm:$0xff]   ;;  %v2181_v39 = vld [vmem:[%s2844_s0 + $0x78] sm:$0xff]  }
   0xe   :  { %v2197_v40 = vld [vmem:[%s2844_s0 + $0x120] sm:$0xff]   ;;  %v2198_v42 = vld [vmem:[%s2844_s0 + $0x128] sm:$0xff]   ;;  %v2199_v44 = vld [vmem:[%s2844_s0 + $0x130] sm:$0xff]  }
   0xf   :  { %1962 = vmatpush3.bf16.msra.mxu0 %v2156_v4  ;;  %2146 = vmatpush3.bf16.msra.mxu1 %v2156_v4  ;;  %v2183_v41 = vld [vmem:[%s2844_s0 + $0x80] sm:$0xff]   ;;  %v2185_v43 = vld [vmem:[%s2844_s0 + $0x88] sm:$0xff]   ;;  %v2187_v45 = vld [vmem:[%s2844_s0 + $0x90] sm:$0xff]  }
  0x10   :  { %1963 = vmatprep.subr.bf16.mxu0 %v2202_v0  ;;  %2139 = vmatprep.subr.bf16.mxu1 %v2202_v0  ;;  %v2200_v46 = vld [vmem:[%s2844_s0 + $0x138] sm:$0xff]   ;;  %v2201_v48 = vld [vmem:[%s2844_s0 + $0x140] sm:$0xff]  }
  0x11   :  { %v2189_v47 = vld [vmem:[%s2844_s0 + $0x98] sm:$0xff]   ;;  %v2191_v49 = vld [vmem:[%s2844_s0 + $0xa0] sm:$0xff]  }
  0x13   :  { %1964 = vmatpush3.bf16.msra.mxu0 %v2157_v5  ;;  %2147 = vmatpush3.bf16.msra.mxu1 %v2157_v5 }
  0x14   :  { %1965 = vmatprep.subr.bf16.mxu0 %v2202_v0  ;;  %2140 = vmatprep.subr.bf16.mxu1 %v2202_v0 }
  0x17   :  { %1966 = vmatpush3.bf16.msra.mxu0 %v2158_v6  ;;  %2148 = vmatpush3.bf16.msra.mxu1 %v2158_v6 }
  0x18   :  { %1967 = vmatprep.subr.bf16.mxu0 %v2202_v0  ;;  %2141 = vmatprep.subr.bf16.mxu1 %v2202_v0 }
  0x1b   :  { %1968 = vmatpush3.bf16.msra.mxu0 %v2159_v7  ;;  %2149 = vmatpush3.bf16.msra.mxu1 %v2159_v7 }
  0x1c   :  { %1969 = vmatprep.subr.bf16.mxu0 %v2202_v0  ;;  %2142 = vmatprep.subr.bf16.mxu1 %v2202_v0 }
  0x1f   :  { %1970 = vmatpush3.bf16.msra.mxu0 %v2160_v8  ;;  %2150 = vmatpush3.bf16.msra.mxu1 %v2160_v8 }
  0x22   :  { %1972 = vmatmul.mubr.bf16.vlgmr.msra.gmra.mrb[0].mxu0 %v2161_v9  ;;  %2056 = vmatmul.mubr.bf16.vlgmr.msra.gmra.mrb[0].mxu1 %v2172_v10 }
  0x23   :  { %1975 = vmatprep.mubr.msk.bf16.mxu0 %vm2203_vm0, %v2202_v0  ;;  %2059 = vmatprep.mubr.msk.bf16.mxu1 %vm2203_vm0, %v2202_v0 }
  0x2a   :  { %1976 = vmatmul.mubr.bf16.gmra.mrb[4].mxu0 %v2162_v11  ;;  %2060 = vmatmul.mubr.bf16.gmra.mrb[4].mxu1 %v2174_v12 }
  0x2b   :  { %1979 = vmatprep.mubr.msk.bf16.mxu0 %vm2203_vm0, %v2202_v0  ;;  %2063 = vmatprep.mubr.msk.bf16.mxu1 %vm2203_vm0, %v2202_v0 }
  0x32   :  { %1980 = vmatmul.mubr.bf16.gmra.mrb[8].mxu0 %v2163_v13  ;;  %2064 = vmatmul.mubr.bf16.gmra.mrb[8].mxu1 %v2176_v14 }
  0x33   :  { %1983 = vmatprep.mubr.msk.bf16.mxu0 %vm2203_vm0, %v2202_v0  ;;  %2067 = vmatprep.mubr.msk.bf16.mxu1 %vm2203_vm0, %v2202_v0 }
  0x3a   :  { %1984 = vmatmul.mubr.bf16.gmra.mrb[12].mxu0 %v2164_v15  ;;  %2068 = vmatmul.mubr.bf16.gmra.mrb[12].mxu1 %v2178_v16 }
  0x3b   :  { %1987 = vmatprep.mubr.msk.bf16.mxu0 %vm2203_vm0, %v2202_v0  ;;  %2071 = vmatprep.mubr.msk.bf16.mxu1 %vm2203_vm0, %v2202_v0 }
  0x42   :  { %1988 = vmatmul.mubr.bf16.gmra.mrb[16].mxu0 %v2165_v17  ;;  %2072 = vmatmul.mubr.bf16.gmra.mrb[16].mxu1 %v2180_v18 }
  0x43   :  { %1991 = vmatprep.mubr.msk.bf16.mxu0 %vm2203_vm0, %v2202_v0  ;;  %2075 = vmatprep.mubr.msk.bf16.mxu1 %vm2203_vm0, %v2202_v0 }
  0x4a   :  { %1992 = vmatmul.mubr.bf16.gmra.mrb[20].mxu0 %v2166_v19  ;;  %2076 = vmatmul.mubr.bf16.gmra.mrb[20].mxu1 %v2182_v20 }
  0x4b   :  { %1995 = vmatprep.mubr.msk.bf16.mxu0 %vm2203_vm0, %v2202_v0  ;;  %2079 = vmatprep.mubr.msk.bf16.mxu1 %vm2203_vm0, %v2202_v0 }
  0x52   :  { %1996 = vmatmul.mubr.bf16.gmra.mrb[24].mxu0 %v2167_v21  ;;  %2080 = vmatmul.mubr.bf16.gmra.mrb[24].mxu1 %v2184_v22 }
  0x53   :  { %1999 = vmatprep.mubr.msk.bf16.mxu0 %vm2203_vm0, %v2202_v0  ;;  %2083 = vmatprep.mubr.msk.bf16.mxu1 %vm2203_vm0, %v2202_v0 }
  0x5a   :  { %2000 = vmatmul.mubr.bf16.gmra.mrb[28].mxu0 %v2168_v23  ;;  %2084 = vmatmul.mubr.bf16.gmra.mrb[28].mxu1 %v2186_v24 }
  0x5b   :  { %2003 = vmatprep.mubr.msk.bf16.mxu0 %vm2203_vm0, %v2202_v0  ;;  %2087 = vmatprep.mubr.msk.bf16.mxu1 %vm2203_vm0, %v2202_v0 }
  0x62   :  { %2004 = vmatmul.mubr.bf16.gmra.mrb[32].mxu0 %v2169_v25  ;;  %2088 = vmatmul.mubr.bf16.gmra.mrb[32].mxu1 %v2188_v26 }
  0x63   :  { %2007 = vmatprep.mubr.msk.bf16.mxu0 %vm2203_vm0, %v2202_v0  ;;  %2091 = vmatprep.mubr.msk.bf16.mxu1 %vm2203_vm0, %v2202_v0 }
  0x6a   :  { %2008 = vmatmul.mubr.bf16.gmra.mrb[36].mxu0 %v2170_v27  ;;  %2092 = vmatmul.mubr.bf16.gmra.mrb[36].mxu1 %v2190_v28 }
  0x6b   :  { %2011 = vmatprep.mubr.msk.bf16.mxu0 %vm2203_vm0, %v2202_v0  ;;  %2095 = vmatprep.mubr.msk.bf16.mxu1 %vm2203_vm0, %v2202_v0 }
  0x72   :  { %2012 = vmatmul.mubr.bf16.gmra.mrb[40].mxu0 %v2171_v29  ;;  %2096 = vmatmul.mubr.bf16.gmra.mrb[40].mxu1 %v2192_v30 }
  0x73   :  { %2015 = vmatprep.mubr.msk.bf16.mxu0 %vm2203_vm0, %v2202_v0  ;;  %2099 = vmatprep.mubr.msk.bf16.mxu1 %vm2203_vm0, %v2202_v0 }
  0x7a   :  { %2016 = vmatmul.mubr.bf16.gmra.mrb[44].mxu0 %v2173_v31  ;;  %2100 = vmatmul.mubr.bf16.gmra.mrb[44].mxu1 %v2193_v32 }
  0x7b   :  { %2019 = vmatprep.mubr.msk.bf16.mxu0 %vm2203_vm0, %v2202_v0  ;;  %2103 = vmatprep.mubr.msk.bf16.mxu1 %vm2203_vm0, %v2202_v0 }
  0x82   :  { %2020 = vmatmul.mubr.bf16.gmra.mrb[48].mxu0 %v2175_v33  ;;  %2104 = vmatmul.mubr.bf16.gmra.mrb[48].mxu1 %v2194_v34 }
  0x83   :  { %2023 = vmatprep.mubr.msk.bf16.mxu0 %vm2203_vm0, %v2202_v0  ;;  %2107 = vmatprep.mubr.msk.bf16.mxu1 %vm2203_vm0, %v2202_v0 }
  0x8a   :  { %2024 = vmatmul.mubr.bf16.gmra.mrb[52].mxu0 %v2177_v35  ;;  %2108 = vmatmul.mubr.bf16.gmra.mrb[52].mxu1 %v2195_v36 }
  0x8b   :  { %2027 = vmatprep.mubr.msk.bf16.mxu0 %vm2203_vm0, %v2202_v0  ;;  %2111 = vmatprep.mubr.msk.bf16.mxu1 %vm2203_vm0, %v2202_v0 }
  0x92   :  { %2028 = vmatmul.mubr.bf16.gmra.mrb[56].mxu0 %v2179_v37  ;;  %2112 = vmatmul.mubr.bf16.gmra.mrb[56].mxu1 %v2196_v38 }
  0x93   :  { %2031 = vmatprep.mubr.msk.bf16.mxu0 %vm2203_vm0, %v2202_v0  ;;  %2115 = vmatprep.mubr.msk.bf16.mxu1 %vm2203_vm0, %v2202_v0 }
  0x9a   :  { %2032 = vmatmul.mubr.bf16.gmra.mrb[60].mxu0 %v2181_v39  ;;  %2116 = vmatmul.mubr.bf16.gmra.mrb[60].mxu1 %v2197_v40 }
  0x9b   :  { %2035 = vmatprep.mubr.msk.bf16.mxu0 %vm2203_vm0, %v2202_v0  ;;  %2119 = vmatprep.mubr.msk.bf16.mxu1 %vm2203_vm0, %v2202_v0 }
  0xa2   :  { %2036 = vmatmul.mubr.bf16.gmra.mrb[64].mxu0 %v2183_v41  ;;  %2120 = vmatmul.mubr.bf16.gmra.mrb[64].mxu1 %v2198_v42 }
  0xa3   :  { %2039 = vmatprep.mubr.msk.bf16.mxu0 %vm2203_vm0, %v2202_v0  ;;  %2123 = vmatprep.mubr.msk.bf16.mxu1 %vm2203_vm0, %v2202_v0 }
  0xaa   :  { %2040 = vmatmul.mubr.bf16.gmra.mrb[68].mxu0 %v2185_v43  ;;  %2124 = vmatmul.mubr.bf16.gmra.mrb[68].mxu1 %v2199_v44 }
  0xab   :  { %2043 = vmatprep.mubr.msk.bf16.mxu0 %vm2203_vm0, %v2202_v0  ;;  %2127 = vmatprep.mubr.msk.bf16.mxu1 %vm2203_vm0, %v2202_v0 }
  0xb2   :  { %2044 = vmatmul.mubr.bf16.gmra.mrb[72].mxu0 %v2187_v45  ;;  %2128 = vmatmul.mubr.bf16.gmra.mrb[72].mxu1 %v2200_v46 }
  0xb3   :  { %2047 = vmatprep.mubr.msk.bf16.mxu0 %vm2203_vm0, %v2202_v0  ;;  %2131 = vmatprep.mubr.msk.bf16.mxu1 %vm2203_vm0, %v2202_v0 }
  0xba   :  { %2048 = vmatmul.mubr.bf16.gmra.mrb[76].mxu0 %v2189_v47  ;;  %2132 = vmatmul.mubr.bf16.gmra.mrb[76].mxu1 %v2201_v48 }
  0xbb   :  { %2051 = vmatprep.mubr.msk.bf16.mxu0 %vm2203_vm0, %v2202_v0 }
  0xc2   :  { %2052 = vmatmul.mubr.bf16.gmra.mrb[80].mxu0 %v2191_v49 }
  0xf5   :  { %v441_v50 = vpop.f32.mrb[0].mxu0  ;;  %v2474_v51 = vpop.f32.mrb[0].mxu1 }
  0xf6   :  { %v1973_v52 = vpop.f32.mrb[1].mxu0  ;;  %v2057_v53 = vpop.f32.mrb[1].mxu1  ;;  %v1266_v54 = vmul.f32 %v441_v50, %v441_v50 }
  0xf7   :  { %v444_v55 = vpop.f32.mrb[2].mxu0  ;;  %v2476_v56 = vpop.f32.mrb[2].mxu1 }
  0xf8   :  { %v1664_v57 = vpack.c.bf16 %v444_v55, %v441_v50  ;;  %v1178_v58 = vadd.f32 %v444_v55, %v441_v50  ;;  %v1267_v59 = vmul.f32 %v444_v55, %v444_v55  ;;  %v1974_v60 = vpop.f32.mrb[3].mxu0  ;;  %v1769_v61 = vpack.c.bf16 %v2476_v56, %v2474_v51  ;;  %v2058_v62 = vpop.f32.mrb[3].mxu1 }
  0xfa   :  { %1665 = vst [vmem:[%s2845_s2] sm:$0xff] %v1664_v57   ;;  %v1348_v63 = vadd.f32 %v1267_v59, %v1266_v54  ;;  %1886 = vst [vmem:[%s2845_s2 + $0xa8] sm:$0xff] %v1769_v61  }
  0xfd   :  { %v449_v0 = vpop.f32.mrb[4].mxu0  ;;  %v2486_v1 = vpop.f32.mrb[4].mxu1 }
  0xfe   :  { %v1179_v2 = vadd.f32 %v1178_v58, %v449_v0  ;;  %v1268_v3 = vmul.f32 %v449_v0, %v449_v0  ;;  %v1977_v4 = vpop.f32.mrb[5].mxu0  ;;  %v2061_v5 = vpop.f32.mrb[5].mxu1 }
  0xff   :  { %v452_v6 = vpop.f32.mrb[6].mxu0  ;;  %v2488_v7 = vpop.f32.mrb[6].mxu1 }
 0x100   :  { %v1349_v8 = vadd.f32 %v1348_v63, %v1268_v3  ;;  %v1669_v9 = vpack.c.bf16 %v452_v6, %v449_v0  ;;  %v1180_v10 = vadd.f32 %v1179_v2, %v452_v6  ;;  %v1269_v11 = vmul.f32 %v452_v6, %v452_v6  ;;  %v1978_v12 = vpop.f32.mrb[7].mxu0  ;;  %v2062_v13 = vpop.f32.mrb[7].mxu1 }
 0x101   :  { %v1774_v14 = vpack.c.bf16 %v2488_v7, %v2486_v1 }
 0x102   :  { %1866 = vst [vmem:[%s2845_s2 + $0x8] sm:$0xff] %v1669_v9   ;;  %v1350_v15 = vadd.f32 %v1349_v8, %v1269_v11 }
 0x103   :  { %1887 = vst [vmem:[%s2845_s2 + $0xb0] sm:$0xff] %v1774_v14  }
 0x105   :  { %v457_v16 = vpop.f32.mrb[8].mxu0  ;;  %v2498_v17 = vpop.f32.mrb[8].mxu1 }
 0x106   :  { %v1181_v18 = vadd.f32 %v1180_v10, %v457_v16  ;;  %v1270_v19 = vmul.f32 %v457_v16, %v457_v16  ;;  %v1981_v20 = vpop.f32.mrb[9].mxu0  ;;  %v2065_v21 = vpop.f32.mrb[9].mxu1 }
 0x107   :  { %v460_v22 = vpop.f32.mrb[10].mxu0  ;;  %v2500_v23 = vpop.f32.mrb[10].mxu1 }
 0x108   :  { %v1351_v24 = vadd.f32 %v1350_v15, %v1270_v19  ;;  %v1674_v25 = vpack.c.bf16 %v460_v22, %v457_v16  ;;  %v1182_v26 = vadd.f32 %v1181_v18, %v460_v22  ;;  %v1271_v27 = vmul.f32 %v460_v22, %v460_v22  ;;  %v1982_v28 = vpop.f32.mrb[11].mxu0  ;;  %v2066_v29 = vpop.f32.mrb[11].mxu1 }
 0x109   :  { %v1779_v30 = vpack.c.bf16 %v2500_v23, %v2498_v17 }
 0x10a   :  { %1867 = vst [vmem:[%s2845_s2 + $0x10] sm:$0xff] %v1674_v25   ;;  %v1352_v31 = vadd.f32 %v1351_v24, %v1271_v27 }
 0x10b   :  { %1888 = vst [vmem:[%s2845_s2 + $0xb8] sm:$0xff] %v1779_v30  }
 0x10d   :  { %v465_v32 = vpop.f32.mrb[12].mxu0  ;;  %v2510_v33 = vpop.f32.mrb[12].mxu1 }
 0x10e   :  { %v1183_v34 = vadd.f32 %v1182_v26, %v465_v32  ;;  %v1272_v35 = vmul.f32 %v465_v32, %v465_v32  ;;  %v1985_v36 = vpop.f32.mrb[13].mxu0  ;;  %v2069_v37 = vpop.f32.mrb[13].mxu1 }
 0x10f   :  { %v468_v38 = vpop.f32.mrb[14].mxu0  ;;  %v2512_v39 = vpop.f32.mrb[14].mxu1 }
 0x110   :  { %v1353_v40 = vadd.f32 %v1352_v31, %v1272_v35  ;;  %v1679_v41 = vpack.c.bf16 %v468_v38, %v465_v32  ;;  %v1184_v42 = vadd.f32 %v1183_v34, %v468_v38  ;;  %v1273_v43 = vmul.f32 %v468_v38, %v468_v38  ;;  %v1986_v44 = vpop.f32.mrb[15].mxu0  ;;  %v2070_v45 = vpop.f32.mrb[15].mxu1 }
 0x111   :  { %v1784_v46 = vpack.c.bf16 %v2512_v39, %v2510_v33 }
 0x112   :  { %1868 = vst [vmem:[%s2845_s2 + $0x18] sm:$0xff] %v1679_v41   ;;  %v1354_v47 = vadd.f32 %v1353_v40, %v1273_v43 }
 0x113   :  { %1889 = vst [vmem:[%s2845_s2 + $0xc0] sm:$0xff] %v1784_v46  }
 0x115   :  { %v473_v48 = vpop.f32.mrb[16].mxu0  ;;  %v2522_v49 = vpop.f32.mrb[16].mxu1 }
 0x116   :  { %v1185_v50 = vadd.f32 %v1184_v42, %v473_v48  ;;  %v1274_v52 = vmul.f32 %v473_v48, %v473_v48  ;;  %v1989_v53 = vpop.f32.mrb[17].mxu0  ;;  %v2073_v54 = vpop.f32.mrb[17].mxu1 }
 0x117   :  { %v476_v55 = vpop.f32.mrb[18].mxu0  ;;  %v2524_v57 = vpop.f32.mrb[18].mxu1 }
 0x118   :  { %v1355_v58 = vadd.f32 %v1354_v47, %v1274_v52  ;;  %v1684_v59 = vpack.c.bf16 %v476_v55, %v473_v48  ;;  %v1186_v60 = vadd.f32 %v1185_v50, %v476_v55  ;;  %v1275_v61 = vmul.f32 %v476_v55, %v476_v55  ;;  %v1990_v62 = vpop.f32.mrb[19].mxu0  ;;  %v2074_v63 = vpop.f32.mrb[19].mxu1 }
 0x119   :  { %v1789_v0 = vpack.c.bf16 %v2524_v57, %v2522_v49 }
 0x11a   :  { %1869 = vst [vmem:[%s2845_s2 + $0x20] sm:$0xff] %v1684_v59   ;;  %v1356_v2 = vadd.f32 %v1355_v58, %v1275_v61 }
 0x11b   :  { %1890 = vst [vmem:[%s2845_s2 + $0xc8] sm:$0xff] %v1789_v0  }
 0x11d   :  { %v481_v3 = vpop.f32.mrb[20].mxu0  ;;  %v2534_v4 = vpop.f32.mrb[20].mxu1 }
 0x11e   :  { %v1187_v5 = vadd.f32 %v1186_v60, %v481_v3  ;;  %v1276_v6 = vmul.f32 %v481_v3, %v481_v3  ;;  %v1993_v8 = vpop.f32.mrb[21].mxu0  ;;  %v2077_v9 = vpop.f32.mrb[21].mxu1 }
 0x11f   :  { %v484_v10 = vpop.f32.mrb[22].mxu0  ;;  %v2536_v11 = vpop.f32.mrb[22].mxu1 }
 0x120   :  { %v1357_v12 = vadd.f32 %v1356_v2, %v1276_v6  ;;  %v1689_v13 = vpack.c.bf16 %v484_v10, %v481_v3  ;;  %v1188_v14 = vadd.f32 %v1187_v5, %v484_v10  ;;  %v1277_v15 = vmul.f32 %v484_v10, %v484_v10  ;;  %v1994_v16 = vpop.f32.mrb[23].mxu0  ;;  %v2078_v18 = vpop.f32.mrb[23].mxu1 }
 0x121   :  { %v1794_v19 = vpack.c.bf16 %v2536_v11, %v2534_v4 }
 0x122   :  { %1870 = vst [vmem:[%s2845_s2 + $0x28] sm:$0xff] %v1689_v13   ;;  %v1358_v20 = vadd.f32 %v1357_v12, %v1277_v15 }
 0x123   :  { %1891 = vst [vmem:[%s2845_s2 + $0xd0] sm:$0xff] %v1794_v19  }
 0x125   :  { %v489_v21 = vpop.f32.mrb[24].mxu0  ;;  %v2546_v22 = vpop.f32.mrb[24].mxu1 }
 0x126   :  { %v1189_v24 = vadd.f32 %v1188_v14, %v489_v21  ;;  %v1278_v25 = vmul.f32 %v489_v21, %v489_v21  ;;  %v1997_v26 = vpop.f32.mrb[25].mxu0  ;;  %v2081_v27 = vpop.f32.mrb[25].mxu1 }
 0x127   :  { %v492_v28 = vpop.f32.mrb[26].mxu0  ;;  %v2548_v29 = vpop.f32.mrb[26].mxu1 }
 0x128   :  { %v1359_v30 = vadd.f32 %v1358_v20, %v1278_v25  ;;  %v1694_v31 = vpack.c.bf16 %v492_v28, %v489_v21  ;;  %v1190_v32 = vadd.f32 %v1189_v24, %v492_v28  ;;  %v1279_v34 = vmul.f32 %v492_v28, %v492_v28  ;;  %v1998_v35 = vpop.f32.mrb[27].mxu0  ;;  %v2082_v36 = vpop.f32.mrb[27].mxu1 }
 0x129   :  { %v1799_v37 = vpack.c.bf16 %v2548_v29, %v2546_v22 }
 0x12a   :  { %1871 = vst [vmem:[%s2845_s2 + $0x30] sm:$0xff] %v1694_v31   ;;  %v1360_v38 = vadd.f32 %v1359_v30, %v1279_v34 }
 0x12b   :  { %1892 = vst [vmem:[%s2845_s2 + $0xd8] sm:$0xff] %v1799_v37  }
 0x12d   :  { %v497_v40 = vpop.f32.mrb[28].mxu0  ;;  %v2558_v41 = vpop.f32.mrb[28].mxu1 }
 0x12e   :  { %v1191_v42 = vadd.f32 %v1190_v32, %v497_v40  ;;  %v1280_v43 = vmul.f32 %v497_v40, %v497_v40  ;;  %v2001_v44 = vpop.f32.mrb[29].mxu0  ;;  %v2085_v45 = vpop.f32.mrb[29].mxu1 }
 0x12f   :  { %v500_v46 = vpop.f32.mrb[30].mxu0  ;;  %v2560_v47 = vpop.f32.mrb[30].mxu1 }
 0x130   :  { %v1361_v48 = vadd.f32 %v1360_v38, %v1280_v43  ;;  %v1699_v50 = vpack.c.bf16 %v500_v46, %v497_v40  ;;  %v1192_v52 = vadd.f32 %v1191_v42, %v500_v46  ;;  %v1281_v53 = vmul.f32 %v500_v46, %v500_v46  ;;  %v2002_v54 = vpop.f32.mrb[31].mxu0  ;;  %v2086_v55 = vpop.f32.mrb[31].mxu1 }
 0x131   :  { %v1804_v58 = vpack.c.bf16 %v2560_v47, %v2558_v41 }
 0x132   :  { %1872 = vst [vmem:[%s2845_s2 + $0x38] sm:$0xff] %v1699_v50   ;;  %v1362_v59 = vadd.f32 %v1361_v48, %v1281_v53 }
 0x133   :  { %1893 = vst [vmem:[%s2845_s2 + $0xe0] sm:$0xff] %v1804_v58  }
 0x135   :  { %v505_v60 = vpop.f32.mrb[32].mxu0  ;;  %v2570_v61 = vpop.f32.mrb[32].mxu1 }
 0x136   :  { %v1193_v62 = vadd.f32 %v1192_v52, %v505_v60  ;;  %v1282_v63 = vmul.f32 %v505_v60, %v505_v60  ;;  %v2005_v0 = vpop.f32.mrb[33].mxu0  ;;  %v2089_v2 = vpop.f32.mrb[33].mxu1 }
 0x137   :  { %v508_v3 = vpop.f32.mrb[34].mxu0  ;;  %v2572_v5 = vpop.f32.mrb[34].mxu1 }
 0x138   :  { %v1363_v6 = vadd.f32 %v1362_v59, %v1282_v63  ;;  %v1704_v8 = vpack.c.bf16 %v508_v3, %v505_v60  ;;  %v1194_v9 = vadd.f32 %v1193_v62, %v508_v3  ;;  %v1283_v10 = vmul.f32 %v508_v3, %v508_v3  ;;  %v2006_v12 = vpop.f32.mrb[35].mxu0  ;;  %v2090_v13 = vpop.f32.mrb[35].mxu1 }
 0x139   :  { %v1809_v14 = vpack.c.bf16 %v2572_v5, %v2570_v61 }
 0x13a   :  { %1873 = vst [vmem:[%s2845_s2 + $0x40] sm:$0xff] %v1704_v8   ;;  %v1364_v15 = vadd.f32 %v1363_v6, %v1283_v10 }
 0x13b   :  { %1894 = vst [vmem:[%s2845_s2 + $0xe8] sm:$0xff] %v1809_v14  }
 0x13d   :  { %v513_v16 = vpop.f32.mrb[36].mxu0  ;;  %v2582_v18 = vpop.f32.mrb[36].mxu1 }
 0x13e   :  { %v1195_v19 = vadd.f32 %v1194_v9, %v513_v16  ;;  %v1284_v20 = vmul.f32 %v513_v16, %v513_v16  ;;  %v2009_v21 = vpop.f32.mrb[37].mxu0  ;;  %v2093_v24 = vpop.f32.mrb[37].mxu1 }
 0x13f   :  { %v516_v25 = vpop.f32.mrb[38].mxu0  ;;  %v2584_v26 = vpop.f32.mrb[38].mxu1 }
 0x140   :  { %v1365_v27 = vadd.f32 %v1364_v15, %v1284_v20  ;;  %v1709_v28 = vpack.c.bf16 %v516_v25, %v513_v16  ;;  %v1196_v30 = vadd.f32 %v1195_v19, %v516_v25  ;;  %v1285_v31 = vmul.f32 %v516_v25, %v516_v25  ;;  %v2010_v32 = vpop.f32.mrb[39].mxu0  ;;  %v2094_v34 = vpop.f32.mrb[39].mxu1 }
 0x141   :  { %v1814_v35 = vpack.c.bf16 %v2584_v26, %v2582_v18 }
 0x142   :  { %1874 = vst [vmem:[%s2845_s2 + $0x48] sm:$0xff] %v1709_v28   ;;  %v1366_v36 = vadd.f32 %v1365_v27, %v1285_v31 }
 0x143   :  { %1895 = vst [vmem:[%s2845_s2 + $0xf0] sm:$0xff] %v1814_v35  }
 0x145   :  { %v521_v37 = vpop.f32.mrb[40].mxu0  ;;  %v2594_v38 = vpop.f32.mrb[40].mxu1 }
 0x146   :  { %v1197_v40 = vadd.f32 %v1196_v30, %v521_v37  ;;  %v1286_v42 = vmul.f32 %v521_v37, %v521_v37  ;;  %v2013_v43 = vpop.f32.mrb[41].mxu0  ;;  %v2097_v44 = vpop.f32.mrb[41].mxu1 }
 0x147   :  { %v524_v45 = vpop.f32.mrb[42].mxu0  ;;  %v2596_v46 = vpop.f32.mrb[42].mxu1 }
 0x148   :  { %v1367_v48 = vadd.f32 %v1366_v36, %v1286_v42  ;;  %v1714_v50 = vpack.c.bf16 %v524_v45, %v521_v37  ;;  %v1198_v52 = vadd.f32 %v1197_v40, %v524_v45  ;;  %v1287_v53 = vmul.f32 %v524_v45, %v524_v45  ;;  %v2014_v54 = vpop.f32.mrb[43].mxu0  ;;  %v2098_v55 = vpop.f32.mrb[43].mxu1 }
 0x149   :  { %v1819_v58 = vpack.c.bf16 %v2596_v46, %v2594_v38 }
 0x14a   :  { %1875 = vst [vmem:[%s2845_s2 + $0x50] sm:$0xff] %v1714_v50   ;;  %v1368_v59 = vadd.f32 %v1367_v48, %v1287_v53 }
 0x14b   :  { %1896 = vst [vmem:[%s2845_s2 + $0xf8] sm:$0xff] %v1819_v58  }
 0x14d   :  { %v529_v60 = vpop.f32.mrb[44].mxu0  ;;  %v2606_v62 = vpop.f32.mrb[44].mxu1 }
 0x14e   :  { %v1199_v63 = vadd.f32 %v1198_v52, %v529_v60  ;;  %v1288_v0 = vmul.f32 %v529_v60, %v529_v60  ;;  %v2017_v2 = vpop.f32.mrb[45].mxu0  ;;  %v2101_v3 = vpop.f32.mrb[45].mxu1 }
 0x14f   :  { %v532_v6 = vpop.f32.mrb[46].mxu0  ;;  %v2608_v8 = vpop.f32.mrb[46].mxu1 }
 0x150   :  { %v1369_v9 = vadd.f32 %v1368_v59, %v1288_v0  ;;  %v1719_v10 = vpack.c.bf16 %v532_v6, %v529_v60  ;;  %v1200_v12 = vadd.f32 %v1199_v63, %v532_v6  ;;  %v1289_v13 = vmul.f32 %v532_v6, %v532_v6  ;;  %v2018_v14 = vpop.f32.mrb[47].mxu0  ;;  %v2102_v15 = vpop.f32.mrb[47].mxu1 }
 0x151   :  { %v1824_v16 = vpack.c.bf16 %v2608_v8, %v2606_v62 }
 0x152   :  { %1876 = vst [vmem:[%s2845_s2 + $0x58] sm:$0xff] %v1719_v10   ;;  %v1370_v19 = vadd.f32 %v1369_v9, %v1289_v13 }
 0x153   :  { %1897 = vst [vmem:[%s2845_s2 + $0x100] sm:$0xff] %v1824_v16  }
 0x155   :  { %v537_v20 = vpop.f32.mrb[48].mxu0  ;;  %v2618_v21 = vpop.f32.mrb[48].mxu1 }
 0x156   :  { %v1201_v24 = vadd.f32 %v1200_v12, %v537_v20  ;;  %v1290_v25 = vmul.f32 %v537_v20, %v537_v20  ;;  %v2021_v27 = vpop.f32.mrb[49].mxu0  ;;  %v2105_v28 = vpop.f32.mrb[49].mxu1 }
 0x157   :  { %v540_v30 = vpop.f32.mrb[50].mxu0  ;;  %v2620_v31 = vpop.f32.mrb[50].mxu1 }
 0x158   :  { %v1371_v32 = vadd.f32 %v1370_v19, %v1290_v25  ;;  %v1724_v34 = vpack.c.bf16 %v540_v30, %v537_v20  ;;  %v1202_v35 = vadd.f32 %v1201_v24, %v540_v30  ;;  %v1291_v36 = vmul.f32 %v540_v30, %v540_v30  ;;  %v2022_v37 = vpop.f32.mrb[51].mxu0  ;;  %v2106_v40 = vpop.f32.mrb[51].mxu1 }
 0x159   :  { %v1829_v42 = vpack.c.bf16 %v2620_v31, %v2618_v21 }
 0x15a   :  { %1877 = vst [vmem:[%s2845_s2 + $0x60] sm:$0xff] %v1724_v34   ;;  %v1372_v43 = vadd.f32 %v1371_v32, %v1291_v36 }
 0x15b   :  { %1898 = vst [vmem:[%s2845_s2 + $0x108] sm:$0xff] %v1829_v42  }
 0x15d   :  { %v545_v44 = vpop.f32.mrb[52].mxu0  ;;  %v2630_v45 = vpop.f32.mrb[52].mxu1 }
 0x15e   :  { %v1203_v48 = vadd.f32 %v1202_v35, %v545_v44  ;;  %v1292_v50 = vmul.f32 %v545_v44, %v545_v44  ;;  %v2025_v52 = vpop.f32.mrb[53].mxu0  ;;  %v2109_v53 = vpop.f32.mrb[53].mxu1 }
 0x15f   :  { %v548_v54 = vpop.f32.mrb[54].mxu0  ;;  %v2632_v55 = vpop.f32.mrb[54].mxu1 }
 0x160   :  { %v1373_v58 = vadd.f32 %v1372_v43, %v1292_v50  ;;  %v1729_v59 = vpack.c.bf16 %v548_v54, %v545_v44  ;;  %v1204_v60 = vadd.f32 %v1203_v48, %v548_v54  ;;  %v1293_v63 = vmul.f32 %v548_v54, %v548_v54  ;;  %v2026_v0 = vpop.f32.mrb[55].mxu0  ;;  %v2110_v2 = vpop.f32.mrb[55].mxu1 }
 0x161   :  { %v1834_v3 = vpack.c.bf16 %v2632_v55, %v2630_v45 }
 0x162   :  { %1878 = vst [vmem:[%s2845_s2 + $0x68] sm:$0xff] %v1729_v59   ;;  %v1374_v6 = vadd.f32 %v1373_v58, %v1293_v63 }
 0x163   :  { %1899 = vst [vmem:[%s2845_s2 + $0x110] sm:$0xff] %v1834_v3  }
 0x165   :  { %v553_v9 = vpop.f32.mrb[56].mxu0  ;;  %v2642_v10 = vpop.f32.mrb[56].mxu1 }
 0x166   :  { %v1205_v12 = vadd.f32 %v1204_v60, %v553_v9  ;;  %v1294_v13 = vmul.f32 %v553_v9, %v553_v9  ;;  %v2029_v14 = vpop.f32.mrb[57].mxu0  ;;  %v2113_v15 = vpop.f32.mrb[57].mxu1 }
 0x167   :  { %v556_v16 = vpop.f32.mrb[58].mxu0  ;;  %v2644_v19 = vpop.f32.mrb[58].mxu1 }
 0x168   :  { %v1375_v20 = vadd.f32 %v1374_v6, %v1294_v13  ;;  %v1734_v24 = vpack.c.bf16 %v556_v16, %v553_v9  ;;  %v1206_v25 = vadd.f32 %v1205_v12, %v556_v16  ;;  %v1295_v27 = vmul.f32 %v556_v16, %v556_v16  ;;  %v2030_v28 = vpop.f32.mrb[59].mxu0  ;;  %v2114_v30 = vpop.f32.mrb[59].mxu1 }
 0x169   :  { %v1839_v32 = vpack.c.bf16 %v2644_v19, %v2642_v10 }
 0x16a   :  { %1879 = vst [vmem:[%s2845_s2 + $0x70] sm:$0xff] %v1734_v24   ;;  %v1376_v34 = vadd.f32 %v1375_v20, %v1295_v27 }
 0x16b   :  { %1900 = vst [vmem:[%s2845_s2 + $0x118] sm:$0xff] %v1839_v32  }
 0x16d   :  { %v561_v35 = vpop.f32.mrb[60].mxu0  ;;  %v2654_v36 = vpop.f32.mrb[60].mxu1 }
 0x16e   :  { %v1207_v37 = vadd.f32 %v1206_v25, %v561_v35  ;;  %v1296_v40 = vmul.f32 %v561_v35, %v561_v35  ;;  %v2033_v42 = vpop.f32.mrb[61].mxu0  ;;  %v2117_v43 = vpop.f32.mrb[61].mxu1 }
 0x16f   :  { %v564_v44 = vpop.f32.mrb[62].mxu0  ;;  %v2656_v48 = vpop.f32.mrb[62].mxu1 }
 0x170   :  { %v1377_v50 = vadd.f32 %v1376_v34, %v1296_v40  ;;  %v1739_v52 = vpack.c.bf16 %v564_v44, %v561_v35  ;;  %v1208_v53 = vadd.f32 %v1207_v37, %v564_v44  ;;  %v1297_v54 = vmul.f32 %v564_v44, %v564_v44  ;;  %v2034_v58 = vpop.f32.mrb[63].mxu0  ;;  %v2118_v59 = vpop.f32.mrb[63].mxu1 }
 0x171   :  { %v1844_v60 = vpack.c.bf16 %v2656_v48, %v2654_v36 }
 0x172   :  { %1880 = vst [vmem:[%s2845_s2 + $0x78] sm:$0xff] %v1739_v52   ;;  %v1378_v63 = vadd.f32 %v1377_v50, %v1297_v54 }
 0x173   :  { %1901 = vst [vmem:[%s2845_s2 + $0x120] sm:$0xff] %v1844_v60  }
 0x175   :  { %v569_v0 = vpop.f32.mrb[64].mxu0  ;;  %v2666_v2 = vpop.f32.mrb[64].mxu1 }
 0x176   :  { %v1209_v3 = vadd.f32 %v1208_v53, %v569_v0  ;;  %v1298_v6 = vmul.f32 %v569_v0, %v569_v0  ;;  %v2037_v9 = vpop.f32.mrb[65].mxu0  ;;  %v2121_v12 = vpop.f32.mrb[65].mxu1 }
 0x177   :  { %v572_v13 = vpop.f32.mrb[66].mxu0  ;;  %v2668_v14 = vpop.f32.mrb[66].mxu1 }
 0x178   :  { %v1379_v15 = vadd.f32 %v1378_v63, %v1298_v6  ;;  %v1744_v16 = vpack.c.bf16 %v572_v13, %v569_v0  ;;  %v1210_v20 = vadd.f32 %v1209_v3, %v572_v13  ;;  %v1299_v24 = vmul.f32 %v572_v13, %v572_v13  ;;  %v2038_v25 = vpop.f32.mrb[67].mxu0  ;;  %v2122_v27 = vpop.f32.mrb[67].mxu1 }
 0x179   :  { %v1849_v28 = vpack.c.bf16 %v2668_v14, %v2666_v2 }
 0x17a   :  { %1881 = vst [vmem:[%s2845_s2 + $0x80] sm:$0xff] %v1744_v16   ;;  %v1380_v30 = vadd.f32 %v1379_v15, %v1299_v24 }
 0x17b   :  { %1902 = vst [vmem:[%s2845_s2 + $0x128] sm:$0xff] %v1849_v28  }
 0x17d   :  { %v577_v32 = vpop.f32.mrb[68].mxu0  ;;  %v2678_v34 = vpop.f32.mrb[68].mxu1 }
 0x17e   :  { %v1211_v35 = vadd.f32 %v1210_v20, %v577_v32  ;;  %v1300_v37 = vmul.f32 %v577_v32, %v577_v32  ;;  %v2041_v40 = vpop.f32.mrb[69].mxu0  ;;  %v2125_v42 = vpop.f32.mrb[69].mxu1 }
 0x17f   :  { %v580_v43 = vpop.f32.mrb[70].mxu0  ;;  %v2680_v44 = vpop.f32.mrb[70].mxu1 }
 0x180   :  { %v1381_v50 = vadd.f32 %v1380_v30, %v1300_v37  ;;  %v1749_v52 = vpack.c.bf16 %v580_v43, %v577_v32  ;;  %v1212_v53 = vadd.f32 %v1211_v35, %v580_v43  ;;  %v1301_v54 = vmul.f32 %v580_v43, %v580_v43  ;;  %v2042_v58 = vpop.f32.mrb[71].mxu0  ;;  %v2126_v59 = vpop.f32.mrb[71].mxu1 }
 0x181   :  { %v1854_v60 = vpack.c.bf16 %v2680_v44, %v2678_v34 }
 0x182   :  { %1882 = vst [vmem:[%s2845_s2 + $0x88] sm:$0xff] %v1749_v52   ;;  %v1382_v63 = vadd.f32 %v1381_v50, %v1301_v54 }
 0x183   :  { %1903 = vst [vmem:[%s2845_s2 + $0x130] sm:$0xff] %v1854_v60  }
 0x185   :  { %v585_v0 = vpop.f32.mrb[72].mxu0  ;;  %v2690_v3 = vpop.f32.mrb[72].mxu1 }
 0x186   :  { %v1213_v6 = vadd.f32 %v1212_v53, %v585_v0  ;;  %v1302_v9 = vmul.f32 %v585_v0, %v585_v0  ;;  %v2045_v12 = vpop.f32.mrb[73].mxu0  ;;  %v2129_v13 = vpop.f32.mrb[73].mxu1 }
 0x187   :  { %v588_v15 = vpop.f32.mrb[74].mxu0  ;;  %v2692_v16 = vpop.f32.mrb[74].mxu1 }
 0x188   :  { %v1383_v20 = vadd.f32 %v1382_v63, %v1302_v9  ;;  %v1754_v24 = vpack.c.bf16 %v588_v15, %v585_v0  ;;  %v1214_v25 = vadd.f32 %v1213_v6, %v588_v15  ;;  %v1303_v27 = vmul.f32 %v588_v15, %v588_v15  ;;  %v2046_v28 = vpop.f32.mrb[75].mxu0  ;;  %v2130_v30 = vpop.f32.mrb[75].mxu1 }
 0x189   :  { %v1859_v32 = vpack.c.bf16 %v2692_v16, %v2690_v3 }
 0x18a   :  { %1883 = vst [vmem:[%s2845_s2 + $0x90] sm:$0xff] %v1754_v24   ;;  %v1384_v35 = vadd.f32 %v1383_v20, %v1303_v27 }
 0x18b   :  { %1904 = vst [vmem:[%s2845_s2 + $0x138] sm:$0xff] %v1859_v32  }
 0x18d   :  { %v593_v37 = vpop.f32.mrb[76].mxu0  ;;  %v2702_v40 = vpop.f32.mrb[76].mxu1 }
 0x18e   :  { %v1215_v42 = vadd.f32 %v1214_v25, %v593_v37  ;;  %v1304_v43 = vmul.f32 %v593_v37, %v593_v37  ;;  %v2049_v50 = vpop.f32.mrb[77].mxu0  ;;  %v2133_v52 = vpop.f32.mrb[77].mxu1 }
 0x18f   :  { %v596_v53 = vpop.f32.mrb[78].mxu0  ;;  %v2704_v54 = vpop.f32.mrb[78].mxu1  ;;  %v1309_v50 = vmul.f32 %v2476_v56, %v2476_v56 }
 0x190   :  { %v1385_v58 = vadd.f32 %v1384_v35, %v1304_v43  ;;  %v1759_v59 = vpack.c.bf16 %v596_v53, %v593_v37  ;;  %v1216_v60 = vadd.f32 %v1215_v42, %v596_v53  ;;  %v1305_v63 = vmul.f32 %v596_v53, %v596_v53  ;;  %v2050_v0 = vpop.f32.mrb[79].mxu0  ;;  %v2134_v6 = vpop.f32.mrb[79].mxu1 }
 0x191   :  { %v1864_v9 = vpack.c.bf16 %v2704_v54, %v2702_v40  ;;  %v1308_v37 = vmul.f32 %v2474_v51, %v2474_v51 }
 0x192   :  { %1884 = vst [vmem:[%s2845_s2 + $0x98] sm:$0xff] %v1759_v59   ;;  %v1386_v12 = vadd.f32 %v1385_v58, %v1305_v63  ;;  %v1310_v58 = vmul.f32 %v2486_v1, %v2486_v1  ;;  %v1311_v63 = vmul.f32 %v2488_v7, %v2488_v7 }
 0x193   :  { %1905 = vst [vmem:[%s2845_s2 + $0x140] sm:$0xff] %v1864_v9  }
 0x195   :  { %v601_v13 = vpop.f32.mrb[80].mxu0 }
 0x196   :  { %v1217_v15 = vadd.f32 %v1216_v60, %v601_v13  ;;  %v1306_v20 = vmul.f32 %v601_v13, %v601_v13  ;;  %v2053_v24 = vpop.f32.mrb[81].mxu0 }
 0x197   :  { %v604_v25 = vpop.f32.mrb[82].mxu0 }
 0x198   :  { %v1387_v27 = vadd.f32 %v1386_v12, %v1306_v20  ;;  %v1764_v28 = vpack.c.bf16 %v604_v25, %v601_v13  ;;  %v1218_v30 = vadd.f32 %v1217_v15, %v604_v25  ;;  %v1307_v32 = vmul.f32 %v604_v25, %v604_v25  ;;  %v2054_v35 = vpop.f32.mrb[83].mxu0 }
 0x19a   :  { %1885 = vst [vmem:[%s2845_s2 + $0xa0] sm:$0xff] %v1764_v28   ;;  %v1219_v42 = vadd.f32 %v1218_v30, %v2474_v51  ;;  %v1388_v43 = vadd.f32 %v1387_v27, %v1307_v32  ;;  %v1312_v51 = vmul.f32 %v2498_v17, %v2498_v17 }
 0x19c   :  { %v1220_v52 = vadd.f32 %v1219_v42, %v2476_v56  ;;  %v1389_v53 = vadd.f32 %v1388_v43, %v1308_v37  ;;  %v1313_v56 = vmul.f32 %v2500_v23, %v2500_v23 }
 0x19e   :  { %v1221_v59 = vadd.f32 %v1220_v52, %v2486_v1  ;;  %v1390_v60 = vadd.f32 %v1389_v53, %v1309_v50  ;;  %v1314_v1 = vmul.f32 %v2510_v33, %v2510_v33 }
 0x1a0   :  { %v1222_v0 = vadd.f32 %v1221_v59, %v2488_v7  ;;  %v1391_v6 = vadd.f32 %v1390_v60, %v1310_v58  ;;  %v1315_v7 = vmul.f32 %v2512_v39, %v2512_v39 }
 0x1a2   :  { %v1223_v9 = vadd.f32 %v1222_v0, %v2498_v17  ;;  %v1392_v12 = vadd.f32 %v1391_v6, %v1311_v63  ;;  %v1316_v17 = vmul.f32 %v2522_v49, %v2522_v49 }
 0x1a4   :  { %v1224_v13 = vadd.f32 %v1223_v9, %v2500_v23  ;;  %v1393_v15 = vadd.f32 %v1392_v12, %v1312_v51  ;;  %v1317_v23 = vmul.f32 %v2524_v57, %v2524_v57 }
 0x1a6   :  { %v1225_v20 = vadd.f32 %v1224_v13, %v2510_v33  ;;  %v1394_v24 = vadd.f32 %v1393_v15, %v1313_v56  ;;  %v1318_v33 = vmul.f32 %v2534_v4, %v2534_v4 }
 0x1a8   :  { %v1226_v25 = vadd.f32 %v1225_v20, %v2512_v39  ;;  %v1395_v27 = vadd.f32 %v1394_v24, %v1314_v1  ;;  %v1319_v39 = vmul.f32 %v2536_v11, %v2536_v11  ;;  %v1328_v24 = vmul.f32 %v2594_v38, %v2594_v38 }
 0x1aa   :  { %v1227_v28 = vadd.f32 %v1226_v25, %v2522_v49  ;;  %v1396_v30 = vadd.f32 %v1395_v27, %v1315_v7  ;;  %v1320_v49 = vmul.f32 %v2546_v22, %v2546_v22  ;;  %v1329_v27 = vmul.f32 %v2596_v46, %v2596_v46 }
 0x1ac   :  { %v1228_v32 = vadd.f32 %v1227_v28, %v2524_v57  ;;  %v1397_v35 = vadd.f32 %v1396_v30, %v1316_v17  ;;  %v1321_v57 = vmul.f32 %v2548_v29, %v2548_v29  ;;  %v1330_v28 = vmul.f32 %v2606_v62, %v2606_v62 }
 0x1ae   :  { %v1398_v37 = vadd.f32 %v1397_v35, %v1317_v23  ;;  %v1229_v42 = vadd.f32 %v1228_v32, %v2534_v4  ;;  %v1322_v4 = vmul.f32 %v2558_v41, %v2558_v41  ;;  %v1331_v23 = vmul.f32 %v2608_v8, %v2608_v8 }
 0x1af   :  { %v1332_v35 = vmul.f32 %v2618_v21, %v2618_v21 }
 0x1b0   :  { %v1230_v43 = vadd.f32 %v1229_v42, %v2536_v11  ;;  %v1399_v50 = vadd.f32 %v1398_v37, %v1318_v33  ;;  %v1323_v11 = vmul.f32 %v2560_v47, %v2560_v47  ;;  %v1333_v37 = vmul.f32 %v2620_v31, %v2620_v31 }
 0x1b2   :  { %v1231_v52 = vadd.f32 %v1230_v43, %v2546_v22  ;;  %v1400_v53 = vadd.f32 %v1399_v50, %v1319_v39  ;;  %v1324_v22 = vmul.f32 %v2570_v61, %v2570_v61  ;;  %v1334_v39 = vmul.f32 %v2630_v45, %v2630_v45 }
 0x1b3   :  { %v1335_v50 = vmul.f32 %v2632_v55, %v2632_v55 }
 0x1b4   :  { %v1232_v58 = vadd.f32 %v1231_v52, %v2548_v29  ;;  %v1401_v59 = vadd.f32 %v1400_v53, %v1320_v49  ;;  %v1325_v29 = vmul.f32 %v2572_v5, %v2572_v5  ;;  %v1336_v52 = vmul.f32 %v2642_v10, %v2642_v10 }
 0x1b6   :  { %v1233_v60 = vadd.f32 %v1232_v58, %v2558_v41  ;;  %v1402_v63 = vadd.f32 %v1401_v59, %v1321_v57  ;;  %v1326_v41 = vmul.f32 %v2582_v18, %v2582_v18  ;;  %v1337_v57 = vmul.f32 %v2644_v19, %v2644_v19 }
 0x1b7   :  { %v1338_v59 = vmul.f32 %v2654_v36, %v2654_v36 }
 0x1b8   :  { %v1234_v0 = vadd.f32 %v1233_v60, %v2560_v47  ;;  %v1403_v6 = vadd.f32 %v1402_v63, %v1322_v4  ;;  %v1327_v47 = vmul.f32 %v2584_v26, %v2584_v26  ;;  %v1339_v60 = vmul.f32 %v2656_v48, %v2656_v48 }
 0x1ba   :  { %v1235_v51 = vadd.f32 %v1234_v0, %v2570_v61  ;;  %v1404_v9 = vadd.f32 %v1403_v6, %v1323_v11  ;;  %v1340_v11 = vmul.f32 %v2666_v2, %v2666_v2  ;;  %v1341_v6 = vmul.f32 %v2668_v14, %v2668_v14 }
 0x1bc   :  { %v1236_v12 = vadd.f32 %v1235_v51, %v2572_v5  ;;  %v1405_v56 = vadd.f32 %v1404_v9, %v1324_v22  ;;  %v1342_v51 = vmul.f32 %v2678_v34, %v2678_v34 }
 0x1be   :  { %v1237_v13 = vadd.f32 %v1236_v12, %v2582_v18  ;;  %v1406_v15 = vadd.f32 %v1405_v56, %v1325_v29  ;;  %v1343_v29 = vmul.f32 %v2680_v44, %v2680_v44  ;;  %v1344_v56 = vmul.f32 %v2690_v3, %v2690_v3 }
 0x1c0   :  { %v1238_v1 = vadd.f32 %v1237_v13, %v2584_v26  ;;  %v1407_v20 = vadd.f32 %v1406_v15, %v1326_v41  ;;  %v1345_v13 = vmul.f32 %v2692_v16, %v2692_v16 }
 0x1c2   :  { %v1239_v61 = vadd.f32 %v1238_v1, %v2594_v38  ;;  %v1408_v7 = vadd.f32 %v1407_v20, %v1327_v47  ;;  %v1347_v20 = vmul.f32 %v2704_v54, %v2704_v54 }
 0x1c4   :  { %v1409_v5 = vadd.f32 %v1408_v7, %v1328_v24  ;;  %v1240_v25 = vadd.f32 %v1239_v61, %v2596_v46 }
 0x1c6   :  { %v1410_v18 = vadd.f32 %v1409_v5, %v1329_v27  ;;  %v1241_v17 = vadd.f32 %v1240_v25, %v2606_v62 }
 0x1c8   :  { %v1411_v26 = vadd.f32 %v1410_v18, %v1330_v28  ;;  %v1242_v30 = vadd.f32 %v1241_v17, %v2608_v8 }
 0x1ca   :  { %v1412_v38 = vadd.f32 %v1411_v26, %v1331_v23  ;;  %v1243_v32 = vadd.f32 %v1242_v30, %v2618_v21 }
 0x1cc   :  { %v1413_v33 = vadd.f32 %v1412_v38, %v1332_v35  ;;  %v1244_v46 = vadd.f32 %v1243_v32, %v2620_v31 }
 0x1ce   :  { %v1414_v42 = vadd.f32 %v1413_v33, %v1333_v37  ;;  %v1245_v62 = vadd.f32 %v1244_v46, %v2630_v45 }
 0x1d0   :  { %v1415_v43 = vadd.f32 %v1414_v42, %v1334_v39  ;;  %v1246_v8 = vadd.f32 %v1245_v62, %v2632_v55 }
 0x1d2   :  { %v1416_v49 = vadd.f32 %v1415_v43, %v1335_v50  ;;  %v1247_v21 = vadd.f32 %v1246_v8, %v2642_v10 }
 0x1d4   :  { %v1417_v53 = vadd.f32 %v1416_v49, %v1336_v52  ;;  %v1248_v31 = vadd.f32 %v1247_v21, %v2644_v19 }
 0x1d6   :  { %v1418_v58 = vadd.f32 %v1417_v53, %v1337_v57  ;;  %v1249_v45 = vadd.f32 %v1248_v31, %v2654_v36 }
 0x1d8   :  { %v1419_v4 = vadd.f32 %v1418_v58, %v1338_v59  ;;  %v1250_v55 = vadd.f32 %v1249_v45, %v2656_v48 }
 0x1da   :  { %v1420_v63 = vadd.f32 %v1419_v4, %v1339_v60  ;;  %v1251_v10 = vadd.f32 %v1250_v55, %v2666_v2 }
 0x1dc   :  { %v1421_v0 = vadd.f32 %v1420_v63, %v1340_v11  ;;  %v1252_v19 = vadd.f32 %v1251_v10, %v2668_v14 }
 0x1de   :  { %v1422_v22 = vadd.f32 %v1421_v0, %v1341_v6  ;;  %v1253_v36 = vadd.f32 %v1252_v19, %v2678_v34  ;;  %v1346_v34 = vmul.f32 %v2702_v40, %v2702_v40 }
 0x1e0   :  { %v1423_v9 = vadd.f32 %v1422_v22, %v1342_v51  ;;  %v1254_v48 = vadd.f32 %v1253_v36, %v2680_v44 }
 0x1e2   :  { %v1424_v12 = vadd.f32 %v1423_v9, %v1343_v29  ;;  %v1255_v2 = vadd.f32 %v1254_v48, %v2690_v3 }
 0x1e4   :  { %v1425_v41 = vadd.f32 %v1424_v12, %v1344_v56  ;;  %v1256_v14 = vadd.f32 %v1255_v2, %v2692_v16 }
 0x1e6   :  { %v1426_v15 = vadd.f32 %v1425_v41, %v1345_v13  ;;  %v1257_v47 = vadd.f32 %v1256_v14, %v2702_v40 }
 0x1e8   :  { %v1427_v1 = vadd.f32 %v1426_v15, %v1346_v34  ;;  %v1258_v44 = vadd.f32 %v1257_v47, %v2704_v54 }
 0x1ea   :  { %v1259_v61 = vrot.slane %v1258_v44, 4  ;;  %v1428_v3 = vadd.f32 %v1427_v1, %v1347_v20 }
 0x1ec   :  { %v1260_v24 = vadd.f32 %v1259_v61, %v1258_v44  ;;  %v1429_v7 = vrot.slane %v1428_v3, 4 }
 0x1ee   :  { %v1261_v5 = vrot.slane %v1260_v24, 2  ;;  %v1430_v25 = vadd.f32 %v1429_v7, %v1428_v3 }
 0x1f0   :  { %v1262_v27 = vadd.f32 %v1261_v5, %v1260_v24  ;;  %v1431_v16 = vrot.slane %v1430_v25, 2 }
 0x1f2   :  { %v1263_v18 = vrot.slane %v1262_v27, 1  ;;  %v1432_v17 = vadd.f32 %v1431_v16, %v1430_v25 }
 0x1f4   :  { %v1264_v28 = vadd.f32 %v1263_v18, %v1262_v27  ;;  %v1433_v26 = vrot.slane %v1432_v17, 1 }
 0x1f6   :  { %1265 = vst [vmem:[%s2846_s3] sm:$0xff] %v1264_v28  ;;  %v1434_v40 = vadd.f32 %v1433_v26, %v1432_v17 }
 0x1f8   :  { %1435 = vst [vmem:[%s2847_s4] sm:$0xff] %v1434_v40 }

// kernel: up_scale_forward.7
= control target key start
LH: loop header
LB: loop body
LE: loop exit
PB: predicated region body
PF: predicated region fallthrough
CT: control target
= control target key end

     0   :  { %s1023_s0 = inlined_call_operand.vmem [shape: bf16[512,128], index: 0, kind: input, shape index: {}]   ;;  %s1024_s1 = inlined_call_operand.vmem [shape: f32[1,128], index: 1, kind: input, shape index: {}]   ;;  %s1025_s2 = inlined_call_operand.vmem [shape: f32[1,128], index: 2, kind: input, shape index: {}]   ;;  %s1026_s3 = inlined_call_operand.vmem [shape: f32[512,128], index: 3, kind: output, shape index: {}]  }
   0x1   :  { %v419_v0 = vld [vmem:[%s1023_s0] sm:$0xff]   ;;  %v546_v4 = vld [vmem:[%s1023_s0 + $0x8] sm:$0xff]   ;;  %v547_v5 = vld [vmem:[%s1023_s0 + $0x10] sm:$0xff]  }
   0x2   :  { %v603_v1 = vld [vmem:[%s1024_s1] ss:$0 sm:$0xff]  ;;  %v420_v2 = vunpack.c.l.bf16 %v419_v0  ;;  %v421_v3 = vunpack.c.h.bf16 %v419_v0  ;;  %v548_v6 = vld [vmem:[%s1023_s0 + $0x18] sm:$0xff]   ;;  %v424_v8 = vunpack.c.l.bf16 %v546_v4  ;;  %v425_v9 = vunpack.c.h.bf16 %v546_v4  ;;  %v550_v33 = vld [vmem:[%s1023_s0 + $0x28] sm:$0xff]  }
   0x3   :  { %v617_v7 = vld [vmem:[%s1025_s2] ss:$0 sm:$0xff]  ;;  %v428_v10 = vunpack.c.l.bf16 %v547_v5  ;;  %v429_v11 = vunpack.c.h.bf16 %v547_v5  ;;  %v432_v14 = vunpack.c.l.bf16 %v548_v6  ;;  %v433_v15 = vunpack.c.h.bf16 %v548_v6  ;;  %v551_v34 = vld [vmem:[%s1023_s0 + $0x30] sm:$0xff]   ;;  %v552_v39 = vld [vmem:[%s1023_s0 + $0x38] sm:$0xff]  }
   0x4   :  { %v149_v12 = vmul.f32 %v420_v2, %v603_v1  ;;  %v150_v13 = vmul.f32 %v421_v3, %v603_v1  ;;  %v151_v16 = vmul.f32 %v424_v8, %v603_v1  ;;  %v152_v17 = vmul.f32 %v425_v9, %v603_v1  ;;  %v549_v28 = vld [vmem:[%s1023_s0 + $0x20] sm:$0xff]   ;;  %v554_v6 = vld [vmem:[%s1023_s0 + $0x48] sm:$0xff]   ;;  %v555_v8 = vld [vmem:[%s1023_s0 + $0x50] sm:$0xff]  }
   0x5   :  { %v153_v18 = vmul.f32 %v428_v10, %v603_v1  ;;  %v154_v19 = vmul.f32 %v429_v11, %v603_v1  ;;  %v155_v22 = vmul.f32 %v432_v14, %v603_v1  ;;  %v156_v23 = vmul.f32 %v433_v15, %v603_v1  ;;  %v553_v0 = vld [vmem:[%s1023_s0 + $0x40] sm:$0xff]  }
   0x6   :  { %v220_v20 = vadd.f32 %v617_v7, %v149_v12  ;;  %v221_v21 = vadd.f32 %v617_v7, %v150_v13  ;;  %v222_v24 = vadd.f32 %v617_v7, %v151_v16  ;;  %v223_v25 = vadd.f32 %v617_v7, %v152_v17  ;;  %v556_v13 = vld [vmem:[%s1023_s0 + $0x58] sm:$0xff]  }
   0x7   :  { %v224_v26 = vadd.f32 %v617_v7, %v153_v18  ;;  %v225_v27 = vadd.f32 %v617_v7, %v154_v19  ;;  %v226_v31 = vadd.f32 %v617_v7, %v155_v22  ;;  %v227_v32 = vadd.f32 %v617_v7, %v156_v23 }
   0x8   :  { %v284_v29 = vmax.f32 %v220_v20, 0.0  ;;  %v285_v30 = vmax.f32 %v221_v21, 0.0  ;;  %v286_v35 = vmax.f32 %v222_v24, 0.0  ;;  %v287_v36 = vmax.f32 %v223_v25, 0.0 }
   0x9   :  { %v288_v37 = vmax.f32 %v224_v26, 0.0  ;;  %v289_v38 = vmax.f32 %v225_v27, 0.0  ;;  %v290_v40 = vmax.f32 %v226_v31, 0.0  ;;  %v291_v41 = vmax.f32 %v227_v32, 0.0 }
   0xa   :  { %348 = vst [vmem:[%s1026_s3] sm:$0xff] %v284_v29  ;;  %349 = vst [vmem:[%s1026_s3 + $0x8] sm:$0xff] %v285_v30  ;;  %v436_v42 = vunpack.c.l.bf16 %v549_v28  ;;  %v437_v43 = vunpack.c.h.bf16 %v549_v28  ;;  %v440_v44 = vunpack.c.l.bf16 %v550_v33  ;;  %v441_v45 = vunpack.c.h.bf16 %v550_v33 }
   0xb   :  { %350 = vst [vmem:[%s1026_s3 + $0x10] sm:$0xff] %v286_v35  ;;  %351 = vst [vmem:[%s1026_s3 + $0x18] sm:$0xff] %v287_v36  ;;  %v444_v46 = vunpack.c.l.bf16 %v551_v34  ;;  %v445_v47 = vunpack.c.h.bf16 %v551_v34  ;;  %v448_v50 = vunpack.c.l.bf16 %v552_v39  ;;  %v449_v51 = vunpack.c.h.bf16 %v552_v39 }
   0xc   :  { %352 = vst [vmem:[%s1026_s3 + $0x20] sm:$0xff] %v288_v37  ;;  %353 = vst [vmem:[%s1026_s3 + $0x28] sm:$0xff] %v289_v38  ;;  %v157_v48 = vmul.f32 %v436_v42, %v603_v1  ;;  %v158_v49 = vmul.f32 %v437_v43, %v603_v1  ;;  %v159_v52 = vmul.f32 %v440_v44, %v603_v1  ;;  %v452_v16 = vunpack.c.l.bf16 %v553_v0  ;;  %v557_v38 = vld [vmem:[%s1023_s0 + $0x60] sm:$0xff]   ;;  %v558_v43 = vld [vmem:[%s1023_s0 + $0x68] sm:$0xff]  }
   0xd   :  { %354 = vst [vmem:[%s1026_s3 + $0x30] sm:$0xff] %v290_v40  ;;  %355 = vst [vmem:[%s1026_s3 + $0x38] sm:$0xff] %v291_v41  ;;  %v160_v53 = vmul.f32 %v441_v45, %v603_v1  ;;  %v161_v54 = vmul.f32 %v444_v46, %v603_v1  ;;  %v162_v55 = vmul.f32 %v445_v47, %v603_v1  ;;  %v453_v17 = vunpack.c.h.bf16 %v553_v0  ;;  %v559_v44 = vld [vmem:[%s1023_s0 + $0x70] sm:$0xff]  }
   0xe   :  { %v228_v56 = vadd.f32 %v617_v7, %v157_v48  ;;  %v229_v57 = vadd.f32 %v617_v7, %v158_v49  ;;  %v163_v58 = vmul.f32 %v448_v50, %v603_v1  ;;  %v164_v59 = vmul.f32 %v449_v51, %v603_v1  ;;  %v560_v49 = vld [vmem:[%s1023_s0 + $0x78] sm:$0xff]  }
   0xf   :  { %v230_v60 = vadd.f32 %v617_v7, %v159_v52  ;;  %v231_v61 = vadd.f32 %v617_v7, %v160_v53  ;;  %v232_v62 = vadd.f32 %v617_v7, %v161_v54  ;;  %v233_v63 = vadd.f32 %v617_v7, %v162_v55 }
  0x10   :  { %v292_v2 = vmax.f32 %v228_v56, 0.0  ;;  %v293_v3 = vmax.f32 %v229_v57, 0.0  ;;  %v234_v4 = vadd.f32 %v617_v7, %v163_v58  ;;  %v235_v5 = vadd.f32 %v617_v7, %v164_v59 }
  0x11   :  { %v294_v9 = vmax.f32 %v230_v60, 0.0  ;;  %v295_v10 = vmax.f32 %v231_v61, 0.0  ;;  %v296_v11 = vmax.f32 %v232_v62, 0.0  ;;  %v297_v12 = vmax.f32 %v233_v63, 0.0 }
  0x12   :  { %356 = vst [vmem:[%s1026_s3 + $0x40] sm:$0xff] %v292_v2  ;;  %357 = vst [vmem:[%s1026_s3 + $0x48] sm:$0xff] %v293_v3  ;;  %v298_v14 = vmax.f32 %v234_v4, 0.0  ;;  %v299_v15 = vmax.f32 %v235_v5, 0.0  ;;  %v456_v18 = vunpack.c.l.bf16 %v554_v6  ;;  %v457_v19 = vunpack.c.h.bf16 %v554_v6 }
  0x13   :  { %358 = vst [vmem:[%s1026_s3 + $0x50] sm:$0xff] %v294_v9  ;;  %359 = vst [vmem:[%s1026_s3 + $0x58] sm:$0xff] %v295_v10  ;;  %v460_v20 = vunpack.c.l.bf16 %v555_v8  ;;  %v461_v21 = vunpack.c.h.bf16 %v555_v8  ;;  %v165_v22 = vmul.f32 %v452_v16, %v603_v1  ;;  %v166_v23 = vmul.f32 %v453_v17, %v603_v1  ;;  %v562_v17 = vld [vmem:[%s1023_s0 + $0x88] sm:$0xff]  }
  0x14   :  { %360 = vst [vmem:[%s1026_s3 + $0x60] sm:$0xff] %v296_v11  ;;  %361 = vst [vmem:[%s1026_s3 + $0x68] sm:$0xff] %v297_v12  ;;  %v464_v24 = vunpack.c.l.bf16 %v556_v13  ;;  %v465_v25 = vunpack.c.h.bf16 %v556_v13  ;;  %v167_v26 = vmul.f32 %v456_v18, %v603_v1  ;;  %v168_v27 = vmul.f32 %v457_v19, %v603_v1  ;;  %v561_v12 = vld [vmem:[%s1023_s0 + $0x80] sm:$0xff]   ;;  %v563_v18 = vld [vmem:[%s1023_s0 + $0x90] sm:$0xff]  }
  0x15   :  { %362 = vst [vmem:[%s1026_s3 + $0x70] sm:$0xff] %v298_v14  ;;  %363 = vst [vmem:[%s1026_s3 + $0x78] sm:$0xff] %v299_v15  ;;  %v169_v28 = vmul.f32 %v460_v20, %v603_v1  ;;  %v170_v29 = vmul.f32 %v461_v21, %v603_v1  ;;  %v236_v30 = vadd.f32 %v617_v7, %v165_v22  ;;  %v468_v52 = vunpack.c.l.bf16 %v557_v38 }
  0x16   :  { %v237_v31 = vadd.f32 %v617_v7, %v166_v23  ;;  %v171_v32 = vmul.f32 %v464_v24, %v603_v1  ;;  %v172_v33 = vmul.f32 %v465_v25, %v603_v1  ;;  %v238_v34 = vadd.f32 %v617_v7, %v167_v26  ;;  %v564_v23 = vld [vmem:[%s1023_s0 + $0x98] sm:$0xff]  }
  0x17   :  { %v239_v35 = vadd.f32 %v617_v7, %v168_v27  ;;  %v240_v36 = vadd.f32 %v617_v7, %v169_v28  ;;  %v241_v37 = vadd.f32 %v617_v7, %v170_v29  ;;  %v300_v39 = vmax.f32 %v236_v30, 0.0 }
  0x18   :  { %v301_v40 = vmax.f32 %v237_v31, 0.0  ;;  %v242_v41 = vadd.f32 %v617_v7, %v171_v32  ;;  %v243_v42 = vadd.f32 %v617_v7, %v172_v33  ;;  %v302_v45 = vmax.f32 %v238_v34, 0.0 }
  0x19   :  { %v303_v46 = vmax.f32 %v239_v35, 0.0  ;;  %v304_v47 = vmax.f32 %v240_v36, 0.0  ;;  %v305_v48 = vmax.f32 %v241_v37, 0.0  ;;  %364 = vst [vmem:[%s1026_s3 + $0x80] sm:$0xff] %v300_v39  ;;  %v469_v53 = vunpack.c.h.bf16 %v557_v38 }
  0x1a   :  { %365 = vst [vmem:[%s1026_s3 + $0x88] sm:$0xff] %v301_v40  ;;  %v306_v50 = vmax.f32 %v242_v41, 0.0  ;;  %v307_v51 = vmax.f32 %v243_v42, 0.0  ;;  %366 = vst [vmem:[%s1026_s3 + $0x90] sm:$0xff] %v302_v45  ;;  %v472_v54 = vunpack.c.l.bf16 %v558_v43  ;;  %v473_v55 = vunpack.c.h.bf16 %v558_v43 }
  0x1b   :  { %367 = vst [vmem:[%s1026_s3 + $0x98] sm:$0xff] %v303_v46  ;;  %368 = vst [vmem:[%s1026_s3 + $0xa0] sm:$0xff] %v304_v47  ;;  %v476_v56 = vunpack.c.l.bf16 %v559_v44  ;;  %v477_v57 = vunpack.c.h.bf16 %v559_v44  ;;  %v173_v58 = vmul.f32 %v468_v52, %v603_v1  ;;  %v174_v59 = vmul.f32 %v469_v53, %v603_v1  ;;  %v566_v53 = vld [vmem:[%s1023_s0 + $0xa8] sm:$0xff]  }
  0x1c   :  { %369 = vst [vmem:[%s1026_s3 + $0xa8] sm:$0xff] %v305_v48  ;;  %370 = vst [vmem:[%s1026_s3 + $0xb0] sm:$0xff] %v306_v50  ;;  %v480_v60 = vunpack.c.l.bf16 %v560_v49  ;;  %v481_v61 = vunpack.c.h.bf16 %v560_v49  ;;  %v175_v62 = vmul.f32 %v472_v54, %v603_v1  ;;  %v176_v63 = vmul.f32 %v473_v55, %v603_v1  ;;  %v565_v48 = vld [vmem:[%s1023_s0 + $0xa0] sm:$0xff]   ;;  %v567_v54 = vld [vmem:[%s1023_s0 + $0xb0] sm:$0xff]  }
  0x1d   :  { %371 = vst [vmem:[%s1026_s3 + $0xb8] sm:$0xff] %v307_v51  ;;  %v177_v0 = vmul.f32 %v476_v56, %v603_v1  ;;  %v178_v2 = vmul.f32 %v477_v57, %v603_v1  ;;  %v244_v3 = vadd.f32 %v617_v7, %v173_v58  ;;  %v245_v4 = vadd.f32 %v617_v7, %v174_v59  ;;  %v568_v59 = vld [vmem:[%s1023_s0 + $0xb8] sm:$0xff]  }
  0x1e   :  { %v179_v5 = vmul.f32 %v480_v60, %v603_v1  ;;  %v180_v6 = vmul.f32 %v481_v61, %v603_v1  ;;  %v246_v8 = vadd.f32 %v617_v7, %v175_v62  ;;  %v247_v9 = vadd.f32 %v617_v7, %v176_v63 }
  0x1f   :  { %v248_v10 = vadd.f32 %v617_v7, %v177_v0  ;;  %v249_v11 = vadd.f32 %v617_v7, %v178_v2  ;;  %v308_v13 = vmax.f32 %v244_v3, 0.0  ;;  %v309_v14 = vmax.f32 %v245_v4, 0.0 }
  0x20   :  { %v250_v15 = vadd.f32 %v617_v7, %v179_v5  ;;  %v251_v16 = vadd.f32 %v617_v7, %v180_v6  ;;  %v310_v19 = vmax.f32 %v246_v8, 0.0  ;;  %v311_v20 = vmax.f32 %v247_v9, 0.0 }
  0x21   :  { %v312_v21 = vmax.f32 %v248_v10, 0.0  ;;  %v313_v22 = vmax.f32 %v249_v11, 0.0  ;;  %372 = vst [vmem:[%s1026_s3 + $0xc0] sm:$0xff] %v308_v13  ;;  %373 = vst [vmem:[%s1026_s3 + $0xc8] sm:$0xff] %v309_v14  ;;  %v484_v26 = vunpack.c.l.bf16 %v561_v12  ;;  %v485_v27 = vunpack.c.h.bf16 %v561_v12 }
  0x22   :  { %v314_v24 = vmax.f32 %v250_v15, 0.0  ;;  %v315_v25 = vmax.f32 %v251_v16, 0.0  ;;  %374 = vst [vmem:[%s1026_s3 + $0xd0] sm:$0xff] %v310_v19  ;;  %375 = vst [vmem:[%s1026_s3 + $0xd8] sm:$0xff] %v311_v20  ;;  %v488_v28 = vunpack.c.l.bf16 %v562_v17  ;;  %v489_v29 = vunpack.c.h.bf16 %v562_v17 }
  0x23   :  { %376 = vst [vmem:[%s1026_s3 + $0xe0] sm:$0xff] %v312_v21  ;;  %377 = vst [vmem:[%s1026_s3 + $0xe8] sm:$0xff] %v313_v22  ;;  %v492_v30 = vunpack.c.l.bf16 %v563_v18  ;;  %v493_v31 = vunpack.c.h.bf16 %v563_v18  ;;  %v181_v32 = vmul.f32 %v484_v26, %v603_v1  ;;  %v182_v33 = vmul.f32 %v485_v27, %v603_v1  ;;  %v569_v22 = vld [vmem:[%s1023_s0 + $0xc0] sm:$0xff]   ;;  %v570_v27 = vld [vmem:[%s1023_s0 + $0xc8] sm:$0xff]  }
  0x24   :  { %378 = vst [vmem:[%s1026_s3 + $0xf0] sm:$0xff] %v314_v24  ;;  %379 = vst [vmem:[%s1026_s3 + $0xf8] sm:$0xff] %v315_v25  ;;  %v496_v34 = vunpack.c.l.bf16 %v564_v23  ;;  %v497_v35 = vunpack.c.h.bf16 %v564_v23  ;;  %v183_v36 = vmul.f32 %v488_v28, %v603_v1  ;;  %v184_v37 = vmul.f32 %v489_v29, %v603_v1  ;;  %v571_v28 = vld [vmem:[%s1023_s0 + $0xd0] sm:$0xff]  }
  0x25   :  { %v185_v38 = vmul.f32 %v492_v30, %v603_v1  ;;  %v186_v39 = vmul.f32 %v493_v31, %v603_v1  ;;  %v252_v40 = vadd.f32 %v617_v7, %v181_v32  ;;  %v253_v41 = vadd.f32 %v617_v7, %v182_v33  ;;  %v572_v33 = vld [vmem:[%s1023_s0 + $0xd8] sm:$0xff]  }
  0x26   :  { %v187_v42 = vmul.f32 %v496_v34, %v603_v1  ;;  %v188_v43 = vmul.f32 %v497_v35, %v603_v1  ;;  %v254_v44 = vadd.f32 %v617_v7, %v183_v36  ;;  %v255_v45 = vadd.f32 %v617_v7, %v184_v37 }
  0x27   :  { %v256_v46 = vadd.f32 %v617_v7, %v185_v38  ;;  %v257_v47 = vadd.f32 %v617_v7, %v186_v39  ;;  %v316_v49 = vmax.f32 %v252_v40, 0.0  ;;  %v317_v50 = vmax.f32 %v253_v41, 0.0 }
  0x28   :  { %v258_v51 = vadd.f32 %v617_v7, %v187_v42  ;;  %v259_v52 = vadd.f32 %v617_v7, %v188_v43  ;;  %v318_v55 = vmax.f32 %v254_v44, 0.0  ;;  %v319_v56 = vmax.f32 %v255_v45, 0.0 }
  0x29   :  { %v320_v57 = vmax.f32 %v256_v46, 0.0  ;;  %v321_v58 = vmax.f32 %v257_v47, 0.0  ;;  %380 = vst [vmem:[%s1026_s3 + $0x100] sm:$0xff] %v316_v49  ;;  %381 = vst [vmem:[%s1026_s3 + $0x108] sm:$0xff] %v317_v50  ;;  %v500_v62 = vunpack.c.l.bf16 %v565_v48  ;;  %v501_v63 = vunpack.c.h.bf16 %v565_v48 }
  0x2a   :  { %v322_v60 = vmax.f32 %v258_v51, 0.0  ;;  %v323_v61 = vmax.f32 %v259_v52, 0.0  ;;  %382 = vst [vmem:[%s1026_s3 + $0x110] sm:$0xff] %v318_v55  ;;  %383 = vst [vmem:[%s1026_s3 + $0x118] sm:$0xff] %v319_v56  ;;  %v504_v0 = vunpack.c.l.bf16 %v566_v53  ;;  %v505_v2 = vunpack.c.h.bf16 %v566_v53 }
  0x2b   :  { %384 = vst [vmem:[%s1026_s3 + $0x120] sm:$0xff] %v320_v57  ;;  %385 = vst [vmem:[%s1026_s3 + $0x128] sm:$0xff] %v321_v58  ;;  %v508_v3 = vunpack.c.l.bf16 %v567_v54  ;;  %v509_v4 = vunpack.c.h.bf16 %v567_v54  ;;  %v189_v5 = vmul.f32 %v500_v62, %v603_v1  ;;  %v190_v6 = vmul.f32 %v501_v63, %v603_v1  ;;  %v573_v58 = vld [vmem:[%s1023_s0 + $0xe0] sm:$0xff]   ;;  %v574_v63 = vld [vmem:[%s1023_s0 + $0xe8] sm:$0xff]  }
  0x2c   :  { %386 = vst [vmem:[%s1026_s3 + $0x130] sm:$0xff] %v322_v60  ;;  %387 = vst [vmem:[%s1026_s3 + $0x138] sm:$0xff] %v323_v61  ;;  %v512_v8 = vunpack.c.l.bf16 %v568_v59  ;;  %v513_v9 = vunpack.c.h.bf16 %v568_v59  ;;  %v191_v10 = vmul.f32 %v504_v0, %v603_v1  ;;  %v192_v11 = vmul.f32 %v505_v2, %v603_v1  ;;  %v575_v0 = vld [vmem:[%s1023_s0 + $0xf0] sm:$0xff]  }
  0x2d   :  { %v193_v12 = vmul.f32 %v508_v3, %v603_v1  ;;  %v194_v13 = vmul.f32 %v509_v4, %v603_v1  ;;  %v260_v14 = vadd.f32 %v617_v7, %v189_v5  ;;  %v261_v15 = vadd.f32 %v617_v7, %v190_v6  ;;  %v576_v6 = vld [vmem:[%s1023_s0 + $0xf8] sm:$0xff]  }
  0x2e   :  { %v195_v16 = vmul.f32 %v512_v8, %v603_v1  ;;  %v196_v17 = vmul.f32 %v513_v9, %v603_v1  ;;  %v262_v18 = vadd.f32 %v617_v7, %v191_v10  ;;  %v263_v19 = vadd.f32 %v617_v7, %v192_v11 }
  0x2f   :  { %v264_v20 = vadd.f32 %v617_v7, %v193_v12  ;;  %v265_v21 = vadd.f32 %v617_v7, %v194_v13  ;;  %v324_v23 = vmax.f32 %v260_v14, 0.0  ;;  %v325_v24 = vmax.f32 %v261_v15, 0.0 }
  0x30   :  { %v266_v25 = vadd.f32 %v617_v7, %v195_v16  ;;  %v267_v26 = vadd.f32 %v617_v7, %v196_v17  ;;  %v326_v29 = vmax.f32 %v262_v18, 0.0  ;;  %v327_v30 = vmax.f32 %v263_v19, 0.0 }
  0x31   :  { %v328_v31 = vmax.f32 %v264_v20, 0.0  ;;  %v329_v32 = vmax.f32 %v265_v21, 0.0  ;;  %388 = vst [vmem:[%s1026_s3 + $0x140] sm:$0xff] %v324_v23  ;;  %389 = vst [vmem:[%s1026_s3 + $0x148] sm:$0xff] %v325_v24  ;;  %v516_v36 = vunpack.c.l.bf16 %v569_v22  ;;  %v517_v37 = vunpack.c.h.bf16 %v569_v22 }
  0x32   :  { %v330_v34 = vmax.f32 %v266_v25, 0.0  ;;  %v331_v35 = vmax.f32 %v267_v26, 0.0  ;;  %390 = vst [vmem:[%s1026_s3 + $0x150] sm:$0xff] %v326_v29  ;;  %391 = vst [vmem:[%s1026_s3 + $0x158] sm:$0xff] %v327_v30  ;;  %v520_v38 = vunpack.c.l.bf16 %v570_v27  ;;  %v521_v39 = vunpack.c.h.bf16 %v570_v27 }
  0x33   :  { %392 = vst [vmem:[%s1026_s3 + $0x160] sm:$0xff] %v328_v31  ;;  %393 = vst [vmem:[%s1026_s3 + $0x168] sm:$0xff] %v329_v32  ;;  %v524_v40 = vunpack.c.l.bf16 %v571_v28  ;;  %v525_v41 = vunpack.c.h.bf16 %v571_v28  ;;  %v197_v42 = vmul.f32 %v516_v36, %v603_v1  ;;  %v198_v43 = vmul.f32 %v517_v37, %v603_v1 }
  0x34   :  { %394 = vst [vmem:[%s1026_s3 + $0x170] sm:$0xff] %v330_v34  ;;  %395 = vst [vmem:[%s1026_s3 + $0x178] sm:$0xff] %v331_v35  ;;  %v528_v44 = vunpack.c.l.bf16 %v572_v33  ;;  %v529_v45 = vunpack.c.h.bf16 %v572_v33  ;;  %v199_v46 = vmul.f32 %v520_v38, %v603_v1  ;;  %v200_v47 = vmul.f32 %v521_v39, %v603_v1 }
  0x35   :  { %v201_v48 = vmul.f32 %v524_v40, %v603_v1  ;;  %v202_v49 = vmul.f32 %v525_v41, %v603_v1  ;;  %v268_v50 = vadd.f32 %v617_v7, %v197_v42  ;;  %v269_v51 = vadd.f32 %v617_v7, %v198_v43 }
  0x36   :  { %v203_v52 = vmul.f32 %v528_v44, %v603_v1  ;;  %v204_v53 = vmul.f32 %v529_v45, %v603_v1  ;;  %v270_v54 = vadd.f32 %v617_v7, %v199_v46  ;;  %v271_v55 = vadd.f32 %v617_v7, %v200_v47 }
  0x37   :  { %v272_v56 = vadd.f32 %v617_v7, %v201_v48  ;;  %v273_v57 = vadd.f32 %v617_v7, %v202_v49  ;;  %v332_v59 = vmax.f32 %v268_v50, 0.0  ;;  %v333_v60 = vmax.f32 %v269_v51, 0.0 }
  0x38   :  { %v274_v61 = vadd.f32 %v617_v7, %v203_v52  ;;  %v275_v62 = vadd.f32 %v617_v7, %v204_v53  ;;  %v334_v2 = vmax.f32 %v270_v54, 0.0  ;;  %v335_v3 = vmax.f32 %v271_v55, 0.0 }
  0x39   :  { %v336_v4 = vmax.f32 %v272_v56, 0.0  ;;  %v337_v5 = vmax.f32 %v273_v57, 0.0  ;;  %396 = vst [vmem:[%s1026_s3 + $0x180] sm:$0xff] %v332_v59  ;;  %397 = vst [vmem:[%s1026_s3 + $0x188] sm:$0xff] %v333_v60  ;;  %v532_v10 = vunpack.c.l.bf16 %v573_v58  ;;  %v533_v11 = vunpack.c.h.bf16 %v573_v58 }
  0x3a   :  { %v338_v8 = vmax.f32 %v274_v61, 0.0  ;;  %v339_v9 = vmax.f32 %v275_v62, 0.0  ;;  %398 = vst [vmem:[%s1026_s3 + $0x190] sm:$0xff] %v334_v2  ;;  %399 = vst [vmem:[%s1026_s3 + $0x198] sm:$0xff] %v335_v3  ;;  %v536_v12 = vunpack.c.l.bf16 %v574_v63  ;;  %v537_v13 = vunpack.c.h.bf16 %v574_v63 }
  0x3b   :  { %400 = vst [vmem:[%s1026_s3 + $0x1a0] sm:$0xff] %v336_v4  ;;  %401 = vst [vmem:[%s1026_s3 + $0x1a8] sm:$0xff] %v337_v5  ;;  %v540_v14 = vunpack.c.l.bf16 %v575_v0  ;;  %v541_v15 = vunpack.c.h.bf16 %v575_v0  ;;  %v205_v16 = vmul.f32 %v532_v10, %v603_v1  ;;  %v206_v17 = vmul.f32 %v533_v11, %v603_v1 }
  0x3c   :  { %402 = vst [vmem:[%s1026_s3 + $0x1b0] sm:$0xff] %v338_v8  ;;  %403 = vst [vmem:[%s1026_s3 + $0x1b8] sm:$0xff] %v339_v9  ;;  %v544_v18 = vunpack.c.l.bf16 %v576_v6  ;;  %v545_v19 = vunpack.c.h.bf16 %v576_v6  ;;  %v207_v20 = vmul.f32 %v536_v12, %v603_v1  ;;  %v208_v21 = vmul.f32 %v537_v13, %v603_v1 }
  0x3d   :  { %v209_v22 = vmul.f32 %v540_v14, %v603_v1  ;;  %v210_v23 = vmul.f32 %v541_v15, %v603_v1  ;;  %v276_v24 = vadd.f32 %v617_v7, %v205_v16  ;;  %v277_v25 = vadd.f32 %v617_v7, %v206_v17 }
  0x3e   :  { %v211_v26 = vmul.f32 %v544_v18, %v603_v1  ;;  %v212_v27 = vmul.f32 %v545_v19, %v603_v1  ;;  %v278_v28 = vadd.f32 %v617_v7, %v207_v20  ;;  %v279_v29 = vadd.f32 %v617_v7, %v208_v21 }
  0x3f   :  { %v280_v30 = vadd.f32 %v617_v7, %v209_v22  ;;  %v281_v31 = vadd.f32 %v617_v7, %v210_v23  ;;  %v340_v32 = vmax.f32 %v276_v24, 0.0  ;;  %v341_v33 = vmax.f32 %v277_v25, 0.0 }
  0x40   :  { %v282_v34 = vadd.f32 %v617_v7, %v211_v26  ;;  %v283_v35 = vadd.f32 %v617_v7, %v212_v27  ;;  %v342_v36 = vmax.f32 %v278_v28, 0.0  ;;  %v343_v37 = vmax.f32 %v279_v29, 0.0 }
  0x41   :  { %v344_v38 = vmax.f32 %v280_v30, 0.0  ;;  %v345_v39 = vmax.f32 %v281_v31, 0.0  ;;  %404 = vst [vmem:[%s1026_s3 + $0x1c0] sm:$0xff] %v340_v32  ;;  %405 = vst [vmem:[%s1026_s3 + $0x1c8] sm:$0xff] %v341_v33 }
  0x42   :  { %v346_v1 = vmax.f32 %v282_v34, 0.0  ;;  %v347_v40 = vmax.f32 %v283_v35, 0.0  ;;  %406 = vst [vmem:[%s1026_s3 + $0x1d0] sm:$0xff] %v342_v36  ;;  %407 = vst [vmem:[%s1026_s3 + $0x1d8] sm:$0xff] %v343_v37 }
  0x43   :  { %408 = vst [vmem:[%s1026_s3 + $0x1e0] sm:$0xff] %v344_v38  ;;  %409 = vst [vmem:[%s1026_s3 + $0x1e8] sm:$0xff] %v345_v39 }
  0x44   :  { %410 = vst [vmem:[%s1026_s3 + $0x1f0] sm:$0xff] %v346_v1  ;;  %411 = vst [vmem:[%s1026_s3 + $0x1f8] sm:$0xff] %v347_v40 }

// kernel: up_scale_forward.6
= control target key start
LH: loop header
LB: loop body
LE: loop exit
PB: predicated region body
PF: predicated region fallthrough
CT: control target
= control target key end

     0   :  { %s2529_s1 = inlined_call_operand.vmem [shape: bf16[128,128], index: 1, kind: input, shape index: {}]   ;;  %s2530_s0 = inlined_call_operand.vmem [shape: bf16[512,128], index: 0, kind: input, shape index: {}]   ;;  %s2531_s2 = inlined_call_operand.vmem [shape: f32[1,128], index: 2, kind: input, shape index: {}]   ;;  %s2532_s3 = inlined_call_operand.vmem [shape: f32[1,128], index: 3, kind: input, shape index: {}]   ;;  %s2533_s4 = inlined_call_operand.vmem [shape: bf16[512,128], index: 4, kind: output, shape index: {0}]   ;;  %s2534_s5 = inlined_call_operand.vmem [shape: f32[8,128], index: 5, kind: output, shape index: {1}]   ;;  %s2535_s6 = inlined_call_operand.vmem [shape: f32[8,128], index: 6, kind: output, shape index: {2}]  }
   0x1   :  { %v1900_v0 = vld [vmem:[%s2529_s1] sm:$0xff]   ;;  %v1901_v1 = vld [vmem:[%s2529_s1 + $0x8] sm:$0xff]   ;;  %v1902_v2 = vld [vmem:[%s2529_s1 + $0x10] sm:$0xff]  }
   0x2   :  { %1804 = vmatprep.subr.bf16.mxu0 %v1900_v0  ;;  %1884 = vmatprep.subr.bf16.mxu1 %v1900_v0  ;;  %v1903_v3 = vld [vmem:[%s2529_s1 + $0x18] sm:$0xff]   ;;  %v1415_v4 = vld [vmem:[%s2530_s0] sm:$0xff]   ;;  %v1702_v8 = vld [vmem:[%s2530_s0 + $0x8] sm:$0xff]  }
   0x3   :  { %1805 = vmatpush3.bf16.msra.mxu0 %v1900_v0  ;;  %1892 = vmatpush3.bf16.msra.mxu1 %v1900_v0  ;;  %v1961_v5 = vld [vmem:[%s2531_s2] ss:$0 sm:$0xff]  ;;  %v1416_v6 = vunpack.c.l.bf16 %v1415_v4  ;;  %v1417_v7 = vunpack.c.h.bf16 %v1415_v4  ;;  %v1703_v9 = vld [vmem:[%s2530_s0 + $0x10] sm:$0xff]   ;;  %v1420_v14 = vunpack.c.l.bf16 %v1702_v8  ;;  %v1421_v15 = vunpack.c.h.bf16 %v1702_v8  ;;  %v1905_v22 = vld [vmem:[%s2529_s1 + $0x28] sm:$0xff]  }
   0x4   :  { %1806 = vmatprep.subr.bf16.mxu0 %v1901_v1  ;;  %1885 = vmatprep.subr.bf16.mxu1 %v1901_v1  ;;  %v1972_v10 = vld [vmem:[%s2532_s3] ss:$0 sm:$0xff]  ;;  %v1424_v16 = vunpack.c.l.bf16 %v1703_v9  ;;  %v1425_v19 = vunpack.c.h.bf16 %v1703_v9  ;;  %v1704_v26 = vld [vmem:[%s2530_s0 + $0x18] sm:$0xff]   ;;  %v1906_v31 = vld [vmem:[%s2529_s1 + $0x30] sm:$0xff]  }
   0x5   :  { %v156_v11 = vmul.f32 %v1416_v6, %v1961_v5  ;;  %v157_v12 = vmul.f32 %v1417_v7, %v1961_v5  ;;  %v1904_v13 = vld [vmem:[%s2529_s1 + $0x20] sm:$0xff]   ;;  %v158_v23 = vmul.f32 %v1420_v14, %v1961_v5  ;;  %v159_v24 = vmul.f32 %v1421_v15, %v1961_v5  ;;  %v1706_v38 = vld [vmem:[%s2530_s0 + $0x28] sm:$0xff]   ;;  %v1707_v41 = vld [vmem:[%s2530_s0 + $0x30] sm:$0xff]  }
   0x6   :  { %v160_v25 = vmul.f32 %v1424_v16, %v1961_v5  ;;  %v161_v28 = vmul.f32 %v1425_v19, %v1961_v5  ;;  %v1705_v29 = vld [vmem:[%s2530_s0 + $0x20] sm:$0xff]   ;;  %v1428_v30 = vunpack.c.l.bf16 %v1704_v26  ;;  %v1429_v35 = vunpack.c.h.bf16 %v1704_v26  ;;  %v1708_v42 = vld [vmem:[%s2530_s0 + $0x38] sm:$0xff]   ;;  %v1710_v63 = vld [vmem:[%s2530_s0 + $0x48] sm:$0xff]  }
   0x7   :  { %1807 = vmatpush3.bf16.msra.mxu0 %v1901_v1  ;;  %1893 = vmatpush3.bf16.msra.mxu1 %v1901_v1  ;;  %v227_v17 = vadd.f32 %v1972_v10, %v156_v11  ;;  %v228_v18 = vadd.f32 %v1972_v10, %v157_v12  ;;  %v229_v32 = vadd.f32 %v1972_v10, %v158_v23  ;;  %v1432_v37 = vunpack.c.l.bf16 %v1705_v29  ;;  %v1907_v43 = vld [vmem:[%s2529_s1 + $0x38] sm:$0xff]   ;;  %v1709_v48 = vld [vmem:[%s2530_s0 + $0x40] sm:$0xff]   ;;  %v1711_v4 = vld [vmem:[%s2530_s0 + $0x50] sm:$0xff]  }
   0x8   :  { %1808 = vmatprep.subr.bf16.mxu0 %v1902_v2  ;;  %1886 = vmatprep.subr.bf16.mxu1 %v1902_v2  ;;  %v230_v33 = vadd.f32 %v1972_v10, %v159_v24  ;;  %v231_v34 = vadd.f32 %v1972_v10, %v160_v25  ;;  %v232_v36 = vadd.f32 %v1972_v10, %v161_v28  ;;  %v1433_v40 = vunpack.c.h.bf16 %v1705_v29  ;;  %v1712_v23 = vld [vmem:[%s2530_s0 + $0x58] sm:$0xff]  }
   0x9   :  { %v291_v20 = vmax.f32 %v227_v17, 0.0  ;;  %v292_v21 = vmax.f32 %v228_v18, 0.0  ;;  %v162_v39 = vmul.f32 %v1428_v30, %v1961_v5  ;;  %v293_v44 = vmax.f32 %v229_v32, 0.0 }
   0xa   :  { %v294_v45 = vmax.f32 %v230_v33, 0.0  ;;  %v295_v46 = vmax.f32 %v231_v34, 0.0  ;;  %v163_v47 = vmul.f32 %v1429_v35, %v1961_v5  ;;  %v296_v49 = vmax.f32 %v232_v36, 0.0 }
   0xb   :  { %1809 = vmatpush3.bf16.msra.mxu0 %v1902_v2  ;;  %1894 = vmatpush3.bf16.msra.mxu1 %v1902_v2  ;;  %v355_v27 = vpack.c.bf16 %v292_v21, %v291_v20  ;;  %v164_v50 = vmul.f32 %v1432_v37, %v1961_v5  ;;  %v1436_v51 = vunpack.c.l.bf16 %v1706_v38  ;;  %v1437_v52 = vunpack.c.h.bf16 %v1706_v38 }
   0xc   :  { %1810 = vmatprep.subr.bf16.mxu0 %v1903_v3  ;;  %1887 = vmatprep.subr.bf16.mxu1 %v1903_v3  ;;  %v1440_v53 = vunpack.c.l.bf16 %v1707_v41  ;;  %v1441_v54 = vunpack.c.h.bf16 %v1707_v41  ;;  %v1444_v55 = vunpack.c.l.bf16 %v1708_v42  ;;  %v1445_v56 = vunpack.c.h.bf16 %v1708_v42 }
   0xd   :  { %1820 = vmatprep.mubr.bf16.mxu0 %v355_v27  ;;  %v165_v57 = vmul.f32 %v1433_v40, %v1961_v5  ;;  %v1448_v58 = vunpack.c.l.bf16 %v1709_v48  ;;  %v1449_v59 = vunpack.c.h.bf16 %v1709_v48  ;;  %v356_v60 = vpack.c.bf16 %v294_v45, %v293_v44  ;;  %v1717_v44 = vld [vmem:[%s2530_s0 + $0x80] sm:$0xff]  }
   0xe   :  { %v233_v61 = vadd.f32 %v1972_v10, %v162_v39  ;;  %v234_v62 = vadd.f32 %v1972_v10, %v163_v47  ;;  %v357_v0 = vpack.c.bf16 %v296_v49, %v295_v46  ;;  %v235_v1 = vadd.f32 %v1972_v10, %v164_v50 }
   0xf   :  { %1811 = vmatpush3.bf16.msra.mxu0 %v1903_v3  ;;  %1895 = vmatpush3.bf16.msra.mxu1 %v1903_v3  ;;  %v166_v2 = vmul.f32 %v1436_v51, %v1961_v5  ;;  %v167_v3 = vmul.f32 %v1437_v52, %v1961_v5  ;;  %v168_v6 = vmul.f32 %v1440_v53, %v1961_v5  ;;  %v1452_v14 = vunpack.c.l.bf16 %v1710_v63  ;;  %v2065_v52 = vld [vmem:[%s2530_s0 + $0x60] sm:$0xff]  }
  0x10   :  { %1812 = vmatprep.subr.bf16.mxu0 %v1904_v13  ;;  %1888 = vmatprep.subr.bf16.mxu1 %v1904_v13  ;;  %v169_v7 = vmul.f32 %v1441_v54, %v1961_v5  ;;  %v170_v8 = vmul.f32 %v1444_v55, %v1961_v5  ;;  %v171_v9 = vmul.f32 %v1445_v56, %v1961_v5  ;;  %v297_v15 = vmax.f32 %v233_v61, 0.0 }
  0x11   :  { %v236_v11 = vadd.f32 %v1972_v10, %v165_v57  ;;  %v172_v12 = vmul.f32 %v1448_v58, %v1961_v5  ;;  %v298_v16 = vmax.f32 %v234_v62, 0.0  ;;  %v1453_v17 = vunpack.c.h.bf16 %v1710_v63 }
  0x12   :  { %v1456_v18 = vunpack.c.l.bf16 %v1711_v4  ;;  %v299_v19 = vmax.f32 %v235_v1, 0.0  ;;  %v237_v20 = vadd.f32 %v1972_v10, %v166_v2  ;;  %v238_v21 = vadd.f32 %v1972_v10, %v167_v3 }
  0x13   :  { %1813 = vmatpush3.bf16.msra.mxu0 %v1904_v13  ;;  %1896 = vmatpush3.bf16.msra.mxu1 %v1904_v13  ;;  %v173_v13 = vmul.f32 %v1449_v59, %v1961_v5  ;;  %v239_v24 = vadd.f32 %v1972_v10, %v168_v6  ;;  %v240_v25 = vadd.f32 %v1972_v10, %v169_v7  ;;  %v300_v28 = vmax.f32 %v236_v11, 0.0  ;;  %v1718_v59 = vld [vmem:[%s2530_s0 + $0x88] sm:$0xff]   ;;  %v1720_v11 = vld [vmem:[%s2530_s0 + $0x98] sm:$0xff]  }
  0x14   :  { %1814 = vmatprep.subr.bf16.mxu0 %v1905_v22  ;;  %1889 = vmatprep.subr.bf16.mxu1 %v1905_v22  ;;  %v241_v26 = vadd.f32 %v1972_v10, %v170_v8  ;;  %v242_v27 = vadd.f32 %v1972_v10, %v171_v9  ;;  %v243_v29 = vadd.f32 %v1972_v10, %v172_v12  ;;  %v1460_v35 = vunpack.c.l.bf16 %v1712_v23 }
  0x15   :  { %v244_v30 = vadd.f32 %v1972_v10, %v173_v13  ;;  %v358_v32 = vpack.c.bf16 %v298_v16, %v297_v15  ;;  %v175_v33 = vmul.f32 %v1453_v17, %v1961_v5  ;;  %v176_v34 = vmul.f32 %v1456_v18, %v1961_v5 }
  0x16   :  { %v301_v36 = vmax.f32 %v237_v20, 0.0  ;;  %v302_v37 = vmax.f32 %v238_v21, 0.0  ;;  %v1461_v39 = vunpack.c.h.bf16 %v1712_v23  ;;  %v303_v40 = vmax.f32 %v239_v24, 0.0  ;;  %v1721_v24 = vld [vmem:[%s2530_s0 + $0xa0] sm:$0xff]  }
  0x17   :  { %1815 = vmatpush3.bf16.msra.mxu0 %v1905_v22  ;;  %1897 = vmatpush3.bf16.msra.mxu1 %v1905_v22  ;;  %v1457_v22 = vunpack.c.h.bf16 %v1711_v4  ;;  %v304_v41 = vmax.f32 %v240_v25, 0.0  ;;  %v305_v42 = vmax.f32 %v241_v26, 0.0  ;;  %v359_v45 = vpack.c.bf16 %v300_v28, %v299_v19 }
  0x18   :  { %1816 = vmatprep.subr.bf16.mxu0 %v1906_v31  ;;  %1890 = vmatprep.subr.bf16.mxu1 %v1906_v31  ;;  %v307_v46 = vmax.f32 %v243_v29, 0.0  ;;  %v308_v47 = vmax.f32 %v244_v30, 0.0  ;;  %v246_v49 = vadd.f32 %v1972_v10, %v175_v33  ;;  %v2059_v50 = vadd.f32 %v1972_v10, %v176_v34  ;;  %v1722_v33 = vld [vmem:[%s2530_s0 + $0xa8] sm:$0xff]  }
  0x19   :  { %v177_v38 = vmul.f32 %v1457_v22, %v1961_v5  ;;  %v178_v51 = vmul.f32 %v1460_v35, %v1961_v5  ;;  %v179_v54 = vmul.f32 %v1461_v39, %v1961_v5  ;;  %v1480_v55 = vunpack.c.l.bf16 %v1717_v44 }
  0x1a   :  { %v360_v56 = vpack.c.bf16 %v302_v37, %v301_v36  ;;  %v361_v57 = vpack.c.bf16 %v304_v41, %v303_v40  ;;  %v1464_v62 = vunpack.c.l.bf16 %v2065_v52  ;;  %v1481_v63 = vunpack.c.h.bf16 %v1717_v44 }
  0x1b   :  { %1817 = vmatpush3.bf16.msra.mxu0 %v1906_v31  ;;  %1898 = vmatpush3.bf16.msra.mxu1 %v1906_v31  ;;  %v174_v31 = vmul.f32 %v1452_v14, %v1961_v5  ;;  %v2068_v53 = vadd.f32 %v1972_v10, %v177_v38  ;;  %v310_v1 = vmax.f32 %v246_v49, 0.0  ;;  %v311_v2 = vmax.f32 %v2059_v50, 0.0 }
  0x1c   :  { %1818 = vmatprep.subr.bf16.mxu0 %v1907_v43  ;;  %1891 = vmatprep.subr.bf16.mxu1 %v1907_v43  ;;  %v2084_v3 = vadd.f32 %v1972_v10, %v178_v51  ;;  %v188_v4 = vmul.f32 %v1480_v55, %v1961_v5  ;;  %v2089_v7 = vadd.f32 %v1972_v10, %v179_v54  ;;  %v1484_v9 = vunpack.c.l.bf16 %v1718_v59 }
  0x1d   :  { %v245_v48 = vadd.f32 %v1972_v10, %v174_v31  ;;  %v312_v6 = vmax.f32 %v2068_v53, 0.0  ;;  %v189_v8 = vmul.f32 %v1481_v63, %v1961_v5  ;;  %v1465_v12 = vunpack.c.h.bf16 %v2065_v52 }
  0x1e   :  { %v259_v13 = vadd.f32 %v1972_v10, %v188_v4  ;;  %v1485_v14 = vunpack.c.h.bf16 %v1718_v59  ;;  %v2098_v16 = vmul.f32 %v1464_v62, %v1961_v5  ;;  %v190_v18 = vmul.f32 %v1484_v9, %v1961_v5 }
  0x1f   :  { %1819 = vmatpush3.bf16.msra.mxu0 %v1907_v43  ;;  %1899 = vmatpush3.bf16.msra.mxu1 %v1907_v43  ;;  %v306_v43 = vmax.f32 %v242_v27, 0.0  ;;  %v309_v61 = vmax.f32 %v245_v48, 0.0  ;;  %v260_v17 = vadd.f32 %v1972_v10, %v189_v8  ;;  %v1492_v23 = vunpack.c.l.bf16 %v1720_v11 }
  0x20   :  { %v323_v20 = vmax.f32 %v259_v13, 0.0  ;;  %v191_v21 = vmul.f32 %v1485_v14, %v1961_v5  ;;  %v261_v27 = vadd.f32 %v1972_v10, %v190_v18  ;;  %v1493_v31 = vunpack.c.h.bf16 %v1720_v11  ;;  %v1725_v18 = vld [vmem:[%s2530_s0 + $0xc0] sm:$0xff]  }
  0x21   :  { %v2071_v58 = vpack.c.bf16 %v306_v43, %v305_v42  ;;  %v2107_v25 = vpack.c.bf16 %v310_v1, %v309_v61  ;;  %v324_v26 = vmax.f32 %v260_v17, 0.0  ;;  %v1496_v37 = vunpack.c.l.bf16 %v1721_v24  ;;  %v1724_v1 = vld [vmem:[%s2530_s0 + $0xb8] sm:$0xff]  }
  0x22   :  { %1821 = vmatmul.mubr.bf16.vlgmr.msra.gmra.mrb[0].mxu0 %v356_v60  ;;  %v2076_v60 = vpack.c.bf16 %v308_v47, %v307_v46  ;;  %v262_v29 = vadd.f32 %v1972_v10, %v191_v21  ;;  %v325_v35 = vmax.f32 %v261_v27, 0.0  ;;  %v195_v40 = vmul.f32 %v1493_v31, %v1961_v5  ;;  %v1723_v46 = vld [vmem:[%s2530_s0 + $0xb0] sm:$0xff]   ;;  %v1714_v47 = vld [vmem:[%s2530_s0 + $0x68] sm:$0xff]  }
  0x23   :  { %1824 = vmatprep.mubr.bf16.mxu0 %v357_v0  ;;  %v1719_v0 = vld [vmem:[%s2530_s0 + $0x90] sm:$0xff]   ;;  %v371_v34 = vpack.c.bf16 %v324_v26, %v323_v20  ;;  %v1497_v43 = vunpack.c.h.bf16 %v1721_v24  ;;  %v196_v44 = vmul.f32 %v1496_v37, %v1961_v5  ;;  %v1501_v54 = vunpack.c.h.bf16 %v1722_v33 }
  0x24   :  { %v1488_v15 = vunpack.c.l.bf16 %v1719_v0  ;;  %v1489_v19 = vunpack.c.h.bf16 %v1719_v0  ;;  %v326_v38 = vmax.f32 %v262_v29, 0.0  ;;  %v266_v49 = vadd.f32 %v1972_v10, %v195_v40  ;;  %v1727_v40 = vld [vmem:[%s2530_s0 + $0xd0] sm:$0xff]  }
  0x25   :  { %1852 = vmatprep.mubr.bf16.mxu1 %v371_v34  ;;  %v199_v62 = vmul.f32 %v1501_v54, %v1961_v5  ;;  %v1504_v63 = vunpack.c.l.bf16 %v1723_v46  ;;  %v1505_v0 = vunpack.c.h.bf16 %v1723_v46  ;;  %v313_v4 = vmax.f32 %v2084_v3, 0.0 }
  0x26   :  { %v192_v22 = vmul.f32 %v1488_v15, %v1961_v5  ;;  %v193_v28 = vmul.f32 %v1489_v19, %v1961_v5  ;;  %v372_v48 = vpack.c.bf16 %v326_v38, %v325_v35  ;;  %v330_v61 = vmax.f32 %v266_v49, 0.0 }
  0x27   :  { %v1468_v8 = vunpack.c.l.bf16 %v1714_v47  ;;  %v314_v13 = vmax.f32 %v2089_v7, 0.0  ;;  %v1469_v14 = vunpack.c.h.bf16 %v1714_v47  ;;  %v200_v15 = vmul.f32 %v1504_v63, %v1961_v5 }
  0x28   :  { %v263_v30 = vadd.f32 %v1972_v10, %v192_v22  ;;  %v264_v36 = vadd.f32 %v1972_v10, %v193_v28  ;;  %1853 = vmatmul.mubr.bf16.vlgmr.msra.gmra.mrb[0].mxu1 %v372_v48  ;;  %v201_v17 = vmul.f32 %v1505_v0, %v1961_v5  ;;  %v181_v3 = vmul.f32 %v1465_v12, %v1961_v5 }
  0x29   :  { %v1508_v19 = vunpack.c.l.bf16 %v1724_v1  ;;  %v1509_v20 = vunpack.c.h.bf16 %v1724_v1  ;;  %v271_v24 = vadd.f32 %v1972_v10, %v200_v15  ;;  %v1512_v27 = vunpack.c.l.bf16 %v1725_v18  ;;  %v1728_v15 = vld [vmem:[%s2530_s0 + $0xd8] sm:$0xff]  }
  0x2a   :  { %1825 = vmatmul.mubr.bf16.gmra.mrb[4].mxu0 %v358_v32  ;;  %v194_v32 = vmul.f32 %v1492_v23, %v1961_v5  ;;  %v327_v39 = vmax.f32 %v263_v30, 0.0  ;;  %v328_v42 = vmax.f32 %v264_v36, 0.0  ;;  %v270_v23 = vadd.f32 %v1972_v10, %v199_v62 }
  0x2b   :  { %1828 = vmatprep.mubr.bf16.mxu0 %v359_v45  ;;  %v1500_v45 = vunpack.c.l.bf16 %v1722_v33  ;;  %v1513_v52 = vunpack.c.h.bf16 %v1725_v18  ;;  %v365_v12 = vpack.c.bf16 %v312_v6, %v311_v2  ;;  %v251_v28 = vadd.f32 %v1972_v10, %v2098_v16  ;;  %v1716_v33 = vld [vmem:[%s2530_s0 + $0x78] sm:$0xff]   ;;  %v1726_v16 = vld [vmem:[%s2530_s0 + $0xc8] sm:$0xff]  }
  0x2c   :  { %v265_v41 = vadd.f32 %v1972_v10, %v194_v32  ;;  %v373_v55 = vpack.c.bf16 %v328_v42, %v327_v39  ;;  %v252_v31 = vadd.f32 %v1972_v10, %v181_v3  ;;  %v182_v32 = vmul.f32 %v1468_v8, %v1961_v5 }
  0x2d   :  { %v198_v59 = vmul.f32 %v1500_v45, %v1961_v5  ;;  %v202_v34 = vmul.f32 %v1508_v19, %v1961_v5  ;;  %v203_v50 = vmul.f32 %v1509_v20, %v1961_v5  ;;  %v366_v35 = vpack.c.bf16 %v314_v13, %v313_v4 }
  0x2e   :  { %v329_v51 = vmax.f32 %v265_v41, 0.0  ;;  %1856 = vmatprep.mubr.bf16.mxu1 %v373_v55  ;;  %v183_v53 = vmul.f32 %v1469_v14, %v1961_v5  ;;  %v334_v6 = vmax.f32 %v270_v23, 0.0  ;;  %v335_v36 = vmax.f32 %v271_v24, 0.0 }
  0x2f   :  { %v269_v22 = vadd.f32 %v1972_v10, %v198_v59  ;;  %v204_v38 = vmul.f32 %v1512_v27, %v1961_v5  ;;  %v205_v39 = vmul.f32 %v1513_v52, %v1961_v5  ;;  %v315_v41 = vmax.f32 %v251_v28, 0.0 }
  0x30   :  { %v374_v21 = vpack.c.bf16 %v330_v61, %v329_v51  ;;  %v316_v45 = vmax.f32 %v252_v31, 0.0  ;;  %v273_v46 = vadd.f32 %v1972_v10, %v202_v34  ;;  %v274_v47 = vadd.f32 %v1972_v10, %v203_v50 }
  0x31   :  { %v333_v2 = vmax.f32 %v269_v22, 0.0  ;;  %v1516_v48 = vunpack.c.l.bf16 %v1726_v16  ;;  %v1517_v51 = vunpack.c.h.bf16 %v1726_v16  ;;  %v1520_v54 = vunpack.c.l.bf16 %v1727_v40 }
  0x32   :  { %1829 = vmatmul.mubr.bf16.gmra.mrb[8].mxu0 %v360_v56  ;;  %v197_v56 = vmul.f32 %v1497_v43, %v1961_v5  ;;  %1857 = vmatmul.mubr.bf16.gmra.mrb[4].mxu1 %v374_v21  ;;  %v1521_v55 = vunpack.c.h.bf16 %v1727_v40  ;;  %v276_v59 = vadd.f32 %v1972_v10, %v205_v39  ;;  %v254_v61 = vadd.f32 %v1972_v10, %v183_v53  ;;  %v1729_v21 = vld [vmem:[%s2530_s0 + $0xe0] sm:$0xff]  }
  0x33   :  { %1832 = vmatprep.mubr.bf16.mxu0 %v361_v57  ;;  %v267_v57 = vadd.f32 %v1972_v10, %v196_v44  ;;  %v1476_v44 = vunpack.c.l.bf16 %v1716_v33  ;;  %v376_v49 = vpack.c.bf16 %v334_v6, %v333_v2  ;;  %v1477_v0 = vunpack.c.h.bf16 %v1716_v33 }
  0x34   :  { %v268_v9 = vadd.f32 %v1972_v10, %v197_v56  ;;  %v253_v56 = vadd.f32 %v1972_v10, %v182_v32  ;;  %v367_v1 = vpack.c.bf16 %v316_v45, %v315_v41  ;;  %v337_v4 = vmax.f32 %v273_v46, 0.0  ;;  %v1731_v41 = vld [vmem:[%s2530_s0 + $0xf0] sm:$0xff]  }
  0x35   :  { %v331_v11 = vmax.f32 %v267_v57, 0.0  ;;  %v275_v57 = vadd.f32 %v1972_v10, %v204_v38  ;;  %v338_v8 = vmax.f32 %v274_v47, 0.0  ;;  %v208_v13 = vmul.f32 %v1520_v54, %v1961_v5 }
  0x36   :  { %v332_v7 = vmax.f32 %v268_v9, 0.0  ;;  %v206_v9 = vmul.f32 %v1516_v48, %v1961_v5  ;;  %v209_v14 = vmul.f32 %v1521_v55, %v1961_v5  ;;  %v340_v3 = vmax.f32 %v276_v59, 0.0 }
  0x37   :  { %v339_v18 = vmax.f32 %v275_v57, 0.0  ;;  %v187_v20 = vmul.f32 %v1477_v0, %v1961_v5  ;;  %v378_v23 = vpack.c.bf16 %v338_v8, %v337_v4  ;;  %v279_v27 = vadd.f32 %v1972_v10, %v208_v13 }
  0x38   :  { %v375_v26 = vpack.c.bf16 %v332_v7, %v331_v11  ;;  %v207_v11 = vmul.f32 %v1517_v51, %v1961_v5  ;;  %v318_v7 = vmax.f32 %v254_v61, 0.0  ;;  %v277_v24 = vadd.f32 %v1972_v10, %v206_v9 }
  0x39   :  { %v280_v52 = vadd.f32 %v1972_v10, %v209_v14  ;;  %v379_v28 = vpack.c.bf16 %v340_v3, %v339_v18  ;;  %v258_v33 = vadd.f32 %v1972_v10, %v187_v20  ;;  %v343_v2 = vmax.f32 %v279_v27, 0.0 }
  0x3a   :  { %1833 = vmatmul.mubr.bf16.gmra.mrb[12].mxu0 %v2071_v58  ;;  %v1715_v58 = vld [vmem:[%s2530_s0 + $0x70] sm:$0xff]   ;;  %1860 = vmatprep.mubr.bf16.mxu1 %v375_v26  ;;  %v1524_v26 = vunpack.c.l.bf16 %v1728_v15  ;;  %v341_v50 = vmax.f32 %v277_v24, 0.0  ;;  %v1536_v51 = vunpack.c.l.bf16 %v1731_v41  ;;  %v1537_v54 = vunpack.c.h.bf16 %v1731_v41 }
  0x3b   :  { %1836 = vmatprep.mubr.bf16.mxu0 %v2076_v60  ;;  %v272_v60 = vadd.f32 %v1972_v10, %v201_v17  ;;  %v1472_v29 = vunpack.c.l.bf16 %v1715_v58  ;;  %v1473_v30 = vunpack.c.h.bf16 %v1715_v58  ;;  %1861 = vmatmul.mubr.bf16.gmra.mrb[8].mxu1 %v376_v49  ;;  %v186_v17 = vmul.f32 %v1476_v44, %v1961_v5 }
  0x3c   :  { %v317_v58 = vmax.f32 %v253_v56, 0.0  ;;  %v344_v6 = vmax.f32 %v280_v52, 0.0  ;;  %v322_v40 = vmax.f32 %v258_v33, 0.0  ;;  %v217_v0 = vmul.f32 %v1537_v54, %v1961_v5 }
  0x3d   :  { %v336_v37 = vmax.f32 %v272_v60, 0.0  ;;  %v184_v42 = vmul.f32 %v1472_v29, %v1961_v5  ;;  %v185_v43 = vmul.f32 %v1473_v30, %v1961_v5  ;;  %v278_v60 = vadd.f32 %v1972_v10, %v207_v11 }
  0x3e   :  { %v1528_v29 = vunpack.c.l.bf16 %v1729_v21  ;;  %v1529_v30 = vunpack.c.h.bf16 %v1729_v21  ;;  %v368_v31 = vpack.c.bf16 %v318_v7, %v317_v58  ;;  %v257_v32 = vadd.f32 %v1972_v10, %v186_v17 }
  0x3f   :  { %v255_v62 = vadd.f32 %v1972_v10, %v184_v42  ;;  %v256_v63 = vadd.f32 %v1972_v10, %v185_v43  ;;  %v342_v53 = vmax.f32 %v278_v60, 0.0  ;;  %v381_v45 = vpack.c.bf16 %v344_v6, %v343_v2 }
  0x40   :  { %v213_v38 = vmul.f32 %v1529_v30, %v1961_v5  ;;  %v321_v39 = vmax.f32 %v257_v32, 0.0  ;;  %v288_v17 = vadd.f32 %v1972_v10, %v217_v0 }
  0x41   :  { %v319_v19 = vmax.f32 %v255_v62, 0.0  ;;  %v320_v22 = vmax.f32 %v256_v63, 0.0  ;;  %v380_v44 = vpack.c.bf16 %v342_v53, %v341_v50  ;;  %v216_v63 = vmul.f32 %v1536_v51, %v1961_v5 }
  0x42   :  { %1837 = vmatmul.mubr.bf16.gmra.mrb[16].mxu0 %v2107_v25  ;;  %v377_v25 = vpack.c.bf16 %v336_v37, %v335_v36  ;;  %v1730_v36 = vld [vmem:[%s2530_s0 + $0xe8] sm:$0xff]   ;;  %v212_v37 = vmul.f32 %v1528_v29, %v1961_v5  ;;  %v284_v49 = vadd.f32 %v1972_v10, %v213_v38  ;;  %v370_v55 = vpack.c.bf16 %v322_v40, %v321_v39 }
  0x43   :  { %1840 = vmatprep.mubr.bf16.mxu0 %v365_v12  ;;  %v1525_v12 = vunpack.c.h.bf16 %v1728_v15  ;;  %v369_v34 = vpack.c.bf16 %v320_v22, %v319_v19  ;;  %v1532_v43 = vunpack.c.l.bf16 %v1730_v36  ;;  %v1533_v47 = vunpack.c.h.bf16 %v1730_v36 }
  0x44   :  { %1864 = vmatprep.mubr.bf16.mxu1 %v377_v25  ;;  %v283_v48 = vadd.f32 %v1972_v10, %v212_v37  ;;  %v348_v62 = vmax.f32 %v284_v49, 0.0  ;;  %v287_v15 = vadd.f32 %v1972_v10, %v216_v63  ;;  %v352_v20 = vmax.f32 %v288_v17, 0.0 }
  0x45   :  { %1865 = vmatmul.mubr.bf16.gmra.mrb[12].mxu1 %v378_v23  ;;  %v211_v16 = vmul.f32 %v1525_v12, %v1961_v5  ;;  %v214_v56 = vmul.f32 %v1532_v43, %v1961_v5  ;;  %v215_v59 = vmul.f32 %v1533_v47, %v1961_v5 }
  0x46   :  { %1868 = vmatprep.mubr.bf16.mxu1 %v379_v28  ;;  %v347_v61 = vmax.f32 %v283_v48, 0.0  ;;  %v351_v19 = vmax.f32 %v287_v15, 0.0 }
  0x47   :  { %v282_v46 = vadd.f32 %v1972_v10, %v211_v16  ;;  %v285_v4 = vadd.f32 %v1972_v10, %v214_v56  ;;  %v286_v9 = vadd.f32 %v1972_v10, %v215_v59 }
  0x48   :  { %v383_v14 = vpack.c.bf16 %v348_v62, %v347_v61  ;;  %v385_v24 = vpack.c.bf16 %v352_v20, %v351_v19 }
  0x49   :  { %v346_v57 = vmax.f32 %v282_v46, 0.0  ;;  %v349_v18 = vmax.f32 %v285_v4, 0.0  ;;  %v350_v3 = vmax.f32 %v286_v9, 0.0 }
  0x4a   :  { %1841 = vmatmul.mubr.bf16.gmra.mrb[20].mxu0 %v366_v35  ;;  %v210_v35 = vmul.f32 %v1524_v26, %v1961_v5 }
  0x4b   :  { %1844 = vmatprep.mubr.bf16.mxu0 %v367_v1  ;;  %v1732_v1 = vld [vmem:[%s2530_s0 + $0xf8] sm:$0xff]   ;;  %v384_v21 = vpack.c.bf16 %v350_v3, %v349_v18 }
  0x4c   :  { %v281_v42 = vadd.f32 %v1972_v10, %v210_v35  ;;  %v1540_v11 = vunpack.c.l.bf16 %v1732_v1  ;;  %v1541_v13 = vunpack.c.h.bf16 %v1732_v1 }
  0x4d   :  { %1869 = vmatmul.mubr.bf16.gmra.mrb[16].mxu1 %v380_v44 }
  0x4e   :  { %v345_v25 = vmax.f32 %v281_v42, 0.0  ;;  %1872 = vmatprep.mubr.bf16.mxu1 %v381_v45  ;;  %v218_v58 = vmul.f32 %v1540_v11, %v1961_v5  ;;  %v219_v7 = vmul.f32 %v1541_v13, %v1961_v5 }
  0x50   :  { %v382_v8 = vpack.c.bf16 %v346_v57, %v345_v25  ;;  %v289_v22 = vadd.f32 %v1972_v10, %v218_v58  ;;  %v290_v23 = vadd.f32 %v1972_v10, %v219_v7 }
  0x52   :  { %1845 = vmatmul.mubr.bf16.gmra.mrb[24].mxu0 %v368_v31  ;;  %v353_v26 = vmax.f32 %v289_v22, 0.0  ;;  %v354_v60 = vmax.f32 %v290_v23, 0.0 }
  0x53   :  { %1848 = vmatprep.mubr.bf16.mxu0 %v369_v34 }
  0x54   :  { %v386_v27 = vpack.c.bf16 %v354_v60, %v353_v26 }
  0x55   :  { %1873 = vmatmul.mubr.bf16.gmra.mrb[20].mxu1 %v382_v8 }
  0x56   :  { %1876 = vmatprep.mubr.bf16.mxu1 %v383_v14 }
  0x5a   :  { %1849 = vmatmul.mubr.bf16.gmra.mrb[28].mxu0 %v370_v55 }
  0x5d   :  { %1877 = vmatmul.mubr.bf16.gmra.mrb[24].mxu1 %v384_v21 }
  0x5e   :  { %1880 = vmatprep.mubr.bf16.mxu1 %v385_v24 }
  0x65   :  { %1881 = vmatmul.mubr.bf16.gmra.mrb[28].mxu1 %v386_v27 }
  0xf5   :  { %v1822_v52 = vpop.f32.mrb[0].mxu0 }
  0xf6   :  { %v485_v12 = vpop.f32.mrb[1].mxu0  ;;  %v1132_v10 = vmul.f32 %v1822_v52, %v1822_v52 }
  0xf7   :  { %v1823_v28 = vpop.f32.mrb[2].mxu0  ;;  %v1130_v30 = vmul.f32 %v485_v12, %v485_v12 }
  0xf8   :  { %v1550_v29 = vpack.c.bf16 %v1823_v28, %v1822_v52  ;;  %v488_v5 = vpop.f32.mrb[3].mxu0  ;;  %v1133_v35 = vmul.f32 %v1823_v28, %v1823_v28 }
  0xf9   :  { %v1545_v31 = vpack.c.bf16 %v488_v5, %v485_v12  ;;  %v1060_v32 = vadd.f32 %v488_v5, %v485_v12  ;;  %v1131_v33 = vmul.f32 %v488_v5, %v488_v5 }
  0xfa   :  { %1733 = vst [vmem:[%s2533_s4 + $0x8] sm:$0xff] %v1550_v29  }
  0xfb   :  { %1546 = vst [vmem:[%s2533_s4] sm:$0xff] %v1545_v31   ;;  %v1061_v34 = vadd.f32 %v1822_v52, %v1060_v32  ;;  %v1194_v50 = vadd.f32 %v1131_v33, %v1130_v30  ;;  %v2253_v14 = vpop.f32.mrb[0].mxu1 }
  0xfc   :  { %v2255_v15 = vpop.f32.mrb[1].mxu1 }
  0xfd   :  { %v1195_v53 = vadd.f32 %v1194_v50, %v1132_v10  ;;  %v1826_v2 = vpop.f32.mrb[4].mxu0  ;;  %v1062_v6 = vadd.f32 %v1823_v28, %v1061_v34  ;;  %v2257_v7 = vpop.f32.mrb[2].mxu1 }
  0xfe   :  { %v501_v16 = vpop.f32.mrb[5].mxu0  ;;  %v1136_v46 = vmul.f32 %v1826_v2, %v1826_v2  ;;  %v1630_v20 = vpack.c.bf16 %v2257_v7, %v2253_v14  ;;  %v2261_v21 = vpop.f32.mrb[3].mxu1 }
  0xff   :  { %v1063_v36 = vadd.f32 %v1062_v6, %v501_v16  ;;  %v1134_v37 = vmul.f32 %v501_v16, %v501_v16  ;;  %v1196_v38 = vadd.f32 %v1195_v53, %v1133_v35  ;;  %v1827_v39 = vpop.f32.mrb[6].mxu0  ;;  %v1625_v60 = vpack.c.bf16 %v2261_v21, %v2255_v15 }
 0x100   :  { %v1560_v40 = vpack.c.bf16 %v1827_v39, %v1826_v2  ;;  %v504_v41 = vpop.f32.mrb[7].mxu0  ;;  %v1137_v49 = vmul.f32 %v1827_v39, %v1827_v39  ;;  %1749 = vst [vmem:[%s2533_s4 + $0x88] sm:$0xff] %v1630_v20  }
 0x101   :  { %v1197_v42 = vadd.f32 %v1196_v38, %v1134_v37  ;;  %v1555_v43 = vpack.c.bf16 %v504_v41, %v501_v16  ;;  %v1064_v44 = vadd.f32 %v1063_v36, %v504_v41  ;;  %v1135_v45 = vmul.f32 %v504_v41, %v504_v41  ;;  %1748 = vst [vmem:[%s2533_s4 + $0x80] sm:$0xff] %v1625_v60  }
 0x102   :  { %1735 = vst [vmem:[%s2533_s4 + $0x18] sm:$0xff] %v1560_v40  }
 0x103   :  { %1734 = vst [vmem:[%s2533_s4 + $0x10] sm:$0xff] %v1555_v43   ;;  %v1065_v47 = vadd.f32 %v1826_v2, %v1064_v44  ;;  %v1198_v48 = vadd.f32 %v1197_v42, %v1135_v45 }
 0x105   :  { %v1199_v51 = vadd.f32 %v1198_v48, %v1136_v46  ;;  %v1830_v54 = vpop.f32.mrb[8].mxu0  ;;  %v1066_v55 = vadd.f32 %v1827_v39, %v1065_v47  ;;  %v2277_v33 = vpop.f32.mrb[4].mxu1 }
 0x106   :  { %v517_v56 = vpop.f32.mrb[9].mxu0  ;;  %v1140_v9 = vmul.f32 %v1830_v54, %v1830_v54  ;;  %v2279_v10 = vpop.f32.mrb[5].mxu1 }
 0x107   :  { %v1067_v25 = vadd.f32 %v1066_v55, %v517_v56  ;;  %v1138_v57 = vmul.f32 %v517_v56, %v517_v56  ;;  %v1200_v59 = vadd.f32 %v1199_v51, %v1137_v49  ;;  %v1831_v61 = vpop.f32.mrb[10].mxu0  ;;  %v2281_v2 = vpop.f32.mrb[6].mxu1 }
 0x108   :  { %v1570_v62 = vpack.c.bf16 %v1831_v61, %v1830_v54  ;;  %v520_v63 = vpop.f32.mrb[11].mxu0  ;;  %v1141_v17 = vmul.f32 %v1831_v61, %v1831_v61  ;;  %v1640_v16 = vpack.c.bf16 %v2281_v2, %v2277_v33  ;;  %v2285_v36 = vpop.f32.mrb[7].mxu1 }
 0x109   :  { %v1201_v0 = vadd.f32 %v1200_v59, %v1138_v57  ;;  %v1565_v1 = vpack.c.bf16 %v520_v63, %v517_v56  ;;  %v1068_v4 = vadd.f32 %v1067_v25, %v520_v63  ;;  %v1139_v8 = vmul.f32 %v520_v63, %v520_v63 }
 0x10a   :  { %1737 = vst [vmem:[%s2533_s4 + $0x28] sm:$0xff] %v1570_v62   ;;  %v1635_v41 = vpack.c.bf16 %v2285_v36, %v2279_v10  ;;  %1751 = vst [vmem:[%s2533_s4 + $0x98] sm:$0xff] %v1640_v16  }
 0x10b   :  { %1736 = vst [vmem:[%s2533_s4 + $0x20] sm:$0xff] %v1565_v1   ;;  %v1069_v11 = vadd.f32 %v1830_v54, %v1068_v4  ;;  %v1202_v13 = vadd.f32 %v1201_v0, %v1139_v8 }
 0x10c   :  { %1750 = vst [vmem:[%s2533_s4 + $0x90] sm:$0xff] %v1635_v41  }
 0x10d   :  { %v1203_v18 = vadd.f32 %v1202_v13, %v1140_v9  ;;  %v1834_v3 = vpop.f32.mrb[12].mxu0  ;;  %v1070_v58 = vadd.f32 %v1831_v61, %v1069_v11 }
 0x10e   :  { %v533_v19 = vpop.f32.mrb[13].mxu0  ;;  %v1144_v30 = vmul.f32 %v1834_v3, %v1834_v3  ;;  %v2301_v54 = vpop.f32.mrb[8].mxu1 }
 0x10f   :  { %v1071_v22 = vadd.f32 %v1070_v58, %v533_v19  ;;  %v1142_v23 = vmul.f32 %v533_v19, %v533_v19  ;;  %v1204_v24 = vadd.f32 %v1203_v18, %v1141_v17  ;;  %v1835_v26 = vpop.f32.mrb[14].mxu0  ;;  %v2303_v55 = vpop.f32.mrb[9].mxu1 }
 0x110   :  { %v1580_v27 = vpack.c.bf16 %v1835_v26, %v1834_v3  ;;  %v536_v52 = vpop.f32.mrb[15].mxu0  ;;  %v1145_v34 = vmul.f32 %v1835_v26, %v1835_v26  ;;  %v2305_v61 = vpop.f32.mrb[10].mxu1 }
 0x111   :  { %v1205_v12 = vadd.f32 %v1204_v24, %v1142_v23  ;;  %v1575_v28 = vpack.c.bf16 %v536_v52, %v533_v19  ;;  %v1072_v29 = vadd.f32 %v1071_v22, %v536_v52  ;;  %v1143_v5 = vmul.f32 %v536_v52, %v536_v52  ;;  %v2309_v0 = vpop.f32.mrb[11].mxu1 }
 0x112   :  { %1739 = vst [vmem:[%s2533_s4 + $0x38] sm:$0xff] %v1580_v27   ;;  %v1650_v63 = vpack.c.bf16 %v2305_v61, %v2301_v54  ;;  %v1645_v11 = vpack.c.bf16 %v2309_v0, %v2303_v55 }
 0x113   :  { %1738 = vst [vmem:[%s2533_s4 + $0x30] sm:$0xff] %v1575_v28   ;;  %v1073_v31 = vadd.f32 %v1834_v3, %v1072_v29  ;;  %v1206_v32 = vadd.f32 %v1205_v12, %v1143_v5 }
 0x114   :  { %1753 = vst [vmem:[%s2533_s4 + $0xa8] sm:$0xff] %v1650_v63   ;;  %1752 = vst [vmem:[%s2533_s4 + $0xa0] sm:$0xff] %v1645_v11  }
 0x115   :  { %v1207_v50 = vadd.f32 %v1206_v32, %v1144_v30  ;;  %v1838_v35 = vpop.f32.mrb[16].mxu0  ;;  %v1074_v53 = vadd.f32 %v1835_v26, %v1073_v31 }
 0x116   :  { %v549_v6 = vpop.f32.mrb[17].mxu0  ;;  %v1148_v48 = vmul.f32 %v1838_v35, %v1838_v35 }
 0x117   :  { %v1075_v37 = vadd.f32 %v1074_v53, %v549_v6  ;;  %v1146_v38 = vmul.f32 %v549_v6, %v549_v6  ;;  %v1208_v39 = vadd.f32 %v1207_v50, %v1145_v34  ;;  %v1839_v40 = vpop.f32.mrb[18].mxu0 }
 0x118   :  { %v1590_v42 = vpack.c.bf16 %v1839_v40, %v1838_v35  ;;  %v552_v43 = vpop.f32.mrb[19].mxu0  ;;  %v1149_v56 = vmul.f32 %v1839_v40, %v1839_v40  ;;  %v2325_v24 = vpop.f32.mrb[12].mxu1 }
 0x119   :  { %v1209_v44 = vadd.f32 %v1208_v39, %v1146_v38  ;;  %v1585_v45 = vpack.c.bf16 %v552_v43, %v549_v6  ;;  %v1076_v46 = vadd.f32 %v1075_v37, %v552_v43  ;;  %v1147_v47 = vmul.f32 %v552_v43, %v552_v43  ;;  %v2327_v26 = vpop.f32.mrb[13].mxu1 }
 0x11a   :  { %1741 = vst [vmem:[%s2533_s4 + $0x48] sm:$0xff] %v1590_v42   ;;  %v2329_v28 = vpop.f32.mrb[14].mxu1 }
 0x11b   :  { %1740 = vst [vmem:[%s2533_s4 + $0x40] sm:$0xff] %v1585_v45   ;;  %v1077_v49 = vadd.f32 %v1838_v35, %v1076_v46  ;;  %v1210_v51 = vadd.f32 %v1209_v44, %v1147_v47  ;;  %v1660_v5 = vpack.c.bf16 %v2329_v28, %v2325_v24  ;;  %v2333_v30 = vpop.f32.mrb[15].mxu1 }
 0x11c   :  { %v1655_v35 = vpack.c.bf16 %v2333_v30, %v2327_v26 }
 0x11d   :  { %v1211_v25 = vadd.f32 %v1210_v51, %v1148_v48  ;;  %v1842_v57 = vpop.f32.mrb[20].mxu0  ;;  %v1078_v59 = vadd.f32 %v1839_v40, %v1077_v49  ;;  %1755 = vst [vmem:[%s2533_s4 + $0xb8] sm:$0xff] %v1660_v5  }
 0x11e   :  { %v565_v62 = vpop.f32.mrb[21].mxu0  ;;  %v1152_v20 = vmul.f32 %v1842_v57, %v1842_v57  ;;  %1754 = vst [vmem:[%s2533_s4 + $0xb0] sm:$0xff] %v1655_v35   ;;  %v1163_v35 = vmul.f32 %v2261_v21, %v2261_v21 }
 0x11f   :  { %v1079_v1 = vadd.f32 %v1078_v59, %v565_v62  ;;  %v1150_v4 = vmul.f32 %v565_v62, %v565_v62  ;;  %v1212_v8 = vadd.f32 %v1211_v25, %v1149_v56  ;;  %v1843_v9 = vpop.f32.mrb[22].mxu0 }
 0x120   :  { %v1600_v13 = vpack.c.bf16 %v1843_v9, %v1842_v57  ;;  %v568_v17 = vpop.f32.mrb[23].mxu0  ;;  %v1153_v60 = vmul.f32 %v1843_v9, %v1843_v9  ;;  %v2349_v43 = vpop.f32.mrb[16].mxu1 }
 0x121   :  { %v1213_v18 = vadd.f32 %v1212_v8, %v1150_v4  ;;  %v1595_v3 = vpack.c.bf16 %v568_v17, %v565_v62  ;;  %v1080_v58 = vadd.f32 %v1079_v1, %v568_v17  ;;  %v1151_v19 = vmul.f32 %v568_v17, %v568_v17  ;;  %v2351_v44 = vpop.f32.mrb[17].mxu1 }
 0x122   :  { %1743 = vst [vmem:[%s2533_s4 + $0x58] sm:$0xff] %v1600_v13   ;;  %v2353_v49 = vpop.f32.mrb[18].mxu1 }
 0x123   :  { %1742 = vst [vmem:[%s2533_s4 + $0x50] sm:$0xff] %v1595_v3   ;;  %v1081_v22 = vadd.f32 %v1842_v57, %v1080_v58  ;;  %v1214_v23 = vadd.f32 %v1213_v18, %v1151_v19  ;;  %v1670_v56 = vpack.c.bf16 %v2353_v49, %v2349_v43  ;;  %v2357_v25 = vpop.f32.mrb[19].mxu1 }
 0x124   :  { %v1665_v1 = vpack.c.bf16 %v2357_v25, %v2351_v44 }
 0x125   :  { %v1215_v27 = vadd.f32 %v1214_v23, %v1152_v20  ;;  %v1846_v52 = vpop.f32.mrb[24].mxu0  ;;  %v1082_v12 = vadd.f32 %v1843_v9, %v1081_v22  ;;  %1757 = vst [vmem:[%s2533_s4 + $0xc8] sm:$0xff] %v1670_v56  }
 0x126   :  { %v581_v29 = vpop.f32.mrb[25].mxu0  ;;  %v1156_v40 = vmul.f32 %v1846_v52, %v1846_v52  ;;  %1756 = vst [vmem:[%s2533_s4 + $0xc0] sm:$0xff] %v1665_v1  }
 0x127   :  { %v1083_v31 = vadd.f32 %v1082_v12, %v581_v29  ;;  %v1154_v32 = vmul.f32 %v581_v29, %v581_v29  ;;  %v1216_v34 = vadd.f32 %v1215_v27, %v1153_v60  ;;  %v1847_v50 = vpop.f32.mrb[26].mxu0  ;;  %v1162_v27 = vmul.f32 %v2255_v15, %v2255_v15 }
 0x128   :  { %v1610_v53 = vpack.c.bf16 %v1847_v50, %v1846_v52  ;;  %v584_v6 = vpop.f32.mrb[27].mxu0  ;;  %v1157_v45 = vmul.f32 %v1847_v50, %v1847_v50  ;;  %v2373_v19 = vpop.f32.mrb[20].mxu1 }
 0x129   :  { %v1217_v16 = vadd.f32 %v1216_v34, %v1154_v32  ;;  %v1605_v37 = vpack.c.bf16 %v584_v6, %v581_v29  ;;  %v1084_v38 = vadd.f32 %v1083_v31, %v584_v6  ;;  %v1155_v39 = vmul.f32 %v584_v6, %v584_v6  ;;  %v2375_v20 = vpop.f32.mrb[21].mxu1 }
 0x12a   :  { %1745 = vst [vmem:[%s2533_s4 + $0x68] sm:$0xff] %v1610_v53  }
 0x12b   :  { %1744 = vst [vmem:[%s2533_s4 + $0x60] sm:$0xff] %v1605_v37   ;;  %v1085_v41 = vadd.f32 %v1846_v52, %v1084_v38  ;;  %v1218_v42 = vadd.f32 %v1217_v16, %v1155_v39  ;;  %v2379_v52 = vpop.f32.mrb[22].mxu1  ;;  %v1165_v38 = vmul.f32 %v2257_v7, %v2257_v7 }
 0x12c   :  { %v1680_v12 = vpack.c.bf16 %v2379_v52, %v2373_v19  ;;  %v2383_v29 = vpop.f32.mrb[23].mxu1 }
 0x12d   :  { %v1219_v46 = vadd.f32 %v1218_v42, %v1156_v40  ;;  %v1850_v47 = vpop.f32.mrb[28].mxu0  ;;  %v1086_v48 = vadd.f32 %v1847_v50, %v1085_v41  ;;  %v1675_v32 = vpack.c.bf16 %v2383_v29, %v2375_v20  ;;  %v1166_v40 = vmul.f32 %v2279_v10, %v2279_v10 }
 0x12e   :  { %v597_v51 = vpop.f32.mrb[29].mxu0  ;;  %v1160_v18 = vmul.f32 %v1850_v47, %v1850_v47  ;;  %1759 = vst [vmem:[%s2533_s4 + $0xd8] sm:$0xff] %v1680_v12   ;;  %v1174_v12 = vmul.f32 %v2327_v26, %v2327_v26 }
 0x12f   :  { %v1087_v57 = vadd.f32 %v1086_v48, %v597_v51  ;;  %v1158_v59 = vmul.f32 %v597_v51, %v597_v51  ;;  %v1220_v62 = vadd.f32 %v1219_v46, %v1157_v45  ;;  %v1851_v63 = vpop.f32.mrb[30].mxu0  ;;  %1758 = vst [vmem:[%s2533_s4 + $0xd0] sm:$0xff] %v1675_v32  }
 0x130   :  { %v1620_v4 = vpack.c.bf16 %v1851_v63, %v1850_v47  ;;  %v600_v8 = vpop.f32.mrb[31].mxu0  ;;  %v1161_v22 = vmul.f32 %v1851_v63, %v1851_v63  ;;  %v2400_v16 = vpop.f32.mrb[24].mxu1 }
 0x131   :  { %v1221_v9 = vadd.f32 %v1220_v62, %v1158_v59  ;;  %v1615_v11 = vpack.c.bf16 %v600_v8, %v597_v51  ;;  %v1088_v13 = vadd.f32 %v1087_v57, %v600_v8  ;;  %v1159_v17 = vmul.f32 %v600_v8, %v600_v8  ;;  %v2402_v37 = vpop.f32.mrb[25].mxu1 }
 0x132   :  { %1747 = vst [vmem:[%s2533_s4 + $0x78] sm:$0xff] %v1620_v4   ;;  %v2409_v41 = vpop.f32.mrb[26].mxu1  ;;  %v1167_v51 = vmul.f32 %v2285_v36, %v2285_v36  ;;  %v1170_v4 = vmul.f32 %v2303_v55, %v2303_v55 }
 0x133   :  { %1746 = vst [vmem:[%s2533_s4 + $0x70] sm:$0xff] %v1615_v11   ;;  %v1089_v3 = vadd.f32 %v1850_v47, %v1088_v13  ;;  %v1222_v58 = vadd.f32 %v1221_v9, %v1159_v17  ;;  %v1690_v42 = vpack.c.bf16 %v2409_v41, %v2400_v16 }
 0x135   :  { %v1223_v23 = vadd.f32 %v1222_v58, %v1160_v18  ;;  %v1090_v60 = vadd.f32 %v1851_v63, %v1089_v3  ;;  %1761 = vst [vmem:[%s2533_s4 + $0xe8] sm:$0xff] %v1690_v42   ;;  %v1169_v63 = vmul.f32 %v2281_v2, %v2281_v2  ;;  %v1171_v3 = vmul.f32 %v2309_v0, %v2309_v0 }
 0x137   :  { %v1091_v5 = vadd.f32 %v1090_v60, %v2255_v15  ;;  %v1224_v31 = vadd.f32 %v1223_v23, %v1161_v22  ;;  %v1164_v15 = vmul.f32 %v2253_v14, %v2253_v14  ;;  %v1173_v23 = vmul.f32 %v2305_v61, %v2305_v61 }
 0x139   :  { %v1225_v34 = vadd.f32 %v1224_v31, %v1162_v27  ;;  %v1092_v50 = vadd.f32 %v1091_v5, %v2261_v21 }
 0x13b   :  { %v1093_v53 = vadd.f32 %v2253_v14, %v1092_v50  ;;  %v1226_v6 = vadd.f32 %v1225_v34, %v1163_v35  ;;  %v2413_v14 = vpop.f32.mrb[27].mxu1  ;;  %v1175_v34 = vmul.f32 %v2333_v30, %v2333_v30 }
 0x13c   :  { %v1685_v47 = vpack.c.bf16 %v2413_v14, %v2402_v37  ;;  %v2430_v59 = vpop.f32.mrb[28].mxu1 }
 0x13d   :  { %v1227_v39 = vadd.f32 %v1226_v6, %v1164_v15  ;;  %v1094_v21 = vadd.f32 %v2257_v7, %v1093_v53  ;;  %v2432_v62 = vpop.f32.mrb[29].mxu1 }
 0x13e   :  { %1760 = vst [vmem:[%s2533_s4 + $0xe0] sm:$0xff] %v1685_v47   ;;  %v2439_v8 = vpop.f32.mrb[30].mxu1 }
 0x13f   :  { %v1095_v45 = vadd.f32 %v1094_v21, %v2279_v10  ;;  %v1228_v46 = vadd.f32 %v1227_v39, %v1165_v38  ;;  %v1168_v10 = vmul.f32 %v2277_v33, %v2277_v33  ;;  %v1700_v9 = vpack.c.bf16 %v2439_v8, %v2430_v59 }
 0x140   :  { %v1179_v21 = vmul.f32 %v2357_v25, %v2357_v25 }
 0x141   :  { %v1229_v7 = vadd.f32 %v1228_v46, %v1166_v40  ;;  %v1096_v48 = vadd.f32 %v1095_v45, %v2285_v36  ;;  %1763 = vst [vmem:[%s2533_s4 + $0xf8] sm:$0xff] %v1700_v9   ;;  %v1187_v9 = vmul.f32 %v2413_v14, %v2413_v14 }
 0x143   :  { %v1097_v56 = vadd.f32 %v2277_v33, %v1096_v48  ;;  %v1230_v57 = vadd.f32 %v1229_v7, %v1167_v51  ;;  %v2443_v33 = vpop.f32.mrb[31].mxu1  ;;  %v1183_v51 = vmul.f32 %v2383_v29, %v2383_v29 }
 0x144   :  { %v1695_v17 = vpack.c.bf16 %v2443_v33, %v2432_v62 }
 0x145   :  { %v1231_v1 = vadd.f32 %v1230_v57, %v1168_v10  ;;  %v1098_v36 = vadd.f32 %v2281_v2, %v1097_v56 }
 0x146   :  { %1762 = vst [vmem:[%s2533_s4 + $0xf0] sm:$0xff] %v1695_v17  }
 0x147   :  { %v1099_v11 = vadd.f32 %v1098_v36, %v2303_v55  ;;  %v1232_v13 = vadd.f32 %v1231_v1, %v1169_v63  ;;  %v1172_v55 = vmul.f32 %v2301_v54, %v2301_v54 }
 0x149   :  { %v1233_v2 = vadd.f32 %v1232_v13, %v1170_v4  ;;  %v1100_v18 = vadd.f32 %v1099_v11, %v2309_v0 }
 0x14b   :  { %v1101_v58 = vadd.f32 %v2301_v54, %v1100_v18  ;;  %v1234_v22 = vadd.f32 %v1233_v2, %v1171_v3  ;;  %v1176_v54 = vmul.f32 %v2325_v24, %v2325_v24 }
 0x14d   :  { %v1235_v60 = vadd.f32 %v1234_v22, %v1172_v55  ;;  %v1102_v27 = vadd.f32 %v2305_v61, %v1101_v58  ;;  %v1177_v61 = vmul.f32 %v2329_v28, %v2329_v28  ;;  %v1191_v58 = vmul.f32 %v2443_v33, %v2443_v33 }
 0x14f   :  { %v1103_v0 = vadd.f32 %v1102_v27, %v2327_v26  ;;  %v1236_v5 = vadd.f32 %v1235_v60, %v1173_v23  ;;  %v1178_v26 = vmul.f32 %v2351_v44, %v2351_v44 }
 0x151   :  { %v1237_v31 = vadd.f32 %v1236_v5, %v1174_v12  ;;  %v1104_v32 = vadd.f32 %v1103_v0, %v2333_v30 }
 0x153   :  { %v1105_v50 = vadd.f32 %v2325_v24, %v1104_v32  ;;  %v1238_v35 = vadd.f32 %v1237_v31, %v1175_v34  ;;  %v1180_v24 = vmul.f32 %v2349_v43, %v2349_v43 }
 0x155   :  { %v1239_v15 = vadd.f32 %v1238_v35, %v1176_v54  ;;  %v1106_v53 = vadd.f32 %v2329_v28, %v1105_v50  ;;  %v1181_v28 = vmul.f32 %v2353_v49, %v2353_v49 }
 0x157   :  { %v1107_v6 = vadd.f32 %v1106_v53, %v2351_v44  ;;  %v1240_v38 = vadd.f32 %v1239_v15, %v1177_v61  ;;  %v1182_v44 = vmul.f32 %v2375_v20, %v2375_v20 }
 0x159   :  { %v1241_v39 = vadd.f32 %v1240_v38, %v1178_v26  ;;  %v1108_v30 = vadd.f32 %v1107_v6, %v2357_v25 }
 0x15b   :  { %v1109_v40 = vadd.f32 %v2349_v43, %v1108_v30  ;;  %v1242_v42 = vadd.f32 %v1241_v39, %v1179_v21  ;;  %v1184_v43 = vmul.f32 %v2373_v19, %v2373_v19 }
 0x15d   :  { %v1243_v45 = vadd.f32 %v1242_v42, %v1180_v24  ;;  %v1110_v46 = vadd.f32 %v2353_v49, %v1109_v40  ;;  %v1185_v49 = vmul.f32 %v2379_v52, %v2379_v52 }
 0x15f   :  { %v1111_v47 = vadd.f32 %v1110_v46, %v2375_v20  ;;  %v1244_v7 = vadd.f32 %v1243_v45, %v1181_v28  ;;  %v1186_v20 = vmul.f32 %v2402_v37, %v2402_v37 }
 0x161   :  { %v1245_v48 = vadd.f32 %v1244_v7, %v1182_v44  ;;  %v1112_v25 = vadd.f32 %v1111_v47, %v2383_v29 }
 0x163   :  { %v1113_v10 = vadd.f32 %v2373_v19, %v1112_v25  ;;  %v1246_v56 = vadd.f32 %v1245_v48, %v1183_v51  ;;  %v1188_v19 = vmul.f32 %v2400_v16, %v2400_v16 }
 0x165   :  { %v1247_v57 = vadd.f32 %v1246_v56, %v1184_v43  ;;  %v1114_v63 = vadd.f32 %v2379_v52, %v1113_v10  ;;  %v1189_v52 = vmul.f32 %v2409_v41, %v2409_v41 }
 0x167   :  { %v1115_v1 = vadd.f32 %v1114_v63, %v2402_v37  ;;  %v1248_v36 = vadd.f32 %v1247_v57, %v1185_v49  ;;  %v1190_v37 = vmul.f32 %v2432_v62, %v2432_v62 }
 0x169   :  { %v1249_v4 = vadd.f32 %v1248_v36, %v1186_v20  ;;  %v1116_v29 = vadd.f32 %v1115_v1, %v2413_v14 }
 0x16b   :  { %v1117_v11 = vadd.f32 %v2400_v16, %v1116_v29  ;;  %v1250_v13 = vadd.f32 %v1249_v4, %v1187_v9  ;;  %v1192_v16 = vmul.f32 %v2430_v59, %v2430_v59 }
 0x16d   :  { %v1251_v17 = vadd.f32 %v1250_v13, %v1188_v19  ;;  %v1118_v2 = vadd.f32 %v2409_v41, %v1117_v11  ;;  %v1193_v41 = vmul.f32 %v2439_v8, %v2439_v8 }
 0x16f   :  { %v1119_v18 = vadd.f32 %v1118_v2, %v2432_v62  ;;  %v1252_v3 = vadd.f32 %v1251_v17, %v1189_v52 }
 0x171   :  { %v1253_v55 = vadd.f32 %v1252_v3, %v1190_v37  ;;  %v1120_v14 = vadd.f32 %v1119_v18, %v2443_v33 }
 0x173   :  { %v1121_v22 = vadd.f32 %v2430_v59, %v1120_v14  ;;  %v1254_v23 = vadd.f32 %v1253_v55, %v1191_v58 }
 0x175   :  { %v1122_v60 = vadd.f32 %v2439_v8, %v1121_v22  ;;  %v1255_v27 = vadd.f32 %v1254_v23, %v1192_v16 }
 0x177   :  { %v1123_v62 = vrot.slane %v1122_v60, 4  ;;  %v1256_v12 = vadd.f32 %v1255_v27, %v1193_v41 }
 0x179   :  { %v1124_v0 = vadd.f32 %v1123_v62, %v1122_v60  ;;  %v1257_v5 = vrot.slane %v1256_v12, 4 }
 0x17b   :  { %v1125_v31 = vrot.slane %v1124_v0, 2  ;;  %v1258_v32 = vadd.f32 %v1257_v5, %v1256_v12 }
 0x17d   :  { %v1126_v34 = vadd.f32 %v1125_v31, %v1124_v0  ;;  %v1259_v33 = vrot.slane %v1258_v32, 2 }
 0x17f   :  { %v1127_v54 = vrot.slane %v1126_v34, 1  ;;  %v1260_v50 = vadd.f32 %v1259_v33, %v1258_v32 }
 0x181   :  { %v1128_v35 = vadd.f32 %v1127_v54, %v1126_v34  ;;  %v1261_v61 = vrot.slane %v1260_v50, 1 }
 0x183   :  { %1129 = vst [vmem:[%s2534_s5] sm:$0xff] %v1128_v35  ;;  %v1262_v59 = vadd.f32 %v1261_v61, %v1260_v50 }
 0x185   :  { %1263 = vst [vmem:[%s2535_s6] sm:$0xff] %v1262_v59 }

</bundles_post_ra>
